<compile_context>
chip_gen: v5e
topology: v5e:2x2
jax: 0.10.0
libtpu: 0.0.40
codegen_flags: <defaults>
</compile_context>

<pallas_src>
import math
import functools

import jax
import jax.numpy as jnp
from jax.experimental import pallas as pl
from jax.experimental.pallas import tpu as pltpu


# ----------------------------------------------------------------------------
# In-kernel math helpers (traced inside Pallas kernel bodies)
# ----------------------------------------------------------------------------
def _ln_math(x, g, b, eps=1e-6):
    """Annotated-transformer LayerNorm: unbiased std (ddof=1), eps added to std."""
    n = x.shape[-1]
    mean = jnp.mean(x, axis=-1, keepdims=True)
    xc = x - mean
    var = jnp.sum(xc * xc, axis=-1, keepdims=True) * (1.0 / (n - 1))
    inv = pl.reciprocal(jnp.sqrt(var) + eps, approx=True)     # EUP, keeps VALU free
    return g * xc * inv + b


def _attention_core(x, n, kv_src, m, wq, bq, wkv, bkv, wo, bo, *, h, d_k, d_model):
    """Multi-head attention + out-proj + residual.
    1/sqrt(d_k) is pre-folded into wq/bq.  Heads stay packed on the lane axis;
    concat(heads) @ W_o is computed as a per-head accumulation so the result is
    produced directly as a lane-dense (Sq, d_model) slab."""
    q = jnp.dot(n, wq, preferred_element_type=jnp.float32) + bq           # (Sq, D)
    kvp = jnp.dot(kv_src, wkv, preferred_element_type=jnp.float32) + bkv  # (Sk, 2D)
    k = kvp[:, :d_model]
    v = kvp[:, d_model:]
    keep = m != 0.0                                                       # (Sq, Sk)
    acc = None
    for hh in range(h):                                                   # static unroll
        lo = hh * d_k
        qh = q[:, lo:lo + d_k]
        kh = k[:, lo:lo + d_k]
        vh = v[:, lo:lo + d_k]
        s = jnp.dot(qh, kh.T, preferred_element_type=jnp.float32)         # (Sq, Sk)
        s = jnp.where(keep, s, jnp.float32(-1e9))
        s = s - jnp.max(s, axis=-1, keepdims=True)
        p = jnp.exp(s)
        p = p * pl.reciprocal(jnp.sum(p, axis=-1, keepdims=True), approx=True)
        ctx_h = jnp.dot(p, vh, preferred_element_type=jnp.float32)        # (Sq, d_k)
        part = jnp.dot(ctx_h, wo[lo:lo + d_k, :], preferred_element_type=jnp.float32)
        acc = part if acc is None else acc + part
    return x + acc + bo


# ----------------------------------------------------------------------------
# Pallas kernels (one per fused sublayer)
# ----------------------------------------------------------------------------
def _embed_kernel(x_ref, pe_ref, w_ref, b_ref, o_ref):
    # LinearEmbedding (sqrt(d_model) folded into w/b) + PositionalEncoding add
    o_ref[...] = (jnp.dot(x_ref[...], w_ref[...], preferred_element_type=jnp.float32)
                  + b_ref[...] + pe_ref[...])


def _self_attn_block_kernel(x_ref, m_ref, g_ref, bln_ref, wq_ref, bq_ref,
                            wkv_ref, bkv_ref, wo_ref, bo_ref, o_ref,
                            *, h, d_k, d_model):
    x = x_ref[...]                                    # (Sq, D)
    n = _ln_math(x, g_ref[...], bln_ref[...])
    o_ref[...] = _attention_core(x, n, n, m_ref[...],
                                 wq_ref[...], bq_ref[...], wkv_ref[...], bkv_ref[...],
                                 wo_ref[...], bo_ref[...],
                                 h=h, d_k=d_k, d_model=d_model)


def _cross_attn_block_kernel(x_ref, mem_ref, m_ref, g_ref, bln_ref, wq_ref, bq_ref,
                             wkv_ref, bkv_ref, wo_ref, bo_ref, o_ref,
                             *, h, d_k, d_model):
    x = x_ref[...]                                    # (Sq, D)
    n = _ln_math(x, g_ref[...], bln_ref[...])
    o_ref[...] = _attention_core(x, n, mem_ref[...], m_ref[...],
                                 wq_ref[...], bq_ref[...], wkv_ref[...], bkv_ref[...],
                                 wo_ref[...], bo_ref[...],
                                 h=h, d_k=d_k, d_model=d_model)


def _ff_block_kernel(x_ref, g_ref, bln_ref, w1_ref, b1_ref, w2_ref, b2_ref, o_ref):
    x = x_ref[...]                                    # (S, D)
    n = _ln_math(x, g_ref[...], bln_ref[...])
    h1 = jnp.maximum(
        jnp.dot(n, w1_ref[...], preferred_element_type=jnp.float32) + b1_ref[...], 0.0)
    o_ref[...] = (x + jnp.dot(h1, w2_ref[...], preferred_element_type=jnp.float32)
                  + b2_ref[...])


def _ln_kernel(x_ref, g_ref, b_ref, o_ref):
    o_ref[...] = _ln_math(x_ref[...], g_ref[...], b_ref[...])


def _ln_linear_kernel(x_ref, g_ref, bln_ref, w_ref, b_ref, o_ref):
    n = _ln_math(x_ref[...], g_ref[...], bln_ref[...])
    o_ref[...] = jnp.dot(n, w_ref[...], preferred_element_type=jnp.float32) + b_ref[...]


# ----------------------------------------------------------------------------
# pallas_call wrappers
# ----------------------------------------------------------------------------
def _rep_spec(arr):
    # whole 2-D array as a single block, revisited every grid step (no re-DMA)
    return pl.BlockSpec(arr.shape, lambda b: (0, 0))


def _batched_spec(S, F):
    # one batch element per grid step; batch dim squeezed out of the kernel ref
    return pl.BlockSpec((None, S, F), lambda b: (b, 0, 0))


_PARALLEL = pltpu.CompilerParams(dimension_semantics=("parallel",))


def embed_block(x, p, pe):
    B, S, F = x.shape
    D = p["w"].shape[1]
    return pl.pallas_call(
        _embed_kernel,
        grid=(B,),
        in_specs=[_batched_spec(S, F), _rep_spec(pe), _rep_spec(p["w"]), _rep_spec(p["b"])],
        out_specs=_batched_spec(S, D),
        out_shape=jax.ShapeDtypeStruct((B, S, D), jnp.float32),
        compiler_params=_PARALLEL,
    )(x, pe, p["w"], p["b"])


def mha_block(x, kv, mask, p, *, h, d_model):
    """Fused LayerNorm + MHA + out-proj + residual.  kv=None -> self-attention."""
    B, Sq, D = x.shape
    d_k = d_model // h
    self_attn = kv is None
    Sk = Sq if self_attn else kv.shape[1]
    weights = (p["ln_g"], p["ln_b"], p["wq"], p["bq"], p["wkv"], p["bkv"], p["wo"], p["bo"])

    in_specs = [_batched_spec(Sq, D)]
    args = [x]
    if self_attn:
        kern = _self_attn_block_kernel
    else:
        kern = _cross_attn_block_kernel
        in_specs.append(_batched_spec(Sk, D))
        args.append(kv)
    in_specs.append(_batched_spec(Sq, Sk))
    args.append(mask)
    in_specs += [_rep_spec(w) for w in weights]
    args += list(weights)

    return pl.pallas_call(
        functools.partial(kern, h=h, d_k=d_k, d_model=d_model),
        grid=(B,),
        in_specs=in_specs,
        out_specs=_batched_spec(Sq, D),
        out_shape=jax.ShapeDtypeStruct((B, Sq, D), jnp.float32),
        compiler_params=_PARALLEL,
    )(*args)


def ff_block(x, p):
    B, S, D = x.shape
    ws = (p["ln_g"], p["ln_b"], p["w1"], p["b1"], p["w2"], p["b2"])
    return pl.pallas_call(
        _ff_block_kernel,
        grid=(B,),
        in_specs=[_batched_spec(S, D)] + [_rep_spec(w) for w in ws],
        out_specs=_batched_spec(S, D),
        out_shape=jax.ShapeDtypeStruct((B, S, D), jnp.float32),
        compiler_params=_PARALLEL,
    )(x, *ws)


def layer_norm_full(x, g, b):
    B, S, D = x.shape
    y = pl.pallas_call(
        _ln_kernel,
        out_shape=jax.ShapeDtypeStruct((B * S, D), jnp.float32),
    )(x.reshape(B * S, D), g, b)
    return y.reshape(B, S, D)


def ln_linear(x, g, bln, w, b):
    B, S, D = x.shape
    out = w.shape[1]
    y = pl.pallas_call(
        _ln_linear_kernel,
        out_shape=jax.ShapeDtypeStruct((B * S, out), jnp.float32),
    )(x.reshape(B * S, D), g, bln, w, b)
    return y.reshape(B, S, out)


# ----------------------------------------------------------------------------
# Model glue (plain JAX: mask prep, PE constants, layer loop) — all under jit
# ----------------------------------------------------------------------------
def positional_encoding(seq_len, d_model):
    pos = jnp.arange(seq_len, dtype=jnp.float32)[:, None]
    div = jnp.exp(jnp.arange(0, d_model, 2, dtype=jnp.float32)
                  * (-math.log(10000.0) / d_model))
    pe = jnp.zeros((seq_len, d_model), jnp.float32)
    pe = pe.at[:, 0::2].set(jnp.sin(pos * div))
    pe = pe.at[:, 1::2].set(jnp.cos(pos * div))
    return pe


def individual_tf_forward(fp, src, tgt, src_mask, tgt_mask, *, h, d_model):
    B, Ss, _ = src.shape
    _, St, _ = tgt.shape

    pe_src = positional_encoding(Ss, d_model)
    pe_tgt = positional_encoding(St, d_model)

    # Masks: same across heads -> pass a single (B, Sq, Sk) slab per attention call.
    enc_self_mask = jnp.broadcast_to(src_mask.astype(jnp.float32), (B, Ss, Ss))
    dec_self_mask = tgt_mask.astype(jnp.float32)                        # (B, St, St)
    dec_cross_mask = jnp.broadcast_to(src_mask.astype(jnp.float32), (B, St, Ss))

    # Encoder
    x = embed_block(src, fp["src_embed"], pe_src)
    for lp in fp["enc_layers"]:
        x = mha_block(x, None, enc_self_mask, lp["self_attn"], h=h, d_model=d_model)
        x = ff_block(x, lp["ff"])
    memory = layer_norm_full(x, fp["enc_norm"]["g"], fp["enc_norm"]["b"])

    # Decoder
    y = embed_block(tgt, fp["tgt_embed"], pe_tgt)
    for lp in fp["dec_layers"]:
        y = mha_block(y, None, dec_self_mask, lp["self_attn"], h=h, d_model=d_model)
        y = mha_block(y, memory, dec_cross_mask, lp["src_attn"], h=h, d_model=d_model)
        y = ff_block(y, lp["ff"])

    # Final decoder LayerNorm fused with the Generator projection
    return ln_linear(y, fp["dec_norm"]["g"], fp["dec_norm"]["b"],
                     fp["generator"]["w"], fp["generator"]["b"])


# ----------------------------------------------------------------------------
# Parameter init (PyTorch-style: xavier_uniform weights, zero biases, LN=1/0)
# and one-time fusion/pre-folding (concat W_k|W_v, 1/sqrt(d_k), sqrt(d_model))
# ----------------------------------------------------------------------------
def init_params(key, enc_inp, dec_inp, dec_out, N, d_model, d_ff):
    keys = iter(jax.random.split(key, 512))

    def lin(k_in, k_out):
        a = math.sqrt(6.0 / (k_in + k_out))
        w = jax.random.uniform(next(keys), (k_in, k_out), jnp.float32, -a, a)
        return {"w": w, "b": jnp.zeros((k_out,), jnp.float32)}

    def attn():
        return {"q": lin(d_model, d_model), "k": lin(d_model, d_model),
                "v": lin(d_model, d_model), "o": lin(d_model, d_model)}

    def ff():
        return {"w1": lin(d_model, d_ff), "w2": lin(d_ff, d_model)}

    def ln():
        return {"g": jnp.ones((d_model,), jnp.float32),
                "b": jnp.zeros((d_model,), jnp.float32)}

    return {
        "src_embed": lin(enc_inp, d_model),
        "tgt_embed": lin(dec_inp, d_model),
        "enc_layers": [{"self_attn": attn(), "ff": ff(), "ln1": ln(), "ln2": ln()}
                       for _ in range(N)],
        "enc_norm": ln(),
        "dec_layers": [{"self_attn": attn(), "src_attn": attn(), "ff": ff(),
                        "ln1": ln(), "ln2": ln(), "ln3": ln()} for _ in range(N)],
        "dec_norm": ln(),
        "generator": lin(d_model, dec_out),
    }


def prepare_params(raw, d_model, h):
    """One-time (outside jit) fusion of the raw PyTorch-style parameters."""
    d_k = d_model // h
    qs = 1.0 / math.sqrt(d_k)
    emb_s = math.sqrt(d_model)
    row = lambda v: v.reshape(1, -1)

    def attn(a, lnp):
        return {"ln_g": row(lnp["g"]), "ln_b": row(lnp["b"]),
                "wq": a["q"]["w"] * qs, "bq": row(a["q"]["b"] * qs),
                "wkv": jnp.concatenate([a["k"]["w"], a["v"]["w"]], axis=1),
                "bkv": row(jnp.concatenate([a["k"]["b"], a["v"]["b"]], axis=0)),
                "wo": a["o"]["w"], "bo": row(a["o"]["b"])}

    def ff(f, lnp):
        return {"ln_g": row(lnp["g"]), "ln_b": row(lnp["b"]),
                "w1": f["w1"]["w"], "b1": row(f["w1"]["b"]),
                "w2": f["w2"]["w"], "b2": row(f["w2"]["b"])}

    def emb(e):
        return {"w": e["w"] * emb_s, "b": row(e["b"] * emb_s)}

    return {
        "src_embed": emb(raw["src_embed"]),
        "tgt_embed": emb(raw["tgt_embed"]),
        "enc_layers": [{"self_attn": attn(l["self_attn"], l["ln1"]),
                        "ff": ff(l["ff"], l["ln2"])} for l in raw["enc_layers"]],
        "enc_norm": {"g": row(raw["enc_norm"]["g"]), "b": row(raw["enc_norm"]["b"])},
        "dec_layers": [{"self_attn": attn(l["self_attn"], l["ln1"]),
                        "src_attn": attn(l["src_attn"], l["ln2"]),
                        "ff": ff(l["ff"], l["ln3"])} for l in raw["dec_layers"]],
        "dec_norm": {"g": row(raw["dec_norm"]["g"]), "b": row(raw["dec_norm"]["b"])},
        "generator": {"w": raw["generator"]["w"], "b": row(raw["generator"]["b"])},
    }


# ----------------------------------------------------------------------------
if __name__ == "__main__":
    # Small hyperparameters consistent with IndividualTF (trajectory forecasting):
    enc_inp_size, dec_inp_size, dec_out_size = 2, 3, 3
    N, d_model, d_ff, h = 2, 64, 128, 4
    B, S_src, S_tgt = 2, 8, 8

    key = jax.random.PRNGKey(0)
    kp, ks, kt = jax.random.split(key, 3)
    raw_params = init_params(kp, enc_inp_size, dec_inp_size, dec_out_size,
                             N, d_model, d_ff)
    fused_params = prepare_params(raw_params, d_model, h)

    src = jax.random.normal(ks, (B, S_src, enc_inp_size), jnp.float32)
    tgt = jax.random.normal(kt, (B, S_tgt, dec_inp_size), jnp.float32)
    src_mask = jnp.ones((B, 1, S_src), jnp.float32)
    tgt_mask = jnp.broadcast_to(
        jnp.tril(jnp.ones((S_tgt, S_tgt), jnp.float32))[None], (B, S_tgt, S_tgt))

    forward = jax.jit(functools.partial(individual_tf_forward, h=h, d_model=d_model))

    out = forward(fused_params, src, tgt, src_mask, tgt_mask)
    out = jax.block_until_ready(out)
    assert out.shape == (B, S_tgt, dec_out_size)
    assert bool(jnp.all(jnp.isfinite(out)))
    print("KERNEL_OK")
</pallas_src>

<mosaic_0001>
module attributes {stable_mosaic.version = 11 : i64} {
  func.func @_embed_kernel(%arg0: i32, %arg1: memref<1x8x2xf32, #tpu.memory_space<vmem>>, %arg2: memref<8x64xf32, #tpu.memory_space<vmem>>, %arg3: memref<2x64xf32, #tpu.memory_space<vmem>>, %arg4: memref<1x64xf32, #tpu.memory_space<vmem>>, %arg5: memref<1x8x64xf32, #tpu.memory_space<vmem>>) attributes {dimension_semantics = [#tpu.dimension_semantics<parallel>], iteration_bounds = array<i64: 2>, scalar_prefetch = 0 : i64, scratch_operands = 0 : i64, tpu.core_type = #tpu.core_type<tc>, window_params = [{transform_indices = @transform_0, window_bounds = array<i64: 1, 8, 2>}, {pipeline_mode = #tpu.pipeline_mode<synchronous>, transform_indices = @transform_1, window_bounds = array<i64: 8, 64>}, {pipeline_mode = #tpu.pipeline_mode<synchronous>, transform_indices = @transform_2, window_bounds = array<i64: 2, 64>}, {pipeline_mode = #tpu.pipeline_mode<synchronous>, transform_indices = @transform_3, window_bounds = array<i64: 1, 64>}, {transform_indices = @transform_4, window_bounds = array<i64: 1, 8, 64>}]} {
    %c0 = arith.constant 0 : index
    %c0_0 = arith.constant 0 : index
    %c0_1 = arith.constant 0 : index
    %0 = vector.load %arg1[%c0, %c0_0, %c0_1] : memref<1x8x2xf32, #tpu.memory_space<vmem>>, vector<1x8x2xf32>
    %1 = vector.shape_cast %0 : vector<1x8x2xf32> to vector<8x2xf32>
    %c0_2 = arith.constant 0 : index
    %c0_3 = arith.constant 0 : index
    %2 = vector.load %arg3[%c0_2, %c0_3] : memref<2x64xf32, #tpu.memory_space<vmem>>, vector<2x64xf32>
    %cst = arith.constant dense<0.000000e+00> : vector<8x64xf32>
    %3 = tpu.matmul %1, %2, %cst {dimension_numbers = #tpu.dot_dimension_numbers<[1], [0], [0], [1], [0, 0, 1, 1], [], []>} : vector<8x2xf32>, vector<2x64xf32>, vector<8x64xf32> -> vector<8x64xf32>
    %c0_4 = arith.constant 0 : index
    %c0_5 = arith.constant 0 : index
    %4 = vector.load %arg4[%c0_4, %c0_5] : memref<1x64xf32, #tpu.memory_space<vmem>>, vector<1x64xf32>
    %5 = vector.broadcast %4 : vector<1x64xf32> to vector<8x64xf32>
    %6 = arith.addf %3, %5 : vector<8x64xf32>
    %c0_6 = arith.constant 0 : index
    %c0_7 = arith.constant 0 : index
    %7 = vector.load %arg2[%c0_6, %c0_7] : memref<8x64xf32, #tpu.memory_space<vmem>>, vector<8x64xf32>
    %8 = arith.addf %6, %7 : vector<8x64xf32>
    %c0_8 = arith.constant 0 : index
    %c0_9 = arith.constant 0 : index
    %c0_10 = arith.constant 0 : index
    %9 = vector.load %arg5[%c0_8, %c0_9, %c0_10] : memref<1x8x64xf32, #tpu.memory_space<vmem>>, vector<1x8x64xf32>
    %10 = vector.shape_cast %9 : vector<1x8x64xf32> to vector<8x64xf32>
    %11 = vector.shape_cast %8 : vector<8x64xf32> to vector<1x8x64xf32>
    tpu.vector_store %arg5[%c0_8, %c0_9, %c0_10], %11 {strides = array<i32>} : memref<1x8x64xf32, #tpu.memory_space<vmem>>, vector<1x8x64xf32>,
    return
  }
  func.func @transform_0(%arg0: i32) -> (i32, i32, i32) {
    %c0_i32 = arith.constant 0 : i32
    %c0_i32_0 = arith.constant 0 : i32
    %c0_i32_1 = arith.constant 0 : i32
    return %arg0, %c0_i32, %c0_i32_0 : i32, i32, i32
  }
  func.func @transform_1(%arg0: i32) -> (i32, i32) {
    %c0_i32 = arith.constant 0 : i32
    %c0_i32_0 = arith.constant 0 : i32
    %c0_i32_1 = arith.constant 0 : i32
    return %c0_i32, %c0_i32_0 : i32, i32
  }
  func.func @transform_2(%arg0: i32) -> (i32, i32) {
    %c0_i32 = arith.constant 0 : i32
    %c0_i32_0 = arith.constant 0 : i32
    %c0_i32_1 = arith.constant 0 : i32
    return %c0_i32, %c0_i32_0 : i32, i32
  }
  func.func @transform_3(%arg0: i32) -> (i32, i32) {
    %c0_i32 = arith.constant 0 : i32
    %c0_i32_0 = arith.constant 0 : i32
    %c0_i32_1 = arith.constant 0 : i32
    return %c0_i32, %c0_i32_0 : i32, i32
  }
  func.func @transform_4(%arg0: i32) -> (i32, i32, i32) {
    %c0_i32 = arith.constant 0 : i32
    %c0_i32_0 = arith.constant 0 : i32
    %c0_i32_1 = arith.constant 0 : i32
    return %arg0, %c0_i32, %c0_i32_0 : i32, i32, i32
  }
}

module attributes {stable_mosaic.version = 11 : i64} {
  func.func @_self_attn_block_kernel(%arg0: i32, %arg1: memref<1x8x64xf32, #tpu.memory_space<vmem>>, %arg2: memref<1x8x8xf32, #tpu.memory_space<vmem>>, %arg3: memref<1x64xf32, #tpu.memory_space<vmem>>, %arg4: memref<1x64xf32, #tpu.memory_space<vmem>>, %arg5: memref<64x64xf32, #tpu.memory_space<vmem>>, %arg6: memref<1x64xf32, #tpu.memory_space<vmem>>, %arg7: memref<64x128xf32, #tpu.memory_space<vmem>>, %arg8: memref<1x128xf32, #tpu.memory_space<vmem>>, %arg9: memref<64x64xf32, #tpu.memory_space<vmem>>, %arg10: memref<1x64xf32, #tpu.memory_space<vmem>>, %arg11: memref<1x8x64xf32, #tpu.memory_space<vmem>>) attributes {dimension_semantics = [#tpu.dimension_semantics<parallel>], iteration_bounds = array<i64: 2>, scalar_prefetch = 0 : i64, scratch_operands = 0 : i64, tpu.core_type = #tpu.core_type<tc>, window_params = [{transform_indices = @transform_0, window_bounds = array<i64: 1, 8, 64>}, {transform_indices = @transform_1, window_bounds = array<i64: 1, 8, 8>}, {pipeline_mode = #tpu.pipeline_mode<synchronous>, transform_indices = @transform_2, window_bounds = array<i64: 1, 64>}, {pipeline_mode = #tpu.pipeline_mode<synchronous>, transform_indices = @transform_3, window_bounds = array<i64: 1, 64>}, {pipeline_mode = #tpu.pipeline_mode<synchronous>, transform_indices = @transform_4, window_bounds = array<i64: 64, 64>}, {pipeline_mode = #tpu.pipeline_mode<synchronous>, transform_indices = @transform_5, window_bounds = array<i64: 1, 64>}, {pipeline_mode = #tpu.pipeline_mode<synchronous>, transform_indices = @transform_6, window_bounds = array<i64: 64, 128>}, {pipeline_mode = #tpu.pipeline_mode<synchronous>, transform_indices = @transform_7, window_bounds = array<i64: 1, 128>}, {pipeline_mode = #tpu.pipeline_mode<synchronous>, transform_indices = @transform_8, window_bounds = array<i64: 64, 64>}, {pipeline_mode = #tpu.pipeline_mode<synchronous>, transform_indices = @transform_9, window_bounds = array<i64: 1, 64>}, {transform_indices = @transform_10, window_bounds = array<i64: 1, 8, 64>}]} {
    %c0 = arith.constant 0 : index
    %c0_0 = arith.constant 0 : index
    %c0_1 = arith.constant 0 : index
    %0 = vector.load %arg1[%c0, %c0_0, %c0_1] : memref<1x8x64xf32, #tpu.memory_space<vmem>>, vector<1x8x64xf32>
    %1 = vector.shape_cast %0 : vector<1x8x64xf32> to vector<8x64xf32>
    %c0_2 = arith.constant 0 : index
    %c0_3 = arith.constant 0 : index
    %2 = vector.load %arg3[%c0_2, %c0_3] : memref<1x64xf32, #tpu.memory_space<vmem>>, vector<1x64xf32>
    %c0_4 = arith.constant 0 : index
    %c0_5 = arith.constant 0 : index
    %3 = vector.load %arg4[%c0_4, %c0_5] : memref<1x64xf32, #tpu.memory_space<vmem>>, vector<1x64xf32>
    %cst = arith.constant dense<0.000000e+00> : vector<8xf32>
    %4 = vector.multi_reduction <add>, %1, %cst [1] : vector<8x64xf32> to vector<8xf32>
    %5 = vector.shape_cast %4 : vector<8xf32> to vector<8x1xf32>
    %cst_6 = arith.constant 6.400000e+01 : f32
    %6 = vector.broadcast %cst_6 : f32 to vector<8x1xf32>
    %7 = arith.divf %5, %6 : vector<8x1xf32>
    %8 = vector.broadcast %7 : vector<8x1xf32> to vector<8x64xf32>
    %9 = arith.subf %1, %8 : vector<8x64xf32>
    %10 = arith.mulf %9, %9 : vector<8x64xf32>
    %cst_7 = arith.constant dense<0.000000e+00> : vector<8xf32>
    %11 = vector.multi_reduction <add>, %10, %cst_7 [1] : vector<8x64xf32> to vector<8xf32>
    %12 = vector.shape_cast %11 : vector<8xf32> to vector<8x1xf32>
    %cst_8 = arith.constant 0.0158730168 : f32
    %13 = vector.broadcast %cst_8 : f32 to vector<8x1xf32>
    %14 = arith.mulf %12, %13 : vector<8x1xf32>
    %15 = math.sqrt %14 : vector<8x1xf32>
    %cst_9 = arith.constant 9.99999997E-7 : f32
    %16 = vector.broadcast %cst_9 : f32 to vector<8x1xf32>
    %17 = arith.addf %15, %16 : vector<8x1xf32>
    %18 = tpu.reciprocal %17 {approx = true} : vector<8x1xf32> -> vector<8x1xf32>
    %19 = vector.broadcast %2 : vector<1x64xf32> to vector<8x64xf32>
    %20 = arith.mulf %19, %9 : vector<8x64xf32>
    %21 = vector.broadcast %18 : vector<8x1xf32> to vector<8x64xf32>
    %22 = arith.mulf %20, %21 : vector<8x64xf32>
    %23 = vector.broadcast %3 : vector<1x64xf32> to vector<8x64xf32>
    %24 = arith.addf %22, %23 : vector<8x64xf32>
    %c0_10 = arith.constant 0 : index
    %c0_11 = arith.constant 0 : index
    %c0_12 = arith.constant 0 : index
    %25 = vector.load %arg2[%c0_10, %c0_11, %c0_12] : memref<1x8x8xf32, #tpu.memory_space<vmem>>, vector<1x8x8xf32>
    %26 = vector.shape_cast %25 : vector<1x8x8xf32> to vector<8x8xf32>
    %c0_13 = arith.constant 0 : index
    %c0_14 = arith.constant 0 : index
    %27 = vector.load %arg5[%c0_13, %c0_14] : memref<64x64xf32, #tpu.memory_space<vmem>>, vector<64x64xf32>
    %c0_15 = arith.constant 0 : index
    %c0_16 = arith.constant 0 : index
    %28 = vector.load %arg6[%c0_15, %c0_16] : memref<1x64xf32, #tpu.memory_space<vmem>>, vector<1x64xf32>
    %c0_17 = arith.constant 0 : index
    %c0_18 = arith.constant 0 : index
    %29 = vector.load %arg7[%c0_17, %c0_18] : memref<64x128xf32, #tpu.memory_space<vmem>>, vector<64x128xf32>
    %c0_19 = arith.constant 0 : index
    %c0_20 = arith.constant 0 : index
    %30 = vector.load %arg8[%c0_19, %c0_20] : memref<1x128xf32, #tpu.memory_space<vmem>>, vector<1x128xf32>
    %c0_21 = arith.constant 0 : index
    %c0_22 = arith.constant 0 : index
    %31 = vector.load %arg9[%c0_21, %c0_22] : memref<64x64xf32, #tpu.memory_space<vmem>>, vector<64x64xf32>
    %c0_23 = arith.constant 0 : index
    %c0_24 = arith.constant 0 : index
    %32 = vector.load %arg10[%c0_23, %c0_24] : memref<1x64xf32, #tpu.memory_space<vmem>>, vector<1x64xf32>
    %cst_25 = arith.constant dense<0.000000e+00> : vector<8x64xf32>
    %33 = tpu.matmul %24, %27, %cst_25 {dimension_numbers = #tpu.dot_dimension_numbers<[1], [0], [0], [1], [0, 0, 1, 1], [], []>} : vector<8x64xf32>, vector<64x64xf32>, vector<8x64xf32> -> vector<8x64xf32>
    %34 = vector.broadcast %28 : vector<1x64xf32> to vector<8x64xf32>
    %35 = arith.addf %33, %34 : vector<8x64xf32>
    %cst_26 = arith.constant dense<0.000000e+00> : vector<8x128xf32>
    %36 = tpu.matmul %24, %29, %cst_26 {dimension_numbers = #tpu.dot_dimension_numbers<[1], [0], [0], [1], [0, 0, 1, 1], [], []>} : vector<8x64xf32>, vector<64x128xf32>, vector<8x128xf32> -> vector<8x128xf32>
    %37 = vector.broadcast %30 : vector<1x128xf32> to vector<8x128xf32>
    %38 = arith.addf %36, %37 : vector<8x128xf32>
    %39 = vector.extract_strided_slice %38 {offsets = [0, 0], sizes = [8, 64], strides = [1, 1]} : vector<8x128xf32> to vector<8x64xf32>
    %40 = vector.extract_strided_slice %38 {offsets = [0, 64], sizes = [8, 64], strides = [1, 1]} : vector<8x128xf32> to vector<8x64xf32>
    %cst_27 = arith.constant 0.000000e+00 : f32
    %41 = vector.broadcast %cst_27 : f32 to vector<8x8xf32>
    %42 = arith.cmpf one, %26, %41 : vector<8x8xf32>
    %43 = vector.extract_strided_slice %35 {offsets = [0, 0], sizes = [8, 16], strides = [1, 1]} : vector<8x64xf32> to vector<8x16xf32>
    %44 = vector.extract_strided_slice %39 {offsets = [0, 0], sizes = [8, 16], strides = [1, 1]} : vector<8x64xf32> to vector<8x16xf32>
    %45 = vector.extract_strided_slice %40 {offsets = [0, 0], sizes = [8, 16], strides = [1, 1]} : vector<8x64xf32> to vector<8x16xf32>
    %46 = tpu.transpose %44, [1, 0] : vector<8x16xf32> -> vector<16x8xf32>
    %cst_28 = arith.constant dense<0.000000e+00> : vector<8x8xf32>
    %47 = tpu.matmul %43, %46, %cst_28 {dimension_numbers = #tpu.dot_dimension_numbers<[1], [0], [0], [1], [0, 0, 1, 1], [], []>} : vector<8x16xf32>, vector<16x8xf32>, vector<8x8xf32> -> vector<8x8xf32>
    %cst_29 = arith.constant -1.000000e+09 : f32
    %48 = vector.broadcast %cst_29 : f32 to vector<8x8xf32>
    %49 = arith.select %42, %47, %48 : vector<8x8xi1>, vector<8x8xf32>
    %cst_30 = arith.constant dense<0xFF800000> : vector<8xf32>
    %50 = vector.multi_reduction <maximumf>, %49, %cst_30 [1] : vector<8x8xf32> to vector<8xf32>
    %51 = vector.shape_cast %50 : vector<8xf32> to vector<8x1xf32>
    %52 = vector.broadcast %51 : vector<8x1xf32> to vector<8x8xf32>
    %53 = arith.subf %49, %52 : vector<8x8xf32>
    %54 = math.exp %53 : vector<8x8xf32>
    %cst_31 = arith.constant dense<0.000000e+00> : vector<8xf32>
    %55 = vector.multi_reduction <add>, %54, %cst_31 [1] : vector<8x8xf32> to vector<8xf32>
    %56 = vector.shape_cast %55 : vector<8xf32> to vector<8x1xf32>
    %57 = tpu.reciprocal %56 {approx = true} : vector<8x1xf32> -> vector<8x1xf32>
    %58 = vector.broadcast %57 : vector<8x1xf32> to vector<8x8xf32>
    %59 = arith.mulf %54, %58 : vector<8x8xf32>
    %cst_32 = arith.constant dense<0.000000e+00> : vector<8x16xf32>
    %60 = tpu.matmul %59, %45, %cst_32 {dimension_numbers = #tpu.dot_dimension_numbers<[1], [0], [0], [1], [0, 0, 1, 1], [], []>} : vector<8x8xf32>, vector<8x16xf32>, vector<8x16xf32> -> vector<8x16xf32>
    %61 = vector.extract_strided_slice %31 {offsets = [0, 0], sizes = [16, 64], strides = [1, 1]} : vector<64x64xf32> to vector<16x64xf32>
    %cst_33 = arith.constant dense<0.000000e+00> : vector<8x64xf32>
    %62 = tpu.matmul %60, %61, %cst_33 {dimension_numbers = #tpu.dot_dimension_numbers<[1], [0], [0], [1], [0, 0, 1, 1], [], []>} : vector<8x16xf32>, vector<16x64xf32>, vector<8x64xf32> -> vector<8x64xf32>
    %63 = vector.extract_strided_slice %35 {offsets = [0, 16], sizes = [8, 16], strides = [1, 1]} : vector<8x64xf32> to vector<8x16xf32>
    %64 = vector.extract_strided_slice %39 {offsets = [0, 16], sizes = [8, 16], strides = [1, 1]} : vector<8x64xf32> to vector<8x16xf32>
    %65 = vector.extract_strided_slice %40 {offsets = [0, 16], sizes = [8, 16], strides = [1, 1]} : vector<8x64xf32> to vector<8x16xf32>
    %66 = tpu.transpose %64, [1, 0] : vector<8x16xf32> -> vector<16x8xf32>
    %cst_34 = arith.constant dense<0.000000e+00> : vector<8x8xf32>
    %67 = tpu.matmul %63, %66, %cst_34 {dimension_numbers = #tpu.dot_dimension_numbers<[1], [0], [0], [1], [0, 0, 1, 1], [], []>} : vector<8x16xf32>, vector<16x8xf32>, vector<8x8xf32> -> vector<8x8xf32>
    %cst_35 = arith.constant -1.000000e+09 : f32
    %68 = vector.broadcast %cst_35 : f32 to vector<8x8xf32>
    %69 = arith.select %42, %67, %68 : vector<8x8xi1>, vector<8x8xf32>
    %cst_36 = arith.constant dense<0xFF800000> : vector<8xf32>
    %70 = vector.multi_reduction <maximumf>, %69, %cst_36 [1] : vector<8x8xf32> to vector<8xf32>
    %71 = vector.shape_cast %70 : vector<8xf32> to vector<8x1xf32>
    %72 = vector.broadcast %71 : vector<8x1xf32> to vector<8x8xf32>
    %73 = arith.subf %69, %72 : vector<8x8xf32>
    %74 = math.exp %73 : vector<8x8xf32>
    %cst_37 = arith.constant dense<0.000000e+00> : vector<8xf32>
    %75 = vector.multi_reduction <add>, %74, %cst_37 [1] : vector<8x8xf32> to vector<8xf32>
    %76 = vector.shape_cast %75 : vector<8xf32> to vector<8x1xf32>
    %77 = tpu.reciprocal %76 {approx = true} : vector<8x1xf32> -> vector<8x1xf32>
    %78 = vector.broadcast %77 : vector<8x1xf32> to vector<8x8xf32>
    %79 = arith.mulf %74, %78 : vector<8x8xf32>
    %cst_38 = arith.constant dense<0.000000e+00> : vector<8x16xf32>
    %80 = tpu.matmul %79, %65, %cst_38 {dimension_numbers = #tpu.dot_dimension_numbers<[1], [0], [0], [1], [0, 0, 1, 1], [], []>} : vector<8x8xf32>, vector<8x16xf32>, vector<8x16xf32> -> vector<8x16xf32>
    %81 = vector.extract_strided_slice %31 {offsets = [16, 0], sizes = [16, 64], strides = [1, 1]} : vector<64x64xf32> to vector<16x64xf32>
    %cst_39 = arith.constant dense<0.000000e+00> : vector<8x64xf32>
    %82 = tpu.matmul %80, %81, %cst_39 {dimension_numbers = #tpu.dot_dimension_numbers<[1], [0], [0], [1], [0, 0, 1, 1], [], []>} : vector<8x16xf32>, vector<16x64xf32>, vector<8x64xf32> -> vector<8x64xf32>
    %83 = arith.addf %62, %82 : vector<8x64xf32>
    %84 = vector.extract_strided_slice %35 {offsets = [0, 32], sizes = [8, 16], strides = [1, 1]} : vector<8x64xf32> to vector<8x16xf32>
    %85 = vector.extract_strided_slice %39 {offsets = [0, 32], sizes = [8, 16], strides = [1, 1]} : vector<8x64xf32> to vector<8x16xf32>
    %86 = vector.extract_strided_slice %40 {offsets = [0, 32], sizes = [8, 16], strides = [1, 1]} : vector<8x64xf32> to vector<8x16xf32>
    %87 = tpu.transpose %85, [1, 0] : vector<8x16xf32> -> vector<16x8xf32>
    %cst_40 = arith.constant dense<0.000000e+00> : vector<8x8xf32>
    %88 = tpu.matmul %84, %87, %cst_40 {dimension_numbers = #tpu.dot_dimension_numbers<[1], [0], [0], [1], [0, 0, 1, 1], [], []>} : vector<8x16xf32>, vector<16x8xf32>, vector<8x8xf32> -> vector<8x8xf32>
    %cst_41 = arith.constant -1.000000e+09 : f32
    %89 = vector.broadcast %cst_41 : f32 to vector<8x8xf32>
    %90 = arith.select %42, %88, %89 : vector<8x8xi1>, vector<8x8xf32>
    %cst_42 = arith.constant dense<0xFF800000> : vector<8xf32>
    %91 = vector.multi_reduction <maximumf>, %90, %cst_42 [1] : vector<8x8xf32> to vector<8xf32>
    %92 = vector.shape_cast %91 : vector<8xf32> to vector<8x1xf32>
    %93 = vector.broadcast %92 : vector<8x1xf32> to vector<8x8xf32>
    %94 = arith.subf %90, %93 : vector<8x8xf32>
    %95 = math.exp %94 : vector<8x8xf32>
    %cst_43 = arith.constant dense<0.000000e+00> : vector<8xf32>
    %96 = vector.multi_reduction <add>, %95, %cst_43 [1] : vector<8x8xf32> to vector<8xf32>
    %97 = vector.shape_cast %96 : vector<8xf32> to vector<8x1xf32>
    %98 = tpu.reciprocal %97 {approx = true} : vector<8x1xf32> -> vector<8x1xf32>
    %99 = vector.broadcast %98 : vector<8x1xf32> to vector<8x8xf32>
    %100 = arith.mulf %95, %99 : vector<8x8xf32>
    %cst_44 = arith.constant dense<0.000000e+00> : vector<8x16xf32>
    %101 = tpu.matmul %100, %86, %cst_44 {dimension_numbers = #tpu.dot_dimension_numbers<[1], [0], [0], [1], [0, 0, 1, 1], [], []>} : vector<8x8xf32>, vector<8x16xf32>, vector<8x16xf32> -> vector<8x16xf32>
    %102 = vector.extract_strided_slice %31 {offsets = [32, 0], sizes = [16, 64], strides = [1, 1]} : vector<64x64xf32> to vector<16x64xf32>
    %cst_45 = arith.constant dense<0.000000e+00> : vector<8x64xf32>
    %103 = tpu.matmul %101, %102, %cst_45 {dimension_numbers = #tpu.dot_dimension_numbers<[1], [0], [0], [1], [0, 0, 1, 1], [], []>} : vector<8x16xf32>, vector<16x64xf32>, vector<8x64xf32> -> vector<8x64xf32>
    %104 = arith.addf %83, %103 : vector<8x64xf32>
    %105 = vector.extract_strided_slice %35 {offsets = [0, 48], sizes = [8, 16], strides = [1, 1]} : vector<8x64xf32> to vector<8x16xf32>
    %106 = vector.extract_strided_slice %39 {offsets = [0, 48], sizes = [8, 16], strides = [1, 1]} : vector<8x64xf32> to vector<8x16xf32>
    %107 = vector.extract_strided_slice %40 {offsets = [0, 48], sizes = [8, 16], strides = [1, 1]} : vector<8x64xf32> to vector<8x16xf32>
    %108 = tpu.transpose %106, [1, 0] : vector<8x16xf32> -> vector<16x8xf32>
    %cst_46 = arith.constant dense<0.000000e+00> : vector<8x8xf32>
    %109 = tpu.matmul %105, %108, %cst_46 {dimension_numbers = #tpu.dot_dimension_numbers<[1], [0], [0], [1], [0, 0, 1, 1], [], []>} : vector<8x16xf32>, vector<16x8xf32>, vector<8x8xf32> -> vector<8x8xf32>
    %cst_47 = arith.constant -1.000000e+09 : f32
    %110 = vector.broadcast %cst_47 : f32 to vector<8x8xf32>
    %111 = arith.select %42, %109, %110 : vector<8x8xi1>, vector<8x8xf32>
    %cst_48 = arith.constant dense<0xFF800000> : vector<8xf32>
    %112 = vector.multi_reduction <maximumf>, %111, %cst_48 [1] : vector<8x8xf32> to vector<8xf32>
    %113 = vector.shape_cast %112 : vector<8xf32> to vector<8x1xf32>
    %114 = vector.broadcast %113 : vector<8x1xf32> to vector<8x8xf32>
    %115 = arith.subf %111, %114 : vector<8x8xf32>
    %116 = math.exp %115 : vector<8x8xf32>
    %cst_49 = arith.constant dense<0.000000e+00> : vector<8xf32>
    %117 = vector.multi_reduction <add>, %116, %cst_49 [1] : vector<8x8xf32> to vector<8xf32>
    %118 = vector.shape_cast %117 : vector<8xf32> to vector<8x1xf32>
    %119 = tpu.reciprocal %118 {approx = true} : vector<8x1xf32> -> vector<8x1xf32>
    %120 = vector.broadcast %119 : vector<8x1xf32> to vector<8x8xf32>
    %121 = arith.mulf %116, %120 : vector<8x8xf32>
    %cst_50 = arith.constant dense<0.000000e+00> : vector<8x16xf32>
    %122 = tpu.matmul %121, %107, %cst_50 {dimension_numbers = #tpu.dot_dimension_numbers<[1], [0], [0], [1], [0, 0, 1, 1], [], []>} : vector<8x8xf32>, vector<8x16xf32>, vector<8x16xf32> -> vector<8x16xf32>
    %123 = vector.extract_strided_slice %31 {offsets = [48, 0], sizes = [16, 64], strides = [1, 1]} : vector<64x64xf32> to vector<16x64xf32>
    %cst_51 = arith.constant dense<0.000000e+00> : vector<8x64xf32>
    %124 = tpu.matmul %122, %123, %cst_51 {dimension_numbers = #tpu.dot_dimension_numbers<[1], [0], [0], [1], [0, 0, 1, 1], [], []>} : vector<8x16xf32>, vector<16x64xf32>, vector<8x64xf32> -> vector<8x64xf32>
    %125 = arith.addf %104, %124 : vector<8x64xf32>
    %126 = arith.addf %1, %125 : vector<8x64xf32>
    %127 = vector.broadcast %32 : vector<1x64xf32> to vector<8x64xf32>
    %128 = arith.addf %126, %127 : vector<8x64xf32>
    %c0_52 = arith.constant 0 : index
    %c0_53 = arith.constant 0 : index
    %c0_54 = arith.constant 0 : index
    %129 = vector.load %arg11[%c0_52, %c0_53, %c0_54] : memref<1x8x64xf32, #tpu.memory_space<vmem>>, vector<1x8x64xf32>
    %130 = vector.shape_cast %129 : vector<1x8x64xf32> to vector<8x64xf32>
    %131 = vector.shape_cast %128 : vector<8x64xf32> to vector<1x8x64xf32>
    tpu.vector_store %arg11[%c0_52, %c0_53, %c0_54], %131 {strides = array<i32>} : memref<1x8x64xf32, #tpu.memory_space<vmem>>, vector<1x8x64xf32>,
    return
  }
  func.func @transform_0(%arg0: i32) -> (i32, i32, i32) {
    %c0_i32 = arith.constant 0 : i32
    %c0_i32_0 = arith.constant 0 : i32
    %c0_i32_1 = arith.constant 0 : i32
    return %arg0, %c0_i32, %c0_i32_0 : i32, i32, i32
  }
  func.func @transform_1(%arg0: i32) -> (i32, i32, i32) {
    %c0_i32 = arith.constant 0 : i32
    %c0_i32_0 = arith.constant 0 : i32
    %c0_i32_1 = arith.constant 0 : i32
    return %arg0, %c0_i32, %c0_i32_0 : i32, i32, i32
  }
  func.func @transform_2(%arg0: i32) -> (i32, i32) {
    %c0_i32 = arith.constant 0 : i32
    %c0_i32_0 = arith.constant 0 : i32
    %c0_i32_1 = arith.constant 0 : i32
    return %c0_i32, %c0_i32_0 : i32, i32
  }
  func.func @transform_3(%arg0: i32) -> (i32, i32) {
    %c0_i32 = arith.constant 0 : i32
    %c0_i32_0 = arith.constant 0 : i32
    %c0_i32_1 = arith.constant 0 : i32
    return %c0_i32, %c0_i32_0 : i32, i32
  }
  func.func @transform_4(%arg0: i32) -> (i32, i32) {
    %c0_i32 = arith.constant 0 : i32
    %c0_i32_0 = arith.constant 0 : i32
    %c0_i32_1 = arith.constant 0 : i32
    return %c0_i32, %c0_i32_0 : i32, i32
  }
  func.func @transform_5(%arg0: i32) -> (i32, i32) {
    %c0_i32 = arith.constant 0 : i32
    %c0_i32_0 = arith.constant 0 : i32
    %c0_i32_1 = arith.constant 0 : i32
    return %c0_i32, %c0_i32_0 : i32, i32
  }
  func.func @transform_6(%arg0: i32) -> (i32, i32) {
    %c0_i32 = arith.constant 0 : i32
    %c0_i32_0 = arith.constant 0 : i32
    %c0_i32_1 = arith.constant 0 : i32
    return %c0_i32, %c0_i32_0 : i32, i32
  }
  func.func @transform_7(%arg0: i32) -> (i32, i32) {
    %c0_i32 = arith.constant 0 : i32
    %c0_i32_0 = arith.constant 0 : i32
    %c0_i32_1 = arith.constant 0 : i32
    return %c0_i32, %c0_i32_0 : i32, i32
  }
  func.func @transform_8(%arg0: i32) -> (i32, i32) {
    %c0_i32 = arith.constant 0 : i32
    %c0_i32_0 = arith.constant 0 : i32
    %c0_i32_1 = arith.constant 0 : i32
    return %c0_i32, %c0_i32_0 : i32, i32
  }
  func.func @transform_9(%arg0: i32) -> (i32, i32) {
    %c0_i32 = arith.constant 0 : i32
    %c0_i32_0 = arith.constant 0 : i32
    %c0_i32_1 = arith.constant 0 : i32
    return %c0_i32, %c0_i32_0 : i32, i32
  }
  func.func @transform_10(%arg0: i32) -> (i32, i32, i32) {
    %c0_i32 = arith.constant 0 : i32
    %c0_i32_0 = arith.constant 0 : i32
    %c0_i32_1 = arith.constant 0 : i32
    return %arg0, %c0_i32, %c0_i32_0 : i32, i32, i32
  }
}

module attributes {stable_mosaic.version = 11 : i64} {
  func.func @_ff_block_kernel(%arg0: i32, %arg1: memref<1x8x64xf32, #tpu.memory_space<vmem>>, %arg2: memref<1x64xf32, #tpu.memory_space<vmem>>, %arg3: memref<1x64xf32, #tpu.memory_space<vmem>>, %arg4: memref<64x128xf32, #tpu.memory_space<vmem>>, %arg5: memref<1x128xf32, #tpu.memory_space<vmem>>, %arg6: memref<128x64xf32, #tpu.memory_space<vmem>>, %arg7: memref<1x64xf32, #tpu.memory_space<vmem>>, %arg8: memref<1x8x64xf32, #tpu.memory_space<vmem>>) attributes {dimension_semantics = [#tpu.dimension_semantics<parallel>], iteration_bounds = array<i64: 2>, scalar_prefetch = 0 : i64, scratch_operands = 0 : i64, tpu.core_type = #tpu.core_type<tc>, window_params = [{transform_indices = @transform_0, window_bounds = array<i64: 1, 8, 64>}, {pipeline_mode = #tpu.pipeline_mode<synchronous>, transform_indices = @transform_1, window_bounds = array<i64: 1, 64>}, {pipeline_mode = #tpu.pipeline_mode<synchronous>, transform_indices = @transform_2, window_bounds = array<i64: 1, 64>}, {pipeline_mode = #tpu.pipeline_mode<synchronous>, transform_indices = @transform_3, window_bounds = array<i64: 64, 128>}, {pipeline_mode = #tpu.pipeline_mode<synchronous>, transform_indices = @transform_4, window_bounds = array<i64: 1, 128>}, {pipeline_mode = #tpu.pipeline_mode<synchronous>, transform_indices = @transform_5, window_bounds = array<i64: 128, 64>}, {pipeline_mode = #tpu.pipeline_mode<synchronous>, transform_indices = @transform_6, window_bounds = array<i64: 1, 64>}, {transform_indices = @transform_7, window_bounds = array<i64: 1, 8, 64>}]} {
    %c0 = arith.constant 0 : index
    %c0_0 = arith.constant 0 : index
    %c0_1 = arith.constant 0 : index
    %0 = vector.load %arg1[%c0, %c0_0, %c0_1] : memref<1x8x64xf32, #tpu.memory_space<vmem>>, vector<1x8x64xf32>
    %1 = vector.shape_cast %0 : vector<1x8x64xf32> to vector<8x64xf32>
    %c0_2 = arith.constant 0 : index
    %c0_3 = arith.constant 0 : index
    %2 = vector.load %arg2[%c0_2, %c0_3] : memref<1x64xf32, #tpu.memory_space<vmem>>, vector<1x64xf32>
    %c0_4 = arith.constant 0 : index
    %c0_5 = arith.constant 0 : index
    %3 = vector.load %arg3[%c0_4, %c0_5] : memref<1x64xf32, #tpu.memory_space<vmem>>, vector<1x64xf32>
    %cst = arith.constant dense<0.000000e+00> : vector<8xf32>
    %4 = vector.multi_reduction <add>, %1, %cst [1] : vector<8x64xf32> to vector<8xf32>
    %5 = vector.shape_cast %4 : vector<8xf32> to vector<8x1xf32>
    %cst_6 = arith.constant 6.400000e+01 : f32
    %6 = vector.broadcast %cst_6 : f32 to vector<8x1xf32>
    %7 = arith.divf %5, %6 : vector<8x1xf32>
    %8 = vector.broadcast %7 : vector<8x1xf32> to vector<8x64xf32>
    %9 = arith.subf %1, %8 : vector<8x64xf32>
    %10 = arith.mulf %9, %9 : vector<8x64xf32>
    %cst_7 = arith.constant dense<0.000000e+00> : vector<8xf32>
    %11 = vector.multi_reduction <add>, %10, %cst_7 [1] : vector<8x64xf32> to vector<8xf32>
    %12 = vector.shape_cast %11 : vector<8xf32> to vector<8x1xf32>
    %cst_8 = arith.constant 0.0158730168 : f32
    %13 = vector.broadcast %cst_8 : f32 to vector<8x1xf32>
    %14 = arith.mulf %12, %13 : vector<8x1xf32>
    %15 = math.sqrt %14 : vector<8x1xf32>
    %cst_9 = arith.constant 9.99999997E-7 : f32
    %16 = vector.broadcast %cst_9 : f32 to vector<8x1xf32>
    %17 = arith.addf %15, %16 : vector<8x1xf32>
    %18 = tpu.reciprocal %17 {approx = true} : vector<8x1xf32> -> vector<8x1xf32>
    %19 = vector.broadcast %2 : vector<1x64xf32> to vector<8x64xf32>
    %20 = arith.mulf %19, %9 : vector<8x64xf32>
    %21 = vector.broadcast %18 : vector<8x1xf32> to vector<8x64xf32>
    %22 = arith.mulf %20, %21 : vector<8x64xf32>
    %23 = vector.broadcast %3 : vector<1x64xf32> to vector<8x64xf32>
    %24 = arith.addf %22, %23 : vector<8x64xf32>
    %c0_10 = arith.constant 0 : index
    %c0_11 = arith.constant 0 : index
    %25 = vector.load %arg4[%c0_10, %c0_11] : memref<64x128xf32, #tpu.memory_space<vmem>>, vector<64x128xf32>
    %cst_12 = arith.constant dense<0.000000e+00> : vector<8x128xf32>
    %26 = tpu.matmul %24, %25, %cst_12 {dimension_numbers = #tpu.dot_dimension_numbers<[1], [0], [0], [1], [0, 0, 1, 1], [], []>} : vector<8x64xf32>, vector<64x128xf32>, vector<8x128xf32> -> vector<8x128xf32>
    %c0_13 = arith.constant 0 : index
    %c0_14 = arith.constant 0 : index
    %27 = vector.load %arg5[%c0_13, %c0_14] : memref<1x128xf32, #tpu.memory_space<vmem>>, vector<1x128xf32>
    %28 = vector.broadcast %27 : vector<1x128xf32> to vector<8x128xf32>
    %29 = arith.addf %26, %28 : vector<8x128xf32>
    %cst_15 = arith.constant 0.000000e+00 : f32
    %30 = vector.broadcast %cst_15 : f32 to vector<8x128xf32>
    %31 = arith.maximumf %29, %30 : vector<8x128xf32>
    %c0_16 = arith.constant 0 : index
    %c0_17 = arith.constant 0 : index
    %32 = vector.load %arg6[%c0_16, %c0_17] : memref<128x64xf32, #tpu.memory_space<vmem>>, vector<128x64xf32>
    %cst_18 = arith.constant dense<0.000000e+00> : vector<8x64xf32>
    %33 = tpu.matmul %31, %32, %cst_18 {dimension_numbers = #tpu.dot_dimension_numbers<[1], [0], [0], [1], [0, 0, 1, 1], [], []>} : vector<8x128xf32>, vector<128x64xf32>, vector<8x64xf32> -> vector<8x64xf32>
    %34 = arith.addf %1, %33 : vector<8x64xf32>
    %c0_19 = arith.constant 0 : index
    %c0_20 = arith.constant 0 : index
    %35 = vector.load %arg7[%c0_19, %c0_20] : memref<1x64xf32, #tpu.memory_space<vmem>>, vector<1x64xf32>
    %36 = vector.broadcast %35 : vector<1x64xf32> to vector<8x64xf32>
    %37 = arith.addf %34, %36 : vector<8x64xf32>
    %c0_21 = arith.constant 0 : index
    %c0_22 = arith.constant 0 : index
    %c0_23 = arith.constant 0 : index
    %38 = vector.load %arg8[%c0_21, %c0_22, %c0_23] : memref<1x8x64xf32, #tpu.memory_space<vmem>>, vector<1x8x64xf32>
    %39 = vector.shape_cast %38 : vector<1x8x64xf32> to vector<8x64xf32>
    %40 = vector.shape_cast %37 : vector<8x64xf32> to vector<1x8x64xf32>
    tpu.vector_store %arg8[%c0_21, %c0_22, %c0_23], %40 {strides = array<i32>} : memref<1x8x64xf32, #tpu.memory_space<vmem>>, vector<1x8x64xf32>,
    return
  }
  func.func @transform_0(%arg0: i32) -> (i32, i32, i32) {
    %c0_i32 = arith.constant 0 : i32
    %c0_i32_0 = arith.constant 0 : i32
    %c0_i32_1 = arith.constant 0 : i32
    return %arg0, %c0_i32, %c0_i32_0 : i32, i32, i32
  }
  func.func @transform_1(%arg0: i32) -> (i32, i32) {
    %c0_i32 = arith.constant 0 : i32
    %c0_i32_0 = arith.constant 0 : i32
    %c0_i32_1 = arith.constant 0 : i32
    return %c0_i32, %c0_i32_0 : i32, i32
  }
  func.func @transform_2(%arg0: i32) -> (i32, i32) {
    %c0_i32 = arith.constant 0 : i32
    %c0_i32_0 = arith.constant 0 : i32
    %c0_i32_1 = arith.constant 0 : i32
    return %c0_i32, %c0_i32_0 : i32, i32
  }
  func.func @transform_3(%arg0: i32) -> (i32, i32) {
    %c0_i32 = arith.constant 0 : i32
    %c0_i32_0 = arith.constant 0 : i32
    %c0_i32_1 = arith.constant 0 : i32
    return %c0_i32, %c0_i32_0 : i32, i32
  }
  func.func @transform_4(%arg0: i32) -> (i32, i32) {
    %c0_i32 = arith.constant 0 : i32
    %c0_i32_0 = arith.constant 0 : i32
    %c0_i32_1 = arith.constant 0 : i32
    return %c0_i32, %c0_i32_0 : i32, i32
  }
  func.func @transform_5(%arg0: i32) -> (i32, i32) {
    %c0_i32 = arith.constant 0 : i32
    %c0_i32_0 = arith.constant 0 : i32
    %c0_i32_1 = arith.constant 0 : i32
    return %c0_i32, %c0_i32_0 : i32, i32
  }
  func.func @transform_6(%arg0: i32) -> (i32, i32) {
    %c0_i32 = arith.constant 0 : i32
    %c0_i32_0 = arith.constant 0 : i32
    %c0_i32_1 = arith.constant 0 : i32
    return %c0_i32, %c0_i32_0 : i32, i32
  }
  func.func @transform_7(%arg0: i32) -> (i32, i32, i32) {
    %c0_i32 = arith.constant 0 : i32
    %c0_i32_0 = arith.constant 0 : i32
    %c0_i32_1 = arith.constant 0 : i32
    return %arg0, %c0_i32, %c0_i32_0 : i32, i32, i32
  }
}

module attributes {stable_mosaic.version = 11 : i64} {
  func.func @_self_attn_block_kernel(%arg0: i32, %arg1: memref<1x8x64xf32, #tpu.memory_space<vmem>>, %arg2: memref<1x8x8xf32, #tpu.memory_space<vmem>>, %arg3: memref<1x64xf32, #tpu.memory_space<vmem>>, %arg4: memref<1x64xf32, #tpu.memory_space<vmem>>, %arg5: memref<64x64xf32, #tpu.memory_space<vmem>>, %arg6: memref<1x64xf32, #tpu.memory_space<vmem>>, %arg7: memref<64x128xf32, #tpu.memory_space<vmem>>, %arg8: memref<1x128xf32, #tpu.memory_space<vmem>>, %arg9: memref<64x64xf32, #tpu.memory_space<vmem>>, %arg10: memref<1x64xf32, #tpu.memory_space<vmem>>, %arg11: memref<1x8x64xf32, #tpu.memory_space<vmem>>) attributes {dimension_semantics = [#tpu.dimension_semantics<parallel>], iteration_bounds = array<i64: 2>, scalar_prefetch = 0 : i64, scratch_operands = 0 : i64, tpu.core_type = #tpu.core_type<tc>, window_params = [{transform_indices = @transform_0, window_bounds = array<i64: 1, 8, 64>}, {transform_indices = @transform_1, window_bounds = array<i64: 1, 8, 8>}, {pipeline_mode = #tpu.pipeline_mode<synchronous>, transform_indices = @transform_2, window_bounds = array<i64: 1, 64>}, {pipeline_mode = #tpu.pipeline_mode<synchronous>, transform_indices = @transform_3, window_bounds = array<i64: 1, 64>}, {pipeline_mode = #tpu.pipeline_mode<synchronous>, transform_indices = @transform_4, window_bounds = array<i64: 64, 64>}, {pipeline_mode = #tpu.pipeline_mode<synchronous>, transform_indices = @transform_5, window_bounds = array<i64: 1, 64>}, {pipeline_mode = #tpu.pipeline_mode<synchronous>, transform_indices = @transform_6, window_bounds = array<i64: 64, 128>}, {pipeline_mode = #tpu.pipeline_mode<synchronous>, transform_indices = @transform_7, window_bounds = array<i64: 1, 128>}, {pipeline_mode = #tpu.pipeline_mode<synchronous>, transform_indices = @transform_8, window_bounds = array<i64: 64, 64>}, {pipeline_mode = #tpu.pipeline_mode<synchronous>, transform_indices = @transform_9, window_bounds = array<i64: 1, 64>}, {transform_indices = @transform_10, window_bounds = array<i64: 1, 8, 64>}]} {
    %c0 = arith.constant 0 : index
    %c0_0 = arith.constant 0 : index
    %c0_1 = arith.constant 0 : index
    %0 = vector.load %arg1[%c0, %c0_0, %c0_1] : memref<1x8x64xf32, #tpu.memory_space<vmem>>, vector<1x8x64xf32>
    %1 = vector.shape_cast %0 : vector<1x8x64xf32> to vector<8x64xf32>
    %c0_2 = arith.constant 0 : index
    %c0_3 = arith.constant 0 : index
    %2 = vector.load %arg3[%c0_2, %c0_3] : memref<1x64xf32, #tpu.memory_space<vmem>>, vector<1x64xf32>
    %c0_4 = arith.constant 0 : index
    %c0_5 = arith.constant 0 : index
    %3 = vector.load %arg4[%c0_4, %c0_5] : memref<1x64xf32, #tpu.memory_space<vmem>>, vector<1x64xf32>
    %cst = arith.constant dense<0.000000e+00> : vector<8xf32>
    %4 = vector.multi_reduction <add>, %1, %cst [1] : vector<8x64xf32> to vector<8xf32>
    %5 = vector.shape_cast %4 : vector<8xf32> to vector<8x1xf32>
    %cst_6 = arith.constant 6.400000e+01 : f32
    %6 = vector.broadcast %cst_6 : f32 to vector<8x1xf32>
    %7 = arith.divf %5, %6 : vector<8x1xf32>
    %8 = vector.broadcast %7 : vector<8x1xf32> to vector<8x64xf32>
    %9 = arith.subf %1, %8 : vector<8x64xf32>
    %10 = arith.mulf %9, %9 : vector<8x64xf32>
    %cst_7 = arith.constant dense<0.000000e+00> : vector<8xf32>
    %11 = vector.multi_reduction <add>, %10, %cst_7 [1] : vector<8x64xf32> to vector<8xf32>
    %12 = vector.shape_cast %11 : vector<8xf32> to vector<8x1xf32>
    %cst_8 = arith.constant 0.0158730168 : f32
    %13 = vector.broadcast %cst_8 : f32 to vector<8x1xf32>
    %14 = arith.mulf %12, %13 : vector<8x1xf32>
    %15 = math.sqrt %14 : vector<8x1xf32>
    %cst_9 = arith.constant 9.99999997E-7 : f32
    %16 = vector.broadcast %cst_9 : f32 to vector<8x1xf32>
    %17 = arith.addf %15, %16 : vector<8x1xf32>
    %18 = tpu.reciprocal %17 {approx = true} : vector<8x1xf32> -> vector<8x1xf32>
    %19 = vector.broadcast %2 : vector<1x64xf32> to vector<8x64xf32>
    %20 = arith.mulf %19, %9 : vector<8x64xf32>
    %21 = vector.broadcast %18 : vector<8x1xf32> to vector<8x64xf32>
    %22 = arith.mulf %20, %21 : vector<8x64xf32>
    %23 = vector.broadcast %3 : vector<1x64xf32> to vector<8x64xf32>
    %24 = arith.addf %22, %23 : vector<8x64xf32>
    %c0_10 = arith.constant 0 : index
    %c0_11 = arith.constant 0 : index
    %c0_12 = arith.constant 0 : index
    %25 = vector.load %arg2[%c0_10, %c0_11, %c0_12] : memref<1x8x8xf32, #tpu.memory_space<vmem>>, vector<1x8x8xf32>
    %26 = vector.shape_cast %25 : vector<1x8x8xf32> to vector<8x8xf32>
    %c0_13 = arith.constant 0 : index
    %c0_14 = arith.constant 0 : index
    %27 = vector.load %arg5[%c0_13, %c0_14] : memref<64x64xf32, #tpu.memory_space<vmem>>, vector<64x64xf32>
    %c0_15 = arith.constant 0 : index
    %c0_16 = arith.constant 0 : index
    %28 = vector.load %arg6[%c0_15, %c0_16] : memref<1x64xf32, #tpu.memory_space<vmem>>, vector<1x64xf32>
    %c0_17 = arith.constant 0 : index
    %c0_18 = arith.constant 0 : index
    %29 = vector.load %arg7[%c0_17, %c0_18] : memref<64x128xf32, #tpu.memory_space<vmem>>, vector<64x128xf32>
    %c0_19 = arith.constant 0 : index
    %c0_20 = arith.constant 0 : index
    %30 = vector.load %arg8[%c0_19, %c0_20] : memref<1x128xf32, #tpu.memory_space<vmem>>, vector<1x128xf32>
    %c0_21 = arith.constant 0 : index
    %c0_22 = arith.constant 0 : index
    %31 = vector.load %arg9[%c0_21, %c0_22] : memref<64x64xf32, #tpu.memory_space<vmem>>, vector<64x64xf32>
    %c0_23 = arith.constant 0 : index
    %c0_24 = arith.constant 0 : index
    %32 = vector.load %arg10[%c0_23, %c0_24] : memref<1x64xf32, #tpu.memory_space<vmem>>, vector<1x64xf32>
    %cst_25 = arith.constant dense<0.000000e+00> : vector<8x64xf32>
    %33 = tpu.matmul %24, %27, %cst_25 {dimension_numbers = #tpu.dot_dimension_numbers<[1], [0], [0], [1], [0, 0, 1, 1], [], []>} : vector<8x64xf32>, vector<64x64xf32>, vector<8x64xf32> -> vector<8x64xf32>
    %34 = vector.broadcast %28 : vector<1x64xf32> to vector<8x64xf32>
    %35 = arith.addf %33, %34 : vector<8x64xf32>
    %cst_26 = arith.constant dense<0.000000e+00> : vector<8x128xf32>
    %36 = tpu.matmul %24, %29, %cst_26 {dimension_numbers = #tpu.dot_dimension_numbers<[1], [0], [0], [1], [0, 0, 1, 1], [], []>} : vector<8x64xf32>, vector<64x128xf32>, vector<8x128xf32> -> vector<8x128xf32>
    %37 = vector.broadcast %30 : vector<1x128xf32> to vector<8x128xf32>
    %38 = arith.addf %36, %37 : vector<8x128xf32>
    %39 = vector.extract_strided_slice %38 {offsets = [0, 0], sizes = [8, 64], strides = [1, 1]} : vector<8x128xf32> to vector<8x64xf32>
    %40 = vector.extract_strided_slice %38 {offsets = [0, 64], sizes = [8, 64], strides = [1, 1]} : vector<8x128xf32> to vector<8x64xf32>
    %cst_27 = arith.constant 0.000000e+00 : f32
    %41 = vector.broadcast %cst_27 : f32 to vector<8x8xf32>
    %42 = arith.cmpf one, %26, %41 : vector<8x8xf32>
    %43 = vector.extract_strided_slice %35 {offsets = [0, 0], sizes = [8, 16], strides = [1, 1]} : vector<8x64xf32> to vector<8x16xf32>
    %44 = vector.extract_strided_slice %39 {offsets = [0, 0], sizes = [8, 16], strides = [1, 1]} : vector<8x64xf32> to vector<8x16xf32>
    %45 = vector.extract_strided_slice %40 {offsets = [0, 0], sizes = [8, 16], strides = [1, 1]} : vector<8x64xf32> to vector<8x16xf32>
    %46 = tpu.transpose %44, [1, 0] : vector<8x16xf32> -> vector<16x8xf32>
    %cst_28 = arith.constant dense<0.000000e+00> : vector<8x8xf32>
    %47 = tpu.matmul %43, %46, %cst_28 {dimension_numbers = #tpu.dot_dimension_numbers<[1], [0], [0], [1], [0, 0, 1, 1], [], []>} : vector<8x16xf32>, vector<16x8xf32>, vector<8x8xf32> -> vector<8x8xf32>
    %cst_29 = arith.constant -1.000000e+09 : f32
    %48 = vector.broadcast %cst_29 : f32 to vector<8x8xf32>
    %49 = arith.select %42, %47, %48 : vector<8x8xi1>, vector<8x8xf32>
    %cst_30 = arith.constant dense<0xFF800000> : vector<8xf32>
    %50 = vector.multi_reduction <maximumf>, %49, %cst_30 [1] : vector<8x8xf32> to vector<8xf32>
    %51 = vector.shape_cast %50 : vector<8xf32> to vector<8x1xf32>
    %52 = vector.broadcast %51 : vector<8x1xf32> to vector<8x8xf32>
    %53 = arith.subf %49, %52 : vector<8x8xf32>
    %54 = math.exp %53 : vector<8x8xf32>
    %cst_31 = arith.constant dense<0.000000e+00> : vector<8xf32>
    %55 = vector.multi_reduction <add>, %54, %cst_31 [1] : vector<8x8xf32> to vector<8xf32>
    %56 = vector.shape_cast %55 : vector<8xf32> to vector<8x1xf32>
    %57 = tpu.reciprocal %56 {approx = true} : vector<8x1xf32> -> vector<8x1xf32>
    %58 = vector.broadcast %57 : vector<8x1xf32> to vector<8x8xf32>
    %59 = arith.mulf %54, %58 : vector<8x8xf32>
    %cst_32 = arith.constant dense<0.000000e+00> : vector<8x16xf32>
    %60 = tpu.matmul %59, %45, %cst_32 {dimension_numbers = #tpu.dot_dimension_numbers<[1], [0], [0], [1], [0, 0, 1, 1], [], []>} : vector<8x8xf32>, vector<8x16xf32>, vector<8x16xf32> -> vector<8x16xf32>
    %61 = vector.extract_strided_slice %31 {offsets = [0, 0], sizes = [16, 64], strides = [1, 1]} : vector<64x64xf32> to vector<16x64xf32>
    %cst_33 = arith.constant dense<0.000000e+00> : vector<8x64xf32>
    %62 = tpu.matmul %60, %61, %cst_33 {dimension_numbers = #tpu.dot_dimension_numbers<[1], [0], [0], [1], [0, 0, 1, 1], [], []>} : vector<8x16xf32>, vector<16x64xf32>, vector<8x64xf32> -> vector<8x64xf32>
    %63 = vector.extract_strided_slice %35 {offsets = [0, 16], sizes = [8, 16], strides = [1, 1]} : vector<8x64xf32> to vector<8x16xf32>
    %64 = vector.extract_strided_slice %39 {offsets = [0, 16], sizes = [8, 16], strides = [1, 1]} : vector<8x64xf32> to vector<8x16xf32>
    %65 = vector.extract_strided_slice %40 {offsets = [0, 16], sizes = [8, 16], strides = [1, 1]} : vector<8x64xf32> to vector<8x16xf32>
    %66 = tpu.transpose %64, [1, 0] : vector<8x16xf32> -> vector<16x8xf32>
    %cst_34 = arith.constant dense<0.000000e+00> : vector<8x8xf32>
    %67 = tpu.matmul %63, %66, %cst_34 {dimension_numbers = #tpu.dot_dimension_numbers<[1], [0], [0], [1], [0, 0, 1, 1], [], []>} : vector<8x16xf32>, vector<16x8xf32>, vector<8x8xf32> -> vector<8x8xf32>
    %cst_35 = arith.constant -1.000000e+09 : f32
    %68 = vector.broadcast %cst_35 : f32 to vector<8x8xf32>
    %69 = arith.select %42, %67, %68 : vector<8x8xi1>, vector<8x8xf32>
    %cst_36 = arith.constant dense<0xFF800000> : vector<8xf32>
    %70 = vector.multi_reduction <maximumf>, %69, %cst_36 [1] : vector<8x8xf32> to vector<8xf32>
    %71 = vector.shape_cast %70 : vector<8xf32> to vector<8x1xf32>
    %72 = vector.broadcast %71 : vector<8x1xf32> to vector<8x8xf32>
    %73 = arith.subf %69, %72 : vector<8x8xf32>
    %74 = math.exp %73 : vector<8x8xf32>
    %cst_37 = arith.constant dense<0.000000e+00> : vector<8xf32>
    %75 = vector.multi_reduction <add>, %74, %cst_37 [1] : vector<8x8xf32> to vector<8xf32>
    %76 = vector.shape_cast %75 : vector<8xf32> to vector<8x1xf32>
    %77 = tpu.reciprocal %76 {approx = true} : vector<8x1xf32> -> vector<8x1xf32>
    %78 = vector.broadcast %77 : vector<8x1xf32> to vector<8x8xf32>
    %79 = arith.mulf %74, %78 : vector<8x8xf32>
    %cst_38 = arith.constant dense<0.000000e+00> : vector<8x16xf32>
    %80 = tpu.matmul %79, %65, %cst_38 {dimension_numbers = #tpu.dot_dimension_numbers<[1], [0], [0], [1], [0, 0, 1, 1], [], []>} : vector<8x8xf32>, vector<8x16xf32>, vector<8x16xf32> -> vector<8x16xf32>
    %81 = vector.extract_strided_slice %31 {offsets = [16, 0], sizes = [16, 64], strides = [1, 1]} : vector<64x64xf32> to vector<16x64xf32>
    %cst_39 = arith.constant dense<0.000000e+00> : vector<8x64xf32>
    %82 = tpu.matmul %80, %81, %cst_39 {dimension_numbers = #tpu.dot_dimension_numbers<[1], [0], [0], [1], [0, 0, 1, 1], [], []>} : vector<8x16xf32>, vector<16x64xf32>, vector<8x64xf32> -> vector<8x64xf32>
    %83 = arith.addf %62, %82 : vector<8x64xf32>
    %84 = vector.extract_strided_slice %35 {offsets = [0, 32], sizes = [8, 16], strides = [1, 1]} : vector<8x64xf32> to vector<8x16xf32>
    %85 = vector.extract_strided_slice %39 {offsets = [0, 32], sizes = [8, 16], strides = [1, 1]} : vector<8x64xf32> to vector<8x16xf32>
    %86 = vector.extract_strided_slice %40 {offsets = [0, 32], sizes = [8, 16], strides = [1, 1]} : vector<8x64xf32> to vector<8x16xf32>
    %87 = tpu.transpose %85, [1, 0] : vector<8x16xf32> -> vector<16x8xf32>
    %cst_40 = arith.constant dense<0.000000e+00> : vector<8x8xf32>
    %88 = tpu.matmul %84, %87, %cst_40 {dimension_numbers = #tpu.dot_dimension_numbers<[1], [0], [0], [1], [0, 0, 1, 1], [], []>} : vector<8x16xf32>, vector<16x8xf32>, vector<8x8xf32> -> vector<8x8xf32>
    %cst_41 = arith.constant -1.000000e+09 : f32
    %89 = vector.broadcast %cst_41 : f32 to vector<8x8xf32>
    %90 = arith.select %42, %88, %89 : vector<8x8xi1>, vector<8x8xf32>
    %cst_42 = arith.constant dense<0xFF800000> : vector<8xf32>
    %91 = vector.multi_reduction <maximumf>, %90, %cst_42 [1] : vector<8x8xf32> to vector<8xf32>
    %92 = vector.shape_cast %91 : vector<8xf32> to vector<8x1xf32>
    %93 = vector.broadcast %92 : vector<8x1xf32> to vector<8x8xf32>
    %94 = arith.subf %90, %93 : vector<8x8xf32>
    %95 = math.exp %94 : vector<8x8xf32>
    %cst_43 = arith.constant dense<0.000000e+00> : vector<8xf32>
    %96 = vector.multi_reduction <add>, %95, %cst_43 [1] : vector<8x8xf32> to vector<8xf32>
    %97 = vector.shape_cast %96 : vector<8xf32> to vector<8x1xf32>
    %98 = tpu.reciprocal %97 {approx = true} : vector<8x1xf32> -> vector<8x1xf32>
    %99 = vector.broadcast %98 : vector<8x1xf32> to vector<8x8xf32>
    %100 = arith.mulf %95, %99 : vector<8x8xf32>
    %cst_44 = arith.constant dense<0.000000e+00> : vector<8x16xf32>
    %101 = tpu.matmul %100, %86, %cst_44 {dimension_numbers = #tpu.dot_dimension_numbers<[1], [0], [0], [1], [0, 0, 1, 1], [], []>} : vector<8x8xf32>, vector<8x16xf32>, vector<8x16xf32> -> vector<8x16xf32>
    %102 = vector.extract_strided_slice %31 {offsets = [32, 0], sizes = [16, 64], strides = [1, 1]} : vector<64x64xf32> to vector<16x64xf32>
    %cst_45 = arith.constant dense<0.000000e+00> : vector<8x64xf32>
    %103 = tpu.matmul %101, %102, %cst_45 {dimension_numbers = #tpu.dot_dimension_numbers<[1], [0], [0], [1], [0, 0, 1, 1], [], []>} : vector<8x16xf32>, vector<16x64xf32>, vector<8x64xf32> -> vector<8x64xf32>
    %104 = arith.addf %83, %103 : vector<8x64xf32>
    %105 = vector.extract_strided_slice %35 {offsets = [0, 48], sizes = [8, 16], strides = [1, 1]} : vector<8x64xf32> to vector<8x16xf32>
    %106 = vector.extract_strided_slice %39 {offsets = [0, 48], sizes = [8, 16], strides = [1, 1]} : vector<8x64xf32> to vector<8x16xf32>
    %107 = vector.extract_strided_slice %40 {offsets = [0, 48], sizes = [8, 16], strides = [1, 1]} : vector<8x64xf32> to vector<8x16xf32>
    %108 = tpu.transpose %106, [1, 0] : vector<8x16xf32> -> vector<16x8xf32>
    %cst_46 = arith.constant dense<0.000000e+00> : vector<8x8xf32>
    %109 = tpu.matmul %105, %108, %cst_46 {dimension_numbers = #tpu.dot_dimension_numbers<[1], [0], [0], [1], [0, 0, 1, 1], [], []>} : vector<8x16xf32>, vector<16x8xf32>, vector<8x8xf32> -> vector<8x8xf32>
    %cst_47 = arith.constant -1.000000e+09 : f32
    %110 = vector.broadcast %cst_47 : f32 to vector<8x8xf32>
    %111 = arith.select %42, %109, %110 : vector<8x8xi1>, vector<8x8xf32>
    %cst_48 = arith.constant dense<0xFF800000> : vector<8xf32>
    %112 = vector.multi_reduction <maximumf>, %111, %cst_48 [1] : vector<8x8xf32> to vector<8xf32>
    %113 = vector.shape_cast %112 : vector<8xf32> to vector<8x1xf32>
    %114 = vector.broadcast %113 : vector<8x1xf32> to vector<8x8xf32>
    %115 = arith.subf %111, %114 : vector<8x8xf32>
    %116 = math.exp %115 : vector<8x8xf32>
    %cst_49 = arith.constant dense<0.000000e+00> : vector<8xf32>
    %117 = vector.multi_reduction <add>, %116, %cst_49 [1] : vector<8x8xf32> to vector<8xf32>
    %118 = vector.shape_cast %117 : vector<8xf32> to vector<8x1xf32>
    %119 = tpu.reciprocal %118 {approx = true} : vector<8x1xf32> -> vector<8x1xf32>
    %120 = vector.broadcast %119 : vector<8x1xf32> to vector<8x8xf32>
    %121 = arith.mulf %116, %120 : vector<8x8xf32>
    %cst_50 = arith.constant dense<0.000000e+00> : vector<8x16xf32>
    %122 = tpu.matmul %121, %107, %cst_50 {dimension_numbers = #tpu.dot_dimension_numbers<[1], [0], [0], [1], [0, 0, 1, 1], [], []>} : vector<8x8xf32>, vector<8x16xf32>, vector<8x16xf32> -> vector<8x16xf32>
    %123 = vector.extract_strided_slice %31 {offsets = [48, 0], sizes = [16, 64], strides = [1, 1]} : vector<64x64xf32> to vector<16x64xf32>
    %cst_51 = arith.constant dense<0.000000e+00> : vector<8x64xf32>
    %124 = tpu.matmul %122, %123, %cst_51 {dimension_numbers = #tpu.dot_dimension_numbers<[1], [0], [0], [1], [0, 0, 1, 1], [], []>} : vector<8x16xf32>, vector<16x64xf32>, vector<8x64xf32> -> vector<8x64xf32>
    %125 = arith.addf %104, %124 : vector<8x64xf32>
    %126 = arith.addf %1, %125 : vector<8x64xf32>
    %127 = vector.broadcast %32 : vector<1x64xf32> to vector<8x64xf32>
    %128 = arith.addf %126, %127 : vector<8x64xf32>
    %c0_52 = arith.constant 0 : index
    %c0_53 = arith.constant 0 : index
    %c0_54 = arith.constant 0 : index
    %129 = vector.load %arg11[%c0_52, %c0_53, %c0_54] : memref<1x8x64xf32, #tpu.memory_space<vmem>>, vector<1x8x64xf32>
    %130 = vector.shape_cast %129 : vector<1x8x64xf32> to vector<8x64xf32>
    %131 = vector.shape_cast %128 : vector<8x64xf32> to vector<1x8x64xf32>
    tpu.vector_store %arg11[%c0_52, %c0_53, %c0_54], %131 {strides = array<i32>} : memref<1x8x64xf32, #tpu.memory_space<vmem>>, vector<1x8x64xf32>,
    return
  }
  func.func @transform_0(%arg0: i32) -> (i32, i32, i32) {
    %c0_i32 = arith.constant 0 : i32
    %c0_i32_0 = arith.constant 0 : i32
    %c0_i32_1 = arith.constant 0 : i32
    return %arg0, %c0_i32, %c0_i32_0 : i32, i32, i32
  }
  func.func @transform_1(%arg0: i32) -> (i32, i32, i32) {
    %c0_i32 = arith.constant 0 : i32
    %c0_i32_0 = arith.constant 0 : i32
    %c0_i32_1 = arith.constant 0 : i32
    return %arg0, %c0_i32, %c0_i32_0 : i32, i32, i32
  }
  func.func @transform_2(%arg0: i32) -> (i32, i32) {
    %c0_i32 = arith.constant 0 : i32
    %c0_i32_0 = arith.constant 0 : i32
    %c0_i32_1 = arith.constant 0 : i32
    return %c0_i32, %c0_i32_0 : i32, i32
  }
  func.func @transform_3(%arg0: i32) -> (i32, i32) {
    %c0_i32 = arith.constant 0 : i32
    %c0_i32_0 = arith.constant 0 : i32
    %c0_i32_1 = arith.constant 0 : i32
    return %c0_i32, %c0_i32_0 : i32, i32
  }
  func.func @transform_4(%arg0: i32) -> (i32, i32) {
    %c0_i32 = arith.constant 0 : i32
    %c0_i32_0 = arith.constant 0 : i32
    %c0_i32_1 = arith.constant 0 : i32
    return %c0_i32, %c0_i32_0 : i32, i32
  }
  func.func @transform_5(%arg0: i32) -> (i32, i32) {
    %c0_i32 = arith.constant 0 : i32
    %c0_i32_0 = arith.constant 0 : i32
    %c0_i32_1 = arith.constant 0 : i32
    return %c0_i32, %c0_i32_0 : i32, i32
  }
  func.func @transform_6(%arg0: i32) -> (i32, i32) {
    %c0_i32 = arith.constant 0 : i32
    %c0_i32_0 = arith.constant 0 : i32
    %c0_i32_1 = arith.constant 0 : i32
    return %c0_i32, %c0_i32_0 : i32, i32
  }
  func.func @transform_7(%arg0: i32) -> (i32, i32) {
    %c0_i32 = arith.constant 0 : i32
    %c0_i32_0 = arith.constant 0 : i32
    %c0_i32_1 = arith.constant 0 : i32
    return %c0_i32, %c0_i32_0 : i32, i32
  }
  func.func @transform_8(%arg0: i32) -> (i32, i32) {
    %c0_i32 = arith.constant 0 : i32
    %c0_i32_0 = arith.constant 0 : i32
    %c0_i32_1 = arith.constant 0 : i32
    return %c0_i32, %c0_i32_0 : i32, i32
  }
  func.func @transform_9(%arg0: i32) -> (i32, i32) {
    %c0_i32 = arith.constant 0 : i32
    %c0_i32_0 = arith.constant 0 : i32
    %c0_i32_1 = arith.constant 0 : i32
    return %c0_i32, %c0_i32_0 : i32, i32
  }
  func.func @transform_10(%arg0: i32) -> (i32, i32, i32) {
    %c0_i32 = arith.constant 0 : i32
    %c0_i32_0 = arith.constant 0 : i32
    %c0_i32_1 = arith.constant 0 : i32
    return %arg0, %c0_i32, %c0_i32_0 : i32, i32, i32
  }
}

module attributes {stable_mosaic.version = 11 : i64} {
  func.func @_ln_kernel(%arg0: memref<16x64xf32, #tpu.memory_space<vmem>>, %arg1: memref<1x64xf32, #tpu.memory_space<vmem>>, %arg2: memref<1x64xf32, #tpu.memory_space<vmem>>, %arg3: memref<16x64xf32, #tpu.memory_space<vmem>>) attributes {dimension_semantics = [], scalar_prefetch = 0 : i64, scratch_operands = 0 : i64, tpu.core_type = #tpu.core_type<tc>} {
    %c0 = arith.constant 0 : index
    %c0_0 = arith.constant 0 : index
    %0 = vector.load %arg0[%c0, %c0_0] : memref<16x64xf32, #tpu.memory_space<vmem>>, vector<16x64xf32>
    %c0_1 = arith.constant 0 : index
    %c0_2 = arith.constant 0 : index
    %1 = vector.load %arg1[%c0_1, %c0_2] : memref<1x64xf32, #tpu.memory_space<vmem>>, vector<1x64xf32>
    %c0_3 = arith.constant 0 : index
    %c0_4 = arith.constant 0 : index
    %2 = vector.load %arg2[%c0_3, %c0_4] : memref<1x64xf32, #tpu.memory_space<vmem>>, vector<1x64xf32>
    %cst = arith.constant dense<0.000000e+00> : vector<16xf32>
    %3 = vector.multi_reduction <add>, %0, %cst [1] : vector<16x64xf32> to vector<16xf32>
    %4 = vector.shape_cast %3 : vector<16xf32> to vector<16x1xf32>
    %cst_5 = arith.constant 6.400000e+01 : f32
    %5 = vector.broadcast %cst_5 : f32 to vector<16x1xf32>
    %6 = arith.divf %4, %5 : vector<16x1xf32>
    %7 = vector.broadcast %6 : vector<16x1xf32> to vector<16x64xf32>
    %8 = arith.subf %0, %7 : vector<16x64xf32>
    %9 = arith.mulf %8, %8 : vector<16x64xf32>
    %cst_6 = arith.constant dense<0.000000e+00> : vector<16xf32>
    %10 = vector.multi_reduction <add>, %9, %cst_6 [1] : vector<16x64xf32> to vector<16xf32>
    %11 = vector.shape_cast %10 : vector<16xf32> to vector<16x1xf32>
    %cst_7 = arith.constant 0.0158730168 : f32
    %12 = vector.broadcast %cst_7 : f32 to vector<16x1xf32>
    %13 = arith.mulf %11, %12 : vector<16x1xf32>
    %14 = math.sqrt %13 : vector<16x1xf32>
    %cst_8 = arith.constant 9.99999997E-7 : f32
    %15 = vector.broadcast %cst_8 : f32 to vector<16x1xf32>
    %16 = arith.addf %14, %15 : vector<16x1xf32>
    %17 = tpu.reciprocal %16 {approx = true} : vector<16x1xf32> -> vector<16x1xf32>
    %18 = vector.broadcast %1 : vector<1x64xf32> to vector<16x64xf32>
    %19 = arith.mulf %18, %8 : vector<16x64xf32>
    %20 = vector.broadcast %17 : vector<16x1xf32> to vector<16x64xf32>
    %21 = arith.mulf %19, %20 : vector<16x64xf32>
    %22 = vector.broadcast %2 : vector<1x64xf32> to vector<16x64xf32>
    %23 = arith.addf %21, %22 : vector<16x64xf32>
    %c0_9 = arith.constant 0 : index
    %c0_10 = arith.constant 0 : index
    %24 = vector.load %arg3[%c0_9, %c0_10] : memref<16x64xf32, #tpu.memory_space<vmem>>, vector<16x64xf32>
    tpu.vector_store %arg3[%c0_9, %c0_10], %23 {strides = array<i32>} : memref<16x64xf32, #tpu.memory_space<vmem>>, vector<16x64xf32>,
    return
  }
}

module attributes {stable_mosaic.version = 11 : i64} {
  func.func @_self_attn_block_kernel(%arg0: i32, %arg1: memref<1x8x64xf32, #tpu.memory_space<vmem>>, %arg2: memref<1x8x8xf32, #tpu.memory_space<vmem>>, %arg3: memref<1x64xf32, #tpu.memory_space<vmem>>, %arg4: memref<1x64xf32, #tpu.memory_space<vmem>>, %arg5: memref<64x64xf32, #tpu.memory_space<vmem>>, %arg6: memref<1x64xf32, #tpu.memory_space<vmem>>, %arg7: memref<64x128xf32, #tpu.memory_space<vmem>>, %arg8: memref<1x128xf32, #tpu.memory_space<vmem>>, %arg9: memref<64x64xf32, #tpu.memory_space<vmem>>, %arg10: memref<1x64xf32, #tpu.memory_space<vmem>>, %arg11: memref<1x8x64xf32, #tpu.memory_space<vmem>>) attributes {dimension_semantics = [#tpu.dimension_semantics<parallel>], iteration_bounds = array<i64: 2>, scalar_prefetch = 0 : i64, scratch_operands = 0 : i64, tpu.core_type = #tpu.core_type<tc>, window_params = [{transform_indices = @transform_0, window_bounds = array<i64: 1, 8, 64>}, {transform_indices = @transform_1, window_bounds = array<i64: 1, 8, 8>}, {pipeline_mode = #tpu.pipeline_mode<synchronous>, transform_indices = @transform_2, window_bounds = array<i64: 1, 64>}, {pipeline_mode = #tpu.pipeline_mode<synchronous>, transform_indices = @transform_3, window_bounds = array<i64: 1, 64>}, {pipeline_mode = #tpu.pipeline_mode<synchronous>, transform_indices = @transform_4, window_bounds = array<i64: 64, 64>}, {pipeline_mode = #tpu.pipeline_mode<synchronous>, transform_indices = @transform_5, window_bounds = array<i64: 1, 64>}, {pipeline_mode = #tpu.pipeline_mode<synchronous>, transform_indices = @transform_6, window_bounds = array<i64: 64, 128>}, {pipeline_mode = #tpu.pipeline_mode<synchronous>, transform_indices = @transform_7, window_bounds = array<i64: 1, 128>}, {pipeline_mode = #tpu.pipeline_mode<synchronous>, transform_indices = @transform_8, window_bounds = array<i64: 64, 64>}, {pipeline_mode = #tpu.pipeline_mode<synchronous>, transform_indices = @transform_9, window_bounds = array<i64: 1, 64>}, {transform_indices = @transform_10, window_bounds = array<i64: 1, 8, 64>}]} {
    %c0 = arith.constant 0 : index
    %c0_0 = arith.constant 0 : index
    %c0_1 = arith.constant 0 : index
    %0 = vector.load %arg1[%c0, %c0_0, %c0_1] : memref<1x8x64xf32, #tpu.memory_space<vmem>>, vector<1x8x64xf32>
    %1 = vector.shape_cast %0 : vector<1x8x64xf32> to vector<8x64xf32>
    %c0_2 = arith.constant 0 : index
    %c0_3 = arith.constant 0 : index
    %2 = vector.load %arg3[%c0_2, %c0_3] : memref<1x64xf32, #tpu.memory_space<vmem>>, vector<1x64xf32>
    %c0_4 = arith.constant 0 : index
    %c0_5 = arith.constant 0 : index
    %3 = vector.load %arg4[%c0_4, %c0_5] : memref<1x64xf32, #tpu.memory_space<vmem>>, vector<1x64xf32>
    %cst = arith.constant dense<0.000000e+00> : vector<8xf32>
    %4 = vector.multi_reduction <add>, %1, %cst [1] : vector<8x64xf32> to vector<8xf32>
    %5 = vector.shape_cast %4 : vector<8xf32> to vector<8x1xf32>
    %cst_6 = arith.constant 6.400000e+01 : f32
    %6 = vector.broadcast %cst_6 : f32 to vector<8x1xf32>
    %7 = arith.divf %5, %6 : vector<8x1xf32>
    %8 = vector.broadcast %7 : vector<8x1xf32> to vector<8x64xf32>
    %9 = arith.subf %1, %8 : vector<8x64xf32>
    %10 = arith.mulf %9, %9 : vector<8x64xf32>
    %cst_7 = arith.constant dense<0.000000e+00> : vector<8xf32>
    %11 = vector.multi_reduction <add>, %10, %cst_7 [1] : vector<8x64xf32> to vector<8xf32>
    %12 = vector.shape_cast %11 : vector<8xf32> to vector<8x1xf32>
    %cst_8 = arith.constant 0.0158730168 : f32
    %13 = vector.broadcast %cst_8 : f32 to vector<8x1xf32>
    %14 = arith.mulf %12, %13 : vector<8x1xf32>
    %15 = math.sqrt %14 : vector<8x1xf32>
    %cst_9 = arith.constant 9.99999997E-7 : f32
    %16 = vector.broadcast %cst_9 : f32 to vector<8x1xf32>
    %17 = arith.addf %15, %16 : vector<8x1xf32>
    %18 = tpu.reciprocal %17 {approx = true} : vector<8x1xf32> -> vector<8x1xf32>
    %19 = vector.broadcast %2 : vector<1x64xf32> to vector<8x64xf32>
    %20 = arith.mulf %19, %9 : vector<8x64xf32>
    %21 = vector.broadcast %18 : vector<8x1xf32> to vector<8x64xf32>
    %22 = arith.mulf %20, %21 : vector<8x64xf32>
    %23 = vector.broadcast %3 : vector<1x64xf32> to vector<8x64xf32>
    %24 = arith.addf %22, %23 : vector<8x64xf32>
    %c0_10 = arith.constant 0 : index
    %c0_11 = arith.constant 0 : index
    %c0_12 = arith.constant 0 : index
    %25 = vector.load %arg2[%c0_10, %c0_11, %c0_12] : memref<1x8x8xf32, #tpu.memory_space<vmem>>, vector<1x8x8xf32>
    %26 = vector.shape_cast %25 : vector<1x8x8xf32> to vector<8x8xf32>
    %c0_13 = arith.constant 0 : index
    %c0_14 = arith.constant 0 : index
    %27 = vector.load %arg5[%c0_13, %c0_14] : memref<64x64xf32, #tpu.memory_space<vmem>>, vector<64x64xf32>
    %c0_15 = arith.constant 0 : index
    %c0_16 = arith.constant 0 : index
    %28 = vector.load %arg6[%c0_15, %c0_16] : memref<1x64xf32, #tpu.memory_space<vmem>>, vector<1x64xf32>
    %c0_17 = arith.constant 0 : index
    %c0_18 = arith.constant 0 : index
    %29 = vector.load %arg7[%c0_17, %c0_18] : memref<64x128xf32, #tpu.memory_space<vmem>>, vector<64x128xf32>
    %c0_19 = arith.constant 0 : index
    %c0_20 = arith.constant 0 : index
    %30 = vector.load %arg8[%c0_19, %c0_20] : memref<1x128xf32, #tpu.memory_space<vmem>>, vector<1x128xf32>
    %c0_21 = arith.constant 0 : index
    %c0_22 = arith.constant 0 : index
    %31 = vector.load %arg9[%c0_21, %c0_22] : memref<64x64xf32, #tpu.memory_space<vmem>>, vector<64x64xf32>
    %c0_23 = arith.constant 0 : index
    %c0_24 = arith.constant 0 : index
    %32 = vector.load %arg10[%c0_23, %c0_24] : memref<1x64xf32, #tpu.memory_space<vmem>>, vector<1x64xf32>
    %cst_25 = arith.constant dense<0.000000e+00> : vector<8x64xf32>
    %33 = tpu.matmul %24, %27, %cst_25 {dimension_numbers = #tpu.dot_dimension_numbers<[1], [0], [0], [1], [0, 0, 1, 1], [], []>} : vector<8x64xf32>, vector<64x64xf32>, vector<8x64xf32> -> vector<8x64xf32>
    %34 = vector.broadcast %28 : vector<1x64xf32> to vector<8x64xf32>
    %35 = arith.addf %33, %34 : vector<8x64xf32>
    %cst_26 = arith.constant dense<0.000000e+00> : vector<8x128xf32>
    %36 = tpu.matmul %24, %29, %cst_26 {dimension_numbers = #tpu.dot_dimension_numbers<[1], [0], [0], [1], [0, 0, 1, 1], [], []>} : vector<8x64xf32>, vector<64x128xf32>, vector<8x128xf32> -> vector<8x128xf32>
    %37 = vector.broadcast %30 : vector<1x128xf32> to vector<8x128xf32>
    %38 = arith.addf %36, %37 : vector<8x128xf32>
    %39 = vector.extract_strided_slice %38 {offsets = [0, 0], sizes = [8, 64], strides = [1, 1]} : vector<8x128xf32> to vector<8x64xf32>
    %40 = vector.extract_strided_slice %38 {offsets = [0, 64], sizes = [8, 64], strides = [1, 1]} : vector<8x128xf32> to vector<8x64xf32>
    %cst_27 = arith.constant 0.000000e+00 : f32
    %41 = vector.broadcast %cst_27 : f32 to vector<8x8xf32>
    %42 = arith.cmpf one, %26, %41 : vector<8x8xf32>
    %43 = vector.extract_strided_slice %35 {offsets = [0, 0], sizes = [8, 16], strides = [1, 1]} : vector<8x64xf32> to vector<8x16xf32>
    %44 = vector.extract_strided_slice %39 {offsets = [0, 0], sizes = [8, 16], strides = [1, 1]} : vector<8x64xf32> to vector<8x16xf32>
    %45 = vector.extract_strided_slice %40 {offsets = [0, 0], sizes = [8, 16], strides = [1, 1]} : vector<8x64xf32> to vector<8x16xf32>
    %46 = tpu.transpose %44, [1, 0] : vector<8x16xf32> -> vector<16x8xf32>
    %cst_28 = arith.constant dense<0.000000e+00> : vector<8x8xf32>
    %47 = tpu.matmul %43, %46, %cst_28 {dimension_numbers = #tpu.dot_dimension_numbers<[1], [0], [0], [1], [0, 0, 1, 1], [], []>} : vector<8x16xf32>, vector<16x8xf32>, vector<8x8xf32> -> vector<8x8xf32>
    %cst_29 = arith.constant -1.000000e+09 : f32
    %48 = vector.broadcast %cst_29 : f32 to vector<8x8xf32>
    %49 = arith.select %42, %47, %48 : vector<8x8xi1>, vector<8x8xf32>
    %cst_30 = arith.constant dense<0xFF800000> : vector<8xf32>
    %50 = vector.multi_reduction <maximumf>, %49, %cst_30 [1] : vector<8x8xf32> to vector<8xf32>
    %51 = vector.shape_cast %50 : vector<8xf32> to vector<8x1xf32>
    %52 = vector.broadcast %51 : vector<8x1xf32> to vector<8x8xf32>
    %53 = arith.subf %49, %52 : vector<8x8xf32>
    %54 = math.exp %53 : vector<8x8xf32>
    %cst_31 = arith.constant dense<0.000000e+00> : vector<8xf32>
    %55 = vector.multi_reduction <add>, %54, %cst_31 [1] : vector<8x8xf32> to vector<8xf32>
    %56 = vector.shape_cast %55 : vector<8xf32> to vector<8x1xf32>
    %57 = tpu.reciprocal %56 {approx = true} : vector<8x1xf32> -> vector<8x1xf32>
    %58 = vector.broadcast %57 : vector<8x1xf32> to vector<8x8xf32>
    %59 = arith.mulf %54, %58 : vector<8x8xf32>
    %cst_32 = arith.constant dense<0.000000e+00> : vector<8x16xf32>
    %60 = tpu.matmul %59, %45, %cst_32 {dimension_numbers = #tpu.dot_dimension_numbers<[1], [0], [0], [1], [0, 0, 1, 1], [], []>} : vector<8x8xf32>, vector<8x16xf32>, vector<8x16xf32> -> vector<8x16xf32>
    %61 = vector.extract_strided_slice %31 {offsets = [0, 0], sizes = [16, 64], strides = [1, 1]} : vector<64x64xf32> to vector<16x64xf32>
    %cst_33 = arith.constant dense<0.000000e+00> : vector<8x64xf32>
    %62 = tpu.matmul %60, %61, %cst_33 {dimension_numbers = #tpu.dot_dimension_numbers<[1], [0], [0], [1], [0, 0, 1, 1], [], []>} : vector<8x16xf32>, vector<16x64xf32>, vector<8x64xf32> -> vector<8x64xf32>
    %63 = vector.extract_strided_slice %35 {offsets = [0, 16], sizes = [8, 16], strides = [1, 1]} : vector<8x64xf32> to vector<8x16xf32>
    %64 = vector.extract_strided_slice %39 {offsets = [0, 16], sizes = [8, 16], strides = [1, 1]} : vector<8x64xf32> to vector<8x16xf32>
    %65 = vector.extract_strided_slice %40 {offsets = [0, 16], sizes = [8, 16], strides = [1, 1]} : vector<8x64xf32> to vector<8x16xf32>
    %66 = tpu.transpose %64, [1, 0] : vector<8x16xf32> -> vector<16x8xf32>
    %cst_34 = arith.constant dense<0.000000e+00> : vector<8x8xf32>
    %67 = tpu.matmul %63, %66, %cst_34 {dimension_numbers = #tpu.dot_dimension_numbers<[1], [0], [0], [1], [0, 0, 1, 1], [], []>} : vector<8x16xf32>, vector<16x8xf32>, vector<8x8xf32> -> vector<8x8xf32>
    %cst_35 = arith.constant -1.000000e+09 : f32
    %68 = vector.broadcast %cst_35 : f32 to vector<8x8xf32>
    %69 = arith.select %42, %67, %68 : vector<8x8xi1>, vector<8x8xf32>
    %cst_36 = arith.constant dense<0xFF800000> : vector<8xf32>
    %70 = vector.multi_reduction <maximumf>, %69, %cst_36 [1] : vector<8x8xf32> to vector<8xf32>
    %71 = vector.shape_cast %70 : vector<8xf32> to vector<8x1xf32>
    %72 = vector.broadcast %71 : vector<8x1xf32> to vector<8x8xf32>
    %73 = arith.subf %69, %72 : vector<8x8xf32>
    %74 = math.exp %73 : vector<8x8xf32>
    %cst_37 = arith.constant dense<0.000000e+00> : vector<8xf32>
    %75 = vector.multi_reduction <add>, %74, %cst_37 [1] : vector<8x8xf32> to vector<8xf32>
    %76 = vector.shape_cast %75 : vector<8xf32> to vector<8x1xf32>
    %77 = tpu.reciprocal %76 {approx = true} : vector<8x1xf32> -> vector<8x1xf32>
    %78 = vector.broadcast %77 : vector<8x1xf32> to vector<8x8xf32>
    %79 = arith.mulf %74, %78 : vector<8x8xf32>
    %cst_38 = arith.constant dense<0.000000e+00> : vector<8x16xf32>
    %80 = tpu.matmul %79, %65, %cst_38 {dimension_numbers = #tpu.dot_dimension_numbers<[1], [0], [0], [1], [0, 0, 1, 1], [], []>} : vector<8x8xf32>, vector<8x16xf32>, vector<8x16xf32> -> vector<8x16xf32>
    %81 = vector.extract_strided_slice %31 {offsets = [16, 0], sizes = [16, 64], strides = [1, 1]} : vector<64x64xf32> to vector<16x64xf32>
    %cst_39 = arith.constant dense<0.000000e+00> : vector<8x64xf32>
    %82 = tpu.matmul %80, %81, %cst_39 {dimension_numbers = #tpu.dot_dimension_numbers<[1], [0], [0], [1], [0, 0, 1, 1], [], []>} : vector<8x16xf32>, vector<16x64xf32>, vector<8x64xf32> -> vector<8x64xf32>
    %83 = arith.addf %62, %82 : vector<8x64xf32>
    %84 = vector.extract_strided_slice %35 {offsets = [0, 32], sizes = [8, 16], strides = [1, 1]} : vector<8x64xf32> to vector<8x16xf32>
    %85 = vector.extract_strided_slice %39 {offsets = [0, 32], sizes = [8, 16], strides = [1, 1]} : vector<8x64xf32> to vector<8x16xf32>
    %86 = vector.extract_strided_slice %40 {offsets = [0, 32], sizes = [8, 16], strides = [1, 1]} : vector<8x64xf32> to vector<8x16xf32>
    %87 = tpu.transpose %85, [1, 0] : vector<8x16xf32> -> vector<16x8xf32>
    %cst_40 = arith.constant dense<0.000000e+00> : vector<8x8xf32>
    %88 = tpu.matmul %84, %87, %cst_40 {dimension_numbers = #tpu.dot_dimension_numbers<[1], [0], [0], [1], [0, 0, 1, 1], [], []>} : vector<8x16xf32>, vector<16x8xf32>, vector<8x8xf32> -> vector<8x8xf32>
    %cst_41 = arith.constant -1.000000e+09 : f32
    %89 = vector.broadcast %cst_41 : f32 to vector<8x8xf32>
    %90 = arith.select %42, %88, %89 : vector<8x8xi1>, vector<8x8xf32>
    %cst_42 = arith.constant dense<0xFF800000> : vector<8xf32>
    %91 = vector.multi_reduction <maximumf>, %90, %cst_42 [1] : vector<8x8xf32> to vector<8xf32>
    %92 = vector.shape_cast %91 : vector<8xf32> to vector<8x1xf32>
    %93 = vector.broadcast %92 : vector<8x1xf32> to vector<8x8xf32>
    %94 = arith.subf %90, %93 : vector<8x8xf32>
    %95 = math.exp %94 : vector<8x8xf32>
    %cst_43 = arith.constant dense<0.000000e+00> : vector<8xf32>
    %96 = vector.multi_reduction <add>, %95, %cst_43 [1] : vector<8x8xf32> to vector<8xf32>
    %97 = vector.shape_cast %96 : vector<8xf32> to vector<8x1xf32>
    %98 = tpu.reciprocal %97 {approx = true} : vector<8x1xf32> -> vector<8x1xf32>
    %99 = vector.broadcast %98 : vector<8x1xf32> to vector<8x8xf32>
    %100 = arith.mulf %95, %99 : vector<8x8xf32>
    %cst_44 = arith.constant dense<0.000000e+00> : vector<8x16xf32>
    %101 = tpu.matmul %100, %86, %cst_44 {dimension_numbers = #tpu.dot_dimension_numbers<[1], [0], [0], [1], [0, 0, 1, 1], [], []>} : vector<8x8xf32>, vector<8x16xf32>, vector<8x16xf32> -> vector<8x16xf32>
    %102 = vector.extract_strided_slice %31 {offsets = [32, 0], sizes = [16, 64], strides = [1, 1]} : vector<64x64xf32> to vector<16x64xf32>
    %cst_45 = arith.constant dense<0.000000e+00> : vector<8x64xf32>
    %103 = tpu.matmul %101, %102, %cst_45 {dimension_numbers = #tpu.dot_dimension_numbers<[1], [0], [0], [1], [0, 0, 1, 1], [], []>} : vector<8x16xf32>, vector<16x64xf32>, vector<8x64xf32> -> vector<8x64xf32>
    %104 = arith.addf %83, %103 : vector<8x64xf32>
    %105 = vector.extract_strided_slice %35 {offsets = [0, 48], sizes = [8, 16], strides = [1, 1]} : vector<8x64xf32> to vector<8x16xf32>
    %106 = vector.extract_strided_slice %39 {offsets = [0, 48], sizes = [8, 16], strides = [1, 1]} : vector<8x64xf32> to vector<8x16xf32>
    %107 = vector.extract_strided_slice %40 {offsets = [0, 48], sizes = [8, 16], strides = [1, 1]} : vector<8x64xf32> to vector<8x16xf32>
    %108 = tpu.transpose %106, [1, 0] : vector<8x16xf32> -> vector<16x8xf32>
    %cst_46 = arith.constant dense<0.000000e+00> : vector<8x8xf32>
    %109 = tpu.matmul %105, %108, %cst_46 {dimension_numbers = #tpu.dot_dimension_numbers<[1], [0], [0], [1], [0, 0, 1, 1], [], []>} : vector<8x16xf32>, vector<16x8xf32>, vector<8x8xf32> -> vector<8x8xf32>
    %cst_47 = arith.constant -1.000000e+09 : f32
    %110 = vector.broadcast %cst_47 : f32 to vector<8x8xf32>
    %111 = arith.select %42, %109, %110 : vector<8x8xi1>, vector<8x8xf32>
    %cst_48 = arith.constant dense<0xFF800000> : vector<8xf32>
    %112 = vector.multi_reduction <maximumf>, %111, %cst_48 [1] : vector<8x8xf32> to vector<8xf32>
    %113 = vector.shape_cast %112 : vector<8xf32> to vector<8x1xf32>
    %114 = vector.broadcast %113 : vector<8x1xf32> to vector<8x8xf32>
    %115 = arith.subf %111, %114 : vector<8x8xf32>
    %116 = math.exp %115 : vector<8x8xf32>
    %cst_49 = arith.constant dense<0.000000e+00> : vector<8xf32>
    %117 = vector.multi_reduction <add>, %116, %cst_49 [1] : vector<8x8xf32> to vector<8xf32>
    %118 = vector.shape_cast %117 : vector<8xf32> to vector<8x1xf32>
    %119 = tpu.reciprocal %118 {approx = true} : vector<8x1xf32> -> vector<8x1xf32>
    %120 = vector.broadcast %119 : vector<8x1xf32> to vector<8x8xf32>
    %121 = arith.mulf %116, %120 : vector<8x8xf32>
    %cst_50 = arith.constant dense<0.000000e+00> : vector<8x16xf32>
    %122 = tpu.matmul %121, %107, %cst_50 {dimension_numbers = #tpu.dot_dimension_numbers<[1], [0], [0], [1], [0, 0, 1, 1], [], []>} : vector<8x8xf32>, vector<8x16xf32>, vector<8x16xf32> -> vector<8x16xf32>
    %123 = vector.extract_strided_slice %31 {offsets = [48, 0], sizes = [16, 64], strides = [1, 1]} : vector<64x64xf32> to vector<16x64xf32>
    %cst_51 = arith.constant dense<0.000000e+00> : vector<8x64xf32>
    %124 = tpu.matmul %122, %123, %cst_51 {dimension_numbers = #tpu.dot_dimension_numbers<[1], [0], [0], [1], [0, 0, 1, 1], [], []>} : vector<8x16xf32>, vector<16x64xf32>, vector<8x64xf32> -> vector<8x64xf32>
    %125 = arith.addf %104, %124 : vector<8x64xf32>
    %126 = arith.addf %1, %125 : vector<8x64xf32>
    %127 = vector.broadcast %32 : vector<1x64xf32> to vector<8x64xf32>
    %128 = arith.addf %126, %127 : vector<8x64xf32>
    %c0_52 = arith.constant 0 : index
    %c0_53 = arith.constant 0 : index
    %c0_54 = arith.constant 0 : index
    %129 = vector.load %arg11[%c0_52, %c0_53, %c0_54] : memref<1x8x64xf32, #tpu.memory_space<vmem>>, vector<1x8x64xf32>
    %130 = vector.shape_cast %129 : vector<1x8x64xf32> to vector<8x64xf32>
    %131 = vector.shape_cast %128 : vector<8x64xf32> to vector<1x8x64xf32>
    tpu.vector_store %arg11[%c0_52, %c0_53, %c0_54], %131 {strides = array<i32>} : memref<1x8x64xf32, #tpu.memory_space<vmem>>, vector<1x8x64xf32>,
    return
  }
  func.func @transform_0(%arg0: i32) -> (i32, i32, i32) {
    %c0_i32 = arith.constant 0 : i32
    %c0_i32_0 = arith.constant 0 : i32
    %c0_i32_1 = arith.constant 0 : i32
    return %arg0, %c0_i32, %c0_i32_0 : i32, i32, i32
  }
  func.func @transform_1(%arg0: i32) -> (i32, i32, i32) {
    %c0_i32 = arith.constant 0 : i32
    %c0_i32_0 = arith.constant 0 : i32
    %c0_i32_1 = arith.constant 0 : i32
    return %arg0, %c0_i32, %c0_i32_0 : i32, i32, i32
  }
  func.func @transform_2(%arg0: i32) -> (i32, i32) {
    %c0_i32 = arith.constant 0 : i32
    %c0_i32_0 = arith.constant 0 : i32
    %c0_i32_1 = arith.constant 0 : i32
    return %c0_i32, %c0_i32_0 : i32, i32
  }
  func.func @transform_3(%arg0: i32) -> (i32, i32) {
    %c0_i32 = arith.constant 0 : i32
    %c0_i32_0 = arith.constant 0 : i32
    %c0_i32_1 = arith.constant 0 : i32
    return %c0_i32, %c0_i32_0 : i32, i32
  }
  func.func @transform_4(%arg0: i32) -> (i32, i32) {
    %c0_i32 = arith.constant 0 : i32
    %c0_i32_0 = arith.constant 0 : i32
    %c0_i32_1 = arith.constant 0 : i32
    return %c0_i32, %c0_i32_0 : i32, i32
  }
  func.func @transform_5(%arg0: i32) -> (i32, i32) {
    %c0_i32 = arith.constant 0 : i32
    %c0_i32_0 = arith.constant 0 : i32
    %c0_i32_1 = arith.constant 0 : i32
    return %c0_i32, %c0_i32_0 : i32, i32
  }
  func.func @transform_6(%arg0: i32) -> (i32, i32) {
    %c0_i32 = arith.constant 0 : i32
    %c0_i32_0 = arith.constant 0 : i32
    %c0_i32_1 = arith.constant 0 : i32
    return %c0_i32, %c0_i32_0 : i32, i32
  }
  func.func @transform_7(%arg0: i32) -> (i32, i32) {
    %c0_i32 = arith.constant 0 : i32
    %c0_i32_0 = arith.constant 0 : i32
    %c0_i32_1 = arith.constant 0 : i32
    return %c0_i32, %c0_i32_0 : i32, i32
  }
  func.func @transform_8(%arg0: i32) -> (i32, i32) {
    %c0_i32 = arith.constant 0 : i32
    %c0_i32_0 = arith.constant 0 : i32
    %c0_i32_1 = arith.constant 0 : i32
    return %c0_i32, %c0_i32_0 : i32, i32
  }
  func.func @transform_9(%arg0: i32) -> (i32, i32) {
    %c0_i32 = arith.constant 0 : i32
    %c0_i32_0 = arith.constant 0 : i32
    %c0_i32_1 = arith.constant 0 : i32
    return %c0_i32, %c0_i32_0 : i32, i32
  }
  func.func @transform_10(%arg0: i32) -> (i32, i32, i32) {
    %c0_i32 = arith.constant 0 : i32
    %c0_i32_0 = arith.constant 0 : i32
    %c0_i32_1 = arith.constant 0 : i32
    return %arg0, %c0_i32, %c0_i32_0 : i32, i32, i32
  }
}

module attributes {stable_mosaic.version = 11 : i64} {
  func.func @_cross_attn_block_kernel(%arg0: i32, %arg1: memref<1x8x64xf32, #tpu.memory_space<vmem>>, %arg2: memref<1x8x64xf32, #tpu.memory_space<vmem>>, %arg3: memref<1x8x8xf32, #tpu.memory_space<vmem>>, %arg4: memref<1x64xf32, #tpu.memory_space<vmem>>, %arg5: memref<1x64xf32, #tpu.memory_space<vmem>>, %arg6: memref<64x64xf32, #tpu.memory_space<vmem>>, %arg7: memref<1x64xf32, #tpu.memory_space<vmem>>, %arg8: memref<64x128xf32, #tpu.memory_space<vmem>>, %arg9: memref<1x128xf32, #tpu.memory_space<vmem>>, %arg10: memref<64x64xf32, #tpu.memory_space<vmem>>, %arg11: memref<1x64xf32, #tpu.memory_space<vmem>>, %arg12: memref<1x8x64xf32, #tpu.memory_space<vmem>>) attributes {dimension_semantics = [#tpu.dimension_semantics<parallel>], iteration_bounds = array<i64: 2>, scalar_prefetch = 0 : i64, scratch_operands = 0 : i64, tpu.core_type = #tpu.core_type<tc>, window_params = [{transform_indices = @transform_0, window_bounds = array<i64: 1, 8, 64>}, {transform_indices = @transform_1, window_bounds = array<i64: 1, 8, 64>}, {transform_indices = @transform_2, window_bounds = array<i64: 1, 8, 8>}, {pipeline_mode = #tpu.pipeline_mode<synchronous>, transform_indices = @transform_3, window_bounds = array<i64: 1, 64>}, {pipeline_mode = #tpu.pipeline_mode<synchronous>, transform_indices = @transform_4, window_bounds = array<i64: 1, 64>}, {pipeline_mode = #tpu.pipeline_mode<synchronous>, transform_indices = @transform_5, window_bounds = array<i64: 64, 64>}, {pipeline_mode = #tpu.pipeline_mode<synchronous>, transform_indices = @transform_6, window_bounds = array<i64: 1, 64>}, {pipeline_mode = #tpu.pipeline_mode<synchronous>, transform_indices = @transform_7, window_bounds = array<i64: 64, 128>}, {pipeline_mode = #tpu.pipeline_mode<synchronous>, transform_indices = @transform_8, window_bounds = array<i64: 1, 128>}, {pipeline_mode = #tpu.pipeline_mode<synchronous>, transform_indices = @transform_9, window_bounds = array<i64: 64, 64>}, {pipeline_mode = #tpu.pipeline_mode<synchronous>, transform_indices = @transform_10, window_bounds = array<i64: 1, 64>}, {transform_indices = @transform_11, window_bounds = array<i64: 1, 8, 64>}]} {
    %c0 = arith.constant 0 : index
    %c0_0 = arith.constant 0 : index
    %c0_1 = arith.constant 0 : index
    %0 = vector.load %arg1[%c0, %c0_0, %c0_1] : memref<1x8x64xf32, #tpu.memory_space<vmem>>, vector<1x8x64xf32>
    %1 = vector.shape_cast %0 : vector<1x8x64xf32> to vector<8x64xf32>
    %c0_2 = arith.constant 0 : index
    %c0_3 = arith.constant 0 : index
    %2 = vector.load %arg4[%c0_2, %c0_3] : memref<1x64xf32, #tpu.memory_space<vmem>>, vector<1x64xf32>
    %c0_4 = arith.constant 0 : index
    %c0_5 = arith.constant 0 : index
    %3 = vector.load %arg5[%c0_4, %c0_5] : memref<1x64xf32, #tpu.memory_space<vmem>>, vector<1x64xf32>
    %cst = arith.constant dense<0.000000e+00> : vector<8xf32>
    %4 = vector.multi_reduction <add>, %1, %cst [1] : vector<8x64xf32> to vector<8xf32>
    %5 = vector.shape_cast %4 : vector<8xf32> to vector<8x1xf32>
    %cst_6 = arith.constant 6.400000e+01 : f32
    %6 = vector.broadcast %cst_6 : f32 to vector<8x1xf32>
    %7 = arith.divf %5, %6 : vector<8x1xf32>
    %8 = vector.broadcast %7 : vector<8x1xf32> to vector<8x64xf32>
    %9 = arith.subf %1, %8 : vector<8x64xf32>
    %10 = arith.mulf %9, %9 : vector<8x64xf32>
    %cst_7 = arith.constant dense<0.000000e+00> : vector<8xf32>
    %11 = vector.multi_reduction <add>, %10, %cst_7 [1] : vector<8x64xf32> to vector<8xf32>
    %12 = vector.shape_cast %11 : vector<8xf32> to vector<8x1xf32>
    %cst_8 = arith.constant 0.0158730168 : f32
    %13 = vector.broadcast %cst_8 : f32 to vector<8x1xf32>
    %14 = arith.mulf %12, %13 : vector<8x1xf32>
    %15 = math.sqrt %14 : vector<8x1xf32>
    %cst_9 = arith.constant 9.99999997E-7 : f32
    %16 = vector.broadcast %cst_9 : f32 to vector<8x1xf32>
    %17 = arith.addf %15, %16 : vector<8x1xf32>
    %18 = tpu.reciprocal %17 {approx = true} : vector<8x1xf32> -> vector<8x1xf32>
    %19 = vector.broadcast %2 : vector<1x64xf32> to vector<8x64xf32>
    %20 = arith.mulf %19, %9 : vector<8x64xf32>
    %21 = vector.broadcast %18 : vector<8x1xf32> to vector<8x64xf32>
    %22 = arith.mulf %20, %21 : vector<8x64xf32>
    %23 = vector.broadcast %3 : vector<1x64xf32> to vector<8x64xf32>
    %24 = arith.addf %22, %23 : vector<8x64xf32>
    %c0_10 = arith.constant 0 : index
    %c0_11 = arith.constant 0 : index
    %c0_12 = arith.constant 0 : index
    %25 = vector.load %arg2[%c0_10, %c0_11, %c0_12] : memref<1x8x64xf32, #tpu.memory_space<vmem>>, vector<1x8x64xf32>
    %26 = vector.shape_cast %25 : vector<1x8x64xf32> to vector<8x64xf32>
    %c0_13 = arith.constant 0 : index
    %c0_14 = arith.constant 0 : index
    %c0_15 = arith.constant 0 : index
    %27 = vector.load %arg3[%c0_13, %c0_14, %c0_15] : memref<1x8x8xf32, #tpu.memory_space<vmem>>, vector<1x8x8xf32>
    %28 = vector.shape_cast %27 : vector<1x8x8xf32> to vector<8x8xf32>
    %c0_16 = arith.constant 0 : index
    %c0_17 = arith.constant 0 : index
    %29 = vector.load %arg6[%c0_16, %c0_17] : memref<64x64xf32, #tpu.memory_space<vmem>>, vector<64x64xf32>
    %c0_18 = arith.constant 0 : index
    %c0_19 = arith.constant 0 : index
    %30 = vector.load %arg7[%c0_18, %c0_19] : memref<1x64xf32, #tpu.memory_space<vmem>>, vector<1x64xf32>
    %c0_20 = arith.constant 0 : index
    %c0_21 = arith.constant 0 : index
    %31 = vector.load %arg8[%c0_20, %c0_21] : memref<64x128xf32, #tpu.memory_space<vmem>>, vector<64x128xf32>
    %c0_22 = arith.constant 0 : index
    %c0_23 = arith.constant 0 : index
    %32 = vector.load %arg9[%c0_22, %c0_23] : memref<1x128xf32, #tpu.memory_space<vmem>>, vector<1x128xf32>
    %c0_24 = arith.constant 0 : index
    %c0_25 = arith.constant 0 : index
    %33 = vector.load %arg10[%c0_24, %c0_25] : memref<64x64xf32, #tpu.memory_space<vmem>>, vector<64x64xf32>
    %c0_26 = arith.constant 0 : index
    %c0_27 = arith.constant 0 : index
    %34 = vector.load %arg11[%c0_26, %c0_27] : memref<1x64xf32, #tpu.memory_space<vmem>>, vector<1x64xf32>
    %cst_28 = arith.constant dense<0.000000e+00> : vector<8x64xf32>
    %35 = tpu.matmul %24, %29, %cst_28 {dimension_numbers = #tpu.dot_dimension_numbers<[1], [0], [0], [1], [0, 0, 1, 1], [], []>} : vector<8x64xf32>, vector<64x64xf32>, vector<8x64xf32> -> vector<8x64xf32>
    %36 = vector.broadcast %30 : vector<1x64xf32> to vector<8x64xf32>
    %37 = arith.addf %35, %36 : vector<8x64xf32>
    %cst_29 = arith.constant dense<0.000000e+00> : vector<8x128xf32>
    %38 = tpu.matmul %26, %31, %cst_29 {dimension_numbers = #tpu.dot_dimension_numbers<[1], [0], [0], [1], [0, 0, 1, 1], [], []>} : vector<8x64xf32>, vector<64x128xf32>, vector<8x128xf32> -> vector<8x128xf32>
    %39 = vector.broadcast %32 : vector<1x128xf32> to vector<8x128xf32>
    %40 = arith.addf %38, %39 : vector<8x128xf32>
    %41 = vector.extract_strided_slice %40 {offsets = [0, 0], sizes = [8, 64], strides = [1, 1]} : vector<8x128xf32> to vector<8x64xf32>
    %42 = vector.extract_strided_slice %40 {offsets = [0, 64], sizes = [8, 64], strides = [1, 1]} : vector<8x128xf32> to vector<8x64xf32>
    %cst_30 = arith.constant 0.000000e+00 : f32
    %43 = vector.broadcast %cst_30 : f32 to vector<8x8xf32>
    %44 = arith.cmpf one, %28, %43 : vector<8x8xf32>
    %45 = vector.extract_strided_slice %37 {offsets = [0, 0], sizes = [8, 16], strides = [1, 1]} : vector<8x64xf32> to vector<8x16xf32>
    %46 = vector.extract_strided_slice %41 {offsets = [0, 0], sizes = [8, 16], strides = [1, 1]} : vector<8x64xf32> to vector<8x16xf32>
    %47 = vector.extract_strided_slice %42 {offsets = [0, 0], sizes = [8, 16], strides = [1, 1]} : vector<8x64xf32> to vector<8x16xf32>
    %48 = tpu.transpose %46, [1, 0] : vector<8x16xf32> -> vector<16x8xf32>
    %cst_31 = arith.constant dense<0.000000e+00> : vector<8x8xf32>
    %49 = tpu.matmul %45, %48, %cst_31 {dimension_numbers = #tpu.dot_dimension_numbers<[1], [0], [0], [1], [0, 0, 1, 1], [], []>} : vector<8x16xf32>, vector<16x8xf32>, vector<8x8xf32> -> vector<8x8xf32>
    %cst_32 = arith.constant -1.000000e+09 : f32
    %50 = vector.broadcast %cst_32 : f32 to vector<8x8xf32>
    %51 = arith.select %44, %49, %50 : vector<8x8xi1>, vector<8x8xf32>
    %cst_33 = arith.constant dense<0xFF800000> : vector<8xf32>
    %52 = vector.multi_reduction <maximumf>, %51, %cst_33 [1] : vector<8x8xf32> to vector<8xf32>
    %53 = vector.shape_cast %52 : vector<8xf32> to vector<8x1xf32>
    %54 = vector.broadcast %53 : vector<8x1xf32> to vector<8x8xf32>
    %55 = arith.subf %51, %54 : vector<8x8xf32>
    %56 = math.exp %55 : vector<8x8xf32>
    %cst_34 = arith.constant dense<0.000000e+00> : vector<8xf32>
    %57 = vector.multi_reduction <add>, %56, %cst_34 [1] : vector<8x8xf32> to vector<8xf32>
    %58 = vector.shape_cast %57 : vector<8xf32> to vector<8x1xf32>
    %59 = tpu.reciprocal %58 {approx = true} : vector<8x1xf32> -> vector<8x1xf32>
    %60 = vector.broadcast %59 : vector<8x1xf32> to vector<8x8xf32>
    %61 = arith.mulf %56, %60 : vector<8x8xf32>
    %cst_35 = arith.constant dense<0.000000e+00> : vector<8x16xf32>
    %62 = tpu.matmul %61, %47, %cst_35 {dimension_numbers = #tpu.dot_dimension_numbers<[1], [0], [0], [1], [0, 0, 1, 1], [], []>} : vector<8x8xf32>, vector<8x16xf32>, vector<8x16xf32> -> vector<8x16xf32>
    %63 = vector.extract_strided_slice %33 {offsets = [0, 0], sizes = [16, 64], strides = [1, 1]} : vector<64x64xf32> to vector<16x64xf32>
    %cst_36 = arith.constant dense<0.000000e+00> : vector<8x64xf32>
    %64 = tpu.matmul %62, %63, %cst_36 {dimension_numbers = #tpu.dot_dimension_numbers<[1], [0], [0], [1], [0, 0, 1, 1], [], []>} : vector<8x16xf32>, vector<16x64xf32>, vector<8x64xf32> -> vector<8x64xf32>
    %65 = vector.extract_strided_slice %37 {offsets = [0, 16], sizes = [8, 16], strides = [1, 1]} : vector<8x64xf32> to vector<8x16xf32>
    %66 = vector.extract_strided_slice %41 {offsets = [0, 16], sizes = [8, 16], strides = [1, 1]} : vector<8x64xf32> to vector<8x16xf32>
    %67 = vector.extract_strided_slice %42 {offsets = [0, 16], sizes = [8, 16], strides = [1, 1]} : vector<8x64xf32> to vector<8x16xf32>
    %68 = tpu.transpose %66, [1, 0] : vector<8x16xf32> -> vector<16x8xf32>
    %cst_37 = arith.constant dense<0.000000e+00> : vector<8x8xf32>
    %69 = tpu.matmul %65, %68, %cst_37 {dimension_numbers = #tpu.dot_dimension_numbers<[1], [0], [0], [1], [0, 0, 1, 1], [], []>} : vector<8x16xf32>, vector<16x8xf32>, vector<8x8xf32> -> vector<8x8xf32>
    %cst_38 = arith.constant -1.000000e+09 : f32
    %70 = vector.broadcast %cst_38 : f32 to vector<8x8xf32>
    %71 = arith.select %44, %69, %70 : vector<8x8xi1>, vector<8x8xf32>
    %cst_39 = arith.constant dense<0xFF800000> : vector<8xf32>
    %72 = vector.multi_reduction <maximumf>, %71, %cst_39 [1] : vector<8x8xf32> to vector<8xf32>
    %73 = vector.shape_cast %72 : vector<8xf32> to vector<8x1xf32>
    %74 = vector.broadcast %73 : vector<8x1xf32> to vector<8x8xf32>
    %75 = arith.subf %71, %74 : vector<8x8xf32>
    %76 = math.exp %75 : vector<8x8xf32>
    %cst_40 = arith.constant dense<0.000000e+00> : vector<8xf32>
    %77 = vector.multi_reduction <add>, %76, %cst_40 [1] : vector<8x8xf32> to vector<8xf32>
    %78 = vector.shape_cast %77 : vector<8xf32> to vector<8x1xf32>
    %79 = tpu.reciprocal %78 {approx = true} : vector<8x1xf32> -> vector<8x1xf32>
    %80 = vector.broadcast %79 : vector<8x1xf32> to vector<8x8xf32>
    %81 = arith.mulf %76, %80 : vector<8x8xf32>
    %cst_41 = arith.constant dense<0.000000e+00> : vector<8x16xf32>
    %82 = tpu.matmul %81, %67, %cst_41 {dimension_numbers = #tpu.dot_dimension_numbers<[1], [0], [0], [1], [0, 0, 1, 1], [], []>} : vector<8x8xf32>, vector<8x16xf32>, vector<8x16xf32> -> vector<8x16xf32>
    %83 = vector.extract_strided_slice %33 {offsets = [16, 0], sizes = [16, 64], strides = [1, 1]} : vector<64x64xf32> to vector<16x64xf32>
    %cst_42 = arith.constant dense<0.000000e+00> : vector<8x64xf32>
    %84 = tpu.matmul %82, %83, %cst_42 {dimension_numbers = #tpu.dot_dimension_numbers<[1], [0], [0], [1], [0, 0, 1, 1], [], []>} : vector<8x16xf32>, vector<16x64xf32>, vector<8x64xf32> -> vector<8x64xf32>
    %85 = arith.addf %64, %84 : vector<8x64xf32>
    %86 = vector.extract_strided_slice %37 {offsets = [0, 32], sizes = [8, 16], strides = [1, 1]} : vector<8x64xf32> to vector<8x16xf32>
    %87 = vector.extract_strided_slice %41 {offsets = [0, 32], sizes = [8, 16], strides = [1, 1]} : vector<8x64xf32> to vector<8x16xf32>
    %88 = vector.extract_strided_slice %42 {offsets = [0, 32], sizes = [8, 16], strides = [1, 1]} : vector<8x64xf32> to vector<8x16xf32>
    %89 = tpu.transpose %87, [1, 0] : vector<8x16xf32> -> vector<16x8xf32>
    %cst_43 = arith.constant dense<0.000000e+00> : vector<8x8xf32>
    %90 = tpu.matmul %86, %89, %cst_43 {dimension_numbers = #tpu.dot_dimension_numbers<[1], [0], [0], [1], [0, 0, 1, 1], [], []>} : vector<8x16xf32>, vector<16x8xf32>, vector<8x8xf32> -> vector<8x8xf32>
    %cst_44 = arith.constant -1.000000e+09 : f32
    %91 = vector.broadcast %cst_44 : f32 to vector<8x8xf32>
    %92 = arith.select %44, %90, %91 : vector<8x8xi1>, vector<8x8xf32>
    %cst_45 = arith.constant dense<0xFF800000> : vector<8xf32>
    %93 = vector.multi_reduction <maximumf>, %92, %cst_45 [1] : vector<8x8xf32> to vector<8xf32>
    %94 = vector.shape_cast %93 : vector<8xf32> to vector<8x1xf32>
    %95 = vector.broadcast %94 : vector<8x1xf32> to vector<8x8xf32>
    %96 = arith.subf %92, %95 : vector<8x8xf32>
    %97 = math.exp %96 : vector<8x8xf32>
    %cst_46 = arith.constant dense<0.000000e+00> : vector<8xf32>
    %98 = vector.multi_reduction <add>, %97, %cst_46 [1] : vector<8x8xf32> to vector<8xf32>
    %99 = vector.shape_cast %98 : vector<8xf32> to vector<8x1xf32>
    %100 = tpu.reciprocal %99 {approx = true} : vector<8x1xf32> -> vector<8x1xf32>
    %101 = vector.broadcast %100 : vector<8x1xf32> to vector<8x8xf32>
    %102 = arith.mulf %97, %101 : vector<8x8xf32>
    %cst_47 = arith.constant dense<0.000000e+00> : vector<8x16xf32>
    %103 = tpu.matmul %102, %88, %cst_47 {dimension_numbers = #tpu.dot_dimension_numbers<[1], [0], [0], [1], [0, 0, 1, 1], [], []>} : vector<8x8xf32>, vector<8x16xf32>, vector<8x16xf32> -> vector<8x16xf32>
    %104 = vector.extract_strided_slice %33 {offsets = [32, 0], sizes = [16, 64], strides = [1, 1]} : vector<64x64xf32> to vector<16x64xf32>
    %cst_48 = arith.constant dense<0.000000e+00> : vector<8x64xf32>
    %105 = tpu.matmul %103, %104, %cst_48 {dimension_numbers = #tpu.dot_dimension_numbers<[1], [0], [0], [1], [0, 0, 1, 1], [], []>} : vector<8x16xf32>, vector<16x64xf32>, vector<8x64xf32> -> vector<8x64xf32>
    %106 = arith.addf %85, %105 : vector<8x64xf32>
    %107 = vector.extract_strided_slice %37 {offsets = [0, 48], sizes = [8, 16], strides = [1, 1]} : vector<8x64xf32> to vector<8x16xf32>
    %108 = vector.extract_strided_slice %41 {offsets = [0, 48], sizes = [8, 16], strides = [1, 1]} : vector<8x64xf32> to vector<8x16xf32>
    %109 = vector.extract_strided_slice %42 {offsets = [0, 48], sizes = [8, 16], strides = [1, 1]} : vector<8x64xf32> to vector<8x16xf32>
    %110 = tpu.transpose %108, [1, 0] : vector<8x16xf32> -> vector<16x8xf32>
    %cst_49 = arith.constant dense<0.000000e+00> : vector<8x8xf32>
    %111 = tpu.matmul %107, %110, %cst_49 {dimension_numbers = #tpu.dot_dimension_numbers<[1], [0], [0], [1], [0, 0, 1, 1], [], []>} : vector<8x16xf32>, vector<16x8xf32>, vector<8x8xf32> -> vector<8x8xf32>
    %cst_50 = arith.constant -1.000000e+09 : f32
    %112 = vector.broadcast %cst_50 : f32 to vector<8x8xf32>
    %113 = arith.select %44, %111, %112 : vector<8x8xi1>, vector<8x8xf32>
    %cst_51 = arith.constant dense<0xFF800000> : vector<8xf32>
    %114 = vector.multi_reduction <maximumf>, %113, %cst_51 [1] : vector<8x8xf32> to vector<8xf32>
    %115 = vector.shape_cast %114 : vector<8xf32> to vector<8x1xf32>
    %116 = vector.broadcast %115 : vector<8x1xf32> to vector<8x8xf32>
    %117 = arith.subf %113, %116 : vector<8x8xf32>
    %118 = math.exp %117 : vector<8x8xf32>
    %cst_52 = arith.constant dense<0.000000e+00> : vector<8xf32>
    %119 = vector.multi_reduction <add>, %118, %cst_52 [1] : vector<8x8xf32> to vector<8xf32>
    %120 = vector.shape_cast %119 : vector<8xf32> to vector<8x1xf32>
    %121 = tpu.reciprocal %120 {approx = true} : vector<8x1xf32> -> vector<8x1xf32>
    %122 = vector.broadcast %121 : vector<8x1xf32> to vector<8x8xf32>
    %123 = arith.mulf %118, %122 : vector<8x8xf32>
    %cst_53 = arith.constant dense<0.000000e+00> : vector<8x16xf32>
    %124 = tpu.matmul %123, %109, %cst_53 {dimension_numbers = #tpu.dot_dimension_numbers<[1], [0], [0], [1], [0, 0, 1, 1], [], []>} : vector<8x8xf32>, vector<8x16xf32>, vector<8x16xf32> -> vector<8x16xf32>
    %125 = vector.extract_strided_slice %33 {offsets = [48, 0], sizes = [16, 64], strides = [1, 1]} : vector<64x64xf32> to vector<16x64xf32>
    %cst_54 = arith.constant dense<0.000000e+00> : vector<8x64xf32>
    %126 = tpu.matmul %124, %125, %cst_54 {dimension_numbers = #tpu.dot_dimension_numbers<[1], [0], [0], [1], [0, 0, 1, 1], [], []>} : vector<8x16xf32>, vector<16x64xf32>, vector<8x64xf32> -> vector<8x64xf32>
    %127 = arith.addf %106, %126 : vector<8x64xf32>
    %128 = arith.addf %1, %127 : vector<8x64xf32>
    %129 = vector.broadcast %34 : vector<1x64xf32> to vector<8x64xf32>
    %130 = arith.addf %128, %129 : vector<8x64xf32>
    %c0_55 = arith.constant 0 : index
    %c0_56 = arith.constant 0 : index
    %c0_57 = arith.constant 0 : index
    %131 = vector.load %arg12[%c0_55, %c0_56, %c0_57] : memref<1x8x64xf32, #tpu.memory_space<vmem>>, vector<1x8x64xf32>
    %132 = vector.shape_cast %131 : vector<1x8x64xf32> to vector<8x64xf32>
    %133 = vector.shape_cast %130 : vector<8x64xf32> to vector<1x8x64xf32>
    tpu.vector_store %arg12[%c0_55, %c0_56, %c0_57], %133 {strides = array<i32>} : memref<1x8x64xf32, #tpu.memory_space<vmem>>, vector<1x8x64xf32>,
    return
  }
  func.func @transform_0(%arg0: i32) -> (i32, i32, i32) {
    %c0_i32 = arith.constant 0 : i32
    %c0_i32_0 = arith.constant 0 : i32
    %c0_i32_1 = arith.constant 0 : i32
    return %arg0, %c0_i32, %c0_i32_0 : i32, i32, i32
  }
  func.func @transform_1(%arg0: i32) -> (i32, i32, i32) {
    %c0_i32 = arith.constant 0 : i32
    %c0_i32_0 = arith.constant 0 : i32
    %c0_i32_1 = arith.constant 0 : i32
    return %arg0, %c0_i32, %c0_i32_0 : i32, i32, i32
  }
  func.func @transform_2(%arg0: i32) -> (i32, i32, i32) {
    %c0_i32 = arith.constant 0 : i32
    %c0_i32_0 = arith.constant 0 : i32
    %c0_i32_1 = arith.constant 0 : i32
    return %arg0, %c0_i32, %c0_i32_0 : i32, i32, i32
  }
  func.func @transform_3(%arg0: i32) -> (i32, i32) {
    %c0_i32 = arith.constant 0 : i32
    %c0_i32_0 = arith.constant 0 : i32
    %c0_i32_1 = arith.constant 0 : i32
    return %c0_i32, %c0_i32_0 : i32, i32
  }
  func.func @transform_4(%arg0: i32) -> (i32, i32) {
    %c0_i32 = arith.constant 0 : i32
    %c0_i32_0 = arith.constant 0 : i32
    %c0_i32_1 = arith.constant 0 : i32
    return %c0_i32, %c0_i32_0 : i32, i32
  }
  func.func @transform_5(%arg0: i32) -> (i32, i32) {
    %c0_i32 = arith.constant 0 : i32
    %c0_i32_0 = arith.constant 0 : i32
    %c0_i32_1 = arith.constant 0 : i32
    return %c0_i32, %c0_i32_0 : i32, i32
  }
  func.func @transform_6(%arg0: i32) -> (i32, i32) {
    %c0_i32 = arith.constant 0 : i32
    %c0_i32_0 = arith.constant 0 : i32
    %c0_i32_1 = arith.constant 0 : i32
    return %c0_i32, %c0_i32_0 : i32, i32
  }
  func.func @transform_7(%arg0: i32) -> (i32, i32) {
    %c0_i32 = arith.constant 0 : i32
    %c0_i32_0 = arith.constant 0 : i32
    %c0_i32_1 = arith.constant 0 : i32
    return %c0_i32, %c0_i32_0 : i32, i32
  }
  func.func @transform_8(%arg0: i32) -> (i32, i32) {
    %c0_i32 = arith.constant 0 : i32
    %c0_i32_0 = arith.constant 0 : i32
    %c0_i32_1 = arith.constant 0 : i32
    return %c0_i32, %c0_i32_0 : i32, i32
  }
  func.func @transform_9(%arg0: i32) -> (i32, i32) {
    %c0_i32 = arith.constant 0 : i32
    %c0_i32_0 = arith.constant 0 : i32
    %c0_i32_1 = arith.constant 0 : i32
    return %c0_i32, %c0_i32_0 : i32, i32
  }
  func.func @transform_10(%arg0: i32) -> (i32, i32) {
    %c0_i32 = arith.constant 0 : i32
    %c0_i32_0 = arith.constant 0 : i32
    %c0_i32_1 = arith.constant 0 : i32
    return %c0_i32, %c0_i32_0 : i32, i32
  }
  func.func @transform_11(%arg0: i32) -> (i32, i32, i32) {
    %c0_i32 = arith.constant 0 : i32
    %c0_i32_0 = arith.constant 0 : i32
    %c0_i32_1 = arith.constant 0 : i32
    return %arg0, %c0_i32, %c0_i32_0 : i32, i32, i32
  }
}

module attributes {stable_mosaic.version = 11 : i64} {
  func.func @_embed_kernel(%arg0: i32, %arg1: memref<1x8x3xf32, #tpu.memory_space<vmem>>, %arg2: memref<8x64xf32, #tpu.memory_space<vmem>>, %arg3: memref<3x64xf32, #tpu.memory_space<vmem>>, %arg4: memref<1x64xf32, #tpu.memory_space<vmem>>, %arg5: memref<1x8x64xf32, #tpu.memory_space<vmem>>) attributes {dimension_semantics = [#tpu.dimension_semantics<parallel>], iteration_bounds = array<i64: 2>, scalar_prefetch = 0 : i64, scratch_operands = 0 : i64, tpu.core_type = #tpu.core_type<tc>, window_params = [{transform_indices = @transform_0, window_bounds = array<i64: 1, 8, 3>}, {pipeline_mode = #tpu.pipeline_mode<synchronous>, transform_indices = @transform_1, window_bounds = array<i64: 8, 64>}, {pipeline_mode = #tpu.pipeline_mode<synchronous>, transform_indices = @transform_2, window_bounds = array<i64: 3, 64>}, {pipeline_mode = #tpu.pipeline_mode<synchronous>, transform_indices = @transform_3, window_bounds = array<i64: 1, 64>}, {transform_indices = @transform_4, window_bounds = array<i64: 1, 8, 64>}]} {
    %c0 = arith.constant 0 : index
    %c0_0 = arith.constant 0 : index
    %c0_1 = arith.constant 0 : index
    %0 = vector.load %arg1[%c0, %c0_0, %c0_1] : memref<1x8x3xf32, #tpu.memory_space<vmem>>, vector<1x8x3xf32>
    %1 = vector.shape_cast %0 : vector<1x8x3xf32> to vector<8x3xf32>
    %c0_2 = arith.constant 0 : index
    %c0_3 = arith.constant 0 : index
    %2 = vector.load %arg3[%c0_2, %c0_3] : memref<3x64xf32, #tpu.memory_space<vmem>>, vector<3x64xf32>
    %cst = arith.constant dense<0.000000e+00> : vector<8x64xf32>
    %3 = tpu.matmul %1, %2, %cst {dimension_numbers = #tpu.dot_dimension_numbers<[1], [0], [0], [1], [0, 0, 1, 1], [], []>} : vector<8x3xf32>, vector<3x64xf32>, vector<8x64xf32> -> vector<8x64xf32>
    %c0_4 = arith.constant 0 : index
    %c0_5 = arith.constant 0 : index
    %4 = vector.load %arg4[%c0_4, %c0_5] : memref<1x64xf32, #tpu.memory_space<vmem>>, vector<1x64xf32>
    %5 = vector.broadcast %4 : vector<1x64xf32> to vector<8x64xf32>
    %6 = arith.addf %3, %5 : vector<8x64xf32>
    %c0_6 = arith.constant 0 : index
    %c0_7 = arith.constant 0 : index
    %7 = vector.load %arg2[%c0_6, %c0_7] : memref<8x64xf32, #tpu.memory_space<vmem>>, vector<8x64xf32>
    %8 = arith.addf %6, %7 : vector<8x64xf32>
    %c0_8 = arith.constant 0 : index
    %c0_9 = arith.constant 0 : index
    %c0_10 = arith.constant 0 : index
    %9 = vector.load %arg5[%c0_8, %c0_9, %c0_10] : memref<1x8x64xf32, #tpu.memory_space<vmem>>, vector<1x8x64xf32>
    %10 = vector.shape_cast %9 : vector<1x8x64xf32> to vector<8x64xf32>
    %11 = vector.shape_cast %8 : vector<8x64xf32> to vector<1x8x64xf32>
    tpu.vector_store %arg5[%c0_8, %c0_9, %c0_10], %11 {strides = array<i32>} : memref<1x8x64xf32, #tpu.memory_space<vmem>>, vector<1x8x64xf32>,
    return
  }
  func.func @transform_0(%arg0: i32) -> (i32, i32, i32) {
    %c0_i32 = arith.constant 0 : i32
    %c0_i32_0 = arith.constant 0 : i32
    %c0_i32_1 = arith.constant 0 : i32
    return %arg0, %c0_i32, %c0_i32_0 : i32, i32, i32
  }
  func.func @transform_1(%arg0: i32) -> (i32, i32) {
    %c0_i32 = arith.constant 0 : i32
    %c0_i32_0 = arith.constant 0 : i32
    %c0_i32_1 = arith.constant 0 : i32
    return %c0_i32, %c0_i32_0 : i32, i32
  }
  func.func @transform_2(%arg0: i32) -> (i32, i32) {
    %c0_i32 = arith.constant 0 : i32
    %c0_i32_0 = arith.constant 0 : i32
    %c0_i32_1 = arith.constant 0 : i32
    return %c0_i32, %c0_i32_0 : i32, i32
  }
  func.func @transform_3(%arg0: i32) -> (i32, i32) {
    %c0_i32 = arith.constant 0 : i32
    %c0_i32_0 = arith.constant 0 : i32
    %c0_i32_1 = arith.constant 0 : i32
    return %c0_i32, %c0_i32_0 : i32, i32
  }
  func.func @transform_4(%arg0: i32) -> (i32, i32, i32) {
    %c0_i32 = arith.constant 0 : i32
    %c0_i32_0 = arith.constant 0 : i32
    %c0_i32_1 = arith.constant 0 : i32
    return %arg0, %c0_i32, %c0_i32_0 : i32, i32, i32
  }
}

module attributes {stable_mosaic.version = 11 : i64} {
  func.func @_ff_block_kernel(%arg0: i32, %arg1: memref<1x8x64xf32, #tpu.memory_space<vmem>>, %arg2: memref<1x64xf32, #tpu.memory_space<vmem>>, %arg3: memref<1x64xf32, #tpu.memory_space<vmem>>, %arg4: memref<64x128xf32, #tpu.memory_space<vmem>>, %arg5: memref<1x128xf32, #tpu.memory_space<vmem>>, %arg6: memref<128x64xf32, #tpu.memory_space<vmem>>, %arg7: memref<1x64xf32, #tpu.memory_space<vmem>>, %arg8: memref<1x8x64xf32, #tpu.memory_space<vmem>>) attributes {dimension_semantics = [#tpu.dimension_semantics<parallel>], iteration_bounds = array<i64: 2>, scalar_prefetch = 0 : i64, scratch_operands = 0 : i64, tpu.core_type = #tpu.core_type<tc>, window_params = [{transform_indices = @transform_0, window_bounds = array<i64: 1, 8, 64>}, {pipeline_mode = #tpu.pipeline_mode<synchronous>, transform_indices = @transform_1, window_bounds = array<i64: 1, 64>}, {pipeline_mode = #tpu.pipeline_mode<synchronous>, transform_indices = @transform_2, window_bounds = array<i64: 1, 64>}, {pipeline_mode = #tpu.pipeline_mode<synchronous>, transform_indices = @transform_3, window_bounds = array<i64: 64, 128>}, {pipeline_mode = #tpu.pipeline_mode<synchronous>, transform_indices = @transform_4, window_bounds = array<i64: 1, 128>}, {pipeline_mode = #tpu.pipeline_mode<synchronous>, transform_indices = @transform_5, window_bounds = array<i64: 128, 64>}, {pipeline_mode = #tpu.pipeline_mode<synchronous>, transform_indices = @transform_6, window_bounds = array<i64: 1, 64>}, {transform_indices = @transform_7, window_bounds = array<i64: 1, 8, 64>}]} {
    %c0 = arith.constant 0 : index
    %c0_0 = arith.constant 0 : index
    %c0_1 = arith.constant 0 : index
    %0 = vector.load %arg1[%c0, %c0_0, %c0_1] : memref<1x8x64xf32, #tpu.memory_space<vmem>>, vector<1x8x64xf32>
    %1 = vector.shape_cast %0 : vector<1x8x64xf32> to vector<8x64xf32>
    %c0_2 = arith.constant 0 : index
    %c0_3 = arith.constant 0 : index
    %2 = vector.load %arg2[%c0_2, %c0_3] : memref<1x64xf32, #tpu.memory_space<vmem>>, vector<1x64xf32>
    %c0_4 = arith.constant 0 : index
    %c0_5 = arith.constant 0 : index
    %3 = vector.load %arg3[%c0_4, %c0_5] : memref<1x64xf32, #tpu.memory_space<vmem>>, vector<1x64xf32>
    %cst = arith.constant dense<0.000000e+00> : vector<8xf32>
    %4 = vector.multi_reduction <add>, %1, %cst [1] : vector<8x64xf32> to vector<8xf32>
    %5 = vector.shape_cast %4 : vector<8xf32> to vector<8x1xf32>
    %cst_6 = arith.constant 6.400000e+01 : f32
    %6 = vector.broadcast %cst_6 : f32 to vector<8x1xf32>
    %7 = arith.divf %5, %6 : vector<8x1xf32>
    %8 = vector.broadcast %7 : vector<8x1xf32> to vector<8x64xf32>
    %9 = arith.subf %1, %8 : vector<8x64xf32>
    %10 = arith.mulf %9, %9 : vector<8x64xf32>
    %cst_7 = arith.constant dense<0.000000e+00> : vector<8xf32>
    %11 = vector.multi_reduction <add>, %10, %cst_7 [1] : vector<8x64xf32> to vector<8xf32>
    %12 = vector.shape_cast %11 : vector<8xf32> to vector<8x1xf32>
    %cst_8 = arith.constant 0.0158730168 : f32
    %13 = vector.broadcast %cst_8 : f32 to vector<8x1xf32>
    %14 = arith.mulf %12, %13 : vector<8x1xf32>
    %15 = math.sqrt %14 : vector<8x1xf32>
    %cst_9 = arith.constant 9.99999997E-7 : f32
    %16 = vector.broadcast %cst_9 : f32 to vector<8x1xf32>
    %17 = arith.addf %15, %16 : vector<8x1xf32>
    %18 = tpu.reciprocal %17 {approx = true} : vector<8x1xf32> -> vector<8x1xf32>
    %19 = vector.broadcast %2 : vector<1x64xf32> to vector<8x64xf32>
    %20 = arith.mulf %19, %9 : vector<8x64xf32>
    %21 = vector.broadcast %18 : vector<8x1xf32> to vector<8x64xf32>
    %22 = arith.mulf %20, %21 : vector<8x64xf32>
    %23 = vector.broadcast %3 : vector<1x64xf32> to vector<8x64xf32>
    %24 = arith.addf %22, %23 : vector<8x64xf32>
    %c0_10 = arith.constant 0 : index
    %c0_11 = arith.constant 0 : index
    %25 = vector.load %arg4[%c0_10, %c0_11] : memref<64x128xf32, #tpu.memory_space<vmem>>, vector<64x128xf32>
    %cst_12 = arith.constant dense<0.000000e+00> : vector<8x128xf32>
    %26 = tpu.matmul %24, %25, %cst_12 {dimension_numbers = #tpu.dot_dimension_numbers<[1], [0], [0], [1], [0, 0, 1, 1], [], []>} : vector<8x64xf32>, vector<64x128xf32>, vector<8x128xf32> -> vector<8x128xf32>
    %c0_13 = arith.constant 0 : index
    %c0_14 = arith.constant 0 : index
    %27 = vector.load %arg5[%c0_13, %c0_14] : memref<1x128xf32, #tpu.memory_space<vmem>>, vector<1x128xf32>
    %28 = vector.broadcast %27 : vector<1x128xf32> to vector<8x128xf32>
    %29 = arith.addf %26, %28 : vector<8x128xf32>
    %cst_15 = arith.constant 0.000000e+00 : f32
    %30 = vector.broadcast %cst_15 : f32 to vector<8x128xf32>
    %31 = arith.maximumf %29, %30 : vector<8x128xf32>
    %c0_16 = arith.constant 0 : index
    %c0_17 = arith.constant 0 : index
    %32 = vector.load %arg6[%c0_16, %c0_17] : memref<128x64xf32, #tpu.memory_space<vmem>>, vector<128x64xf32>
    %cst_18 = arith.constant dense<0.000000e+00> : vector<8x64xf32>
    %33 = tpu.matmul %31, %32, %cst_18 {dimension_numbers = #tpu.dot_dimension_numbers<[1], [0], [0], [1], [0, 0, 1, 1], [], []>} : vector<8x128xf32>, vector<128x64xf32>, vector<8x64xf32> -> vector<8x64xf32>
    %34 = arith.addf %1, %33 : vector<8x64xf32>
    %c0_19 = arith.constant 0 : index
    %c0_20 = arith.constant 0 : index
    %35 = vector.load %arg7[%c0_19, %c0_20] : memref<1x64xf32, #tpu.memory_space<vmem>>, vector<1x64xf32>
    %36 = vector.broadcast %35 : vector<1x64xf32> to vector<8x64xf32>
    %37 = arith.addf %34, %36 : vector<8x64xf32>
    %c0_21 = arith.constant 0 : index
    %c0_22 = arith.constant 0 : index
    %c0_23 = arith.constant 0 : index
    %38 = vector.load %arg8[%c0_21, %c0_22, %c0_23] : memref<1x8x64xf32, #tpu.memory_space<vmem>>, vector<1x8x64xf32>
    %39 = vector.shape_cast %38 : vector<1x8x64xf32> to vector<8x64xf32>
    %40 = vector.shape_cast %37 : vector<8x64xf32> to vector<1x8x64xf32>
    tpu.vector_store %arg8[%c0_21, %c0_22, %c0_23], %40 {strides = array<i32>} : memref<1x8x64xf32, #tpu.memory_space<vmem>>, vector<1x8x64xf32>,
    return
  }
  func.func @transform_0(%arg0: i32) -> (i32, i32, i32) {
    %c0_i32 = arith.constant 0 : i32
    %c0_i32_0 = arith.constant 0 : i32
    %c0_i32_1 = arith.constant 0 : i32
    return %arg0, %c0_i32, %c0_i32_0 : i32, i32, i32
  }
  func.func @transform_1(%arg0: i32) -> (i32, i32) {
    %c0_i32 = arith.constant 0 : i32
    %c0_i32_0 = arith.constant 0 : i32
    %c0_i32_1 = arith.constant 0 : i32
    return %c0_i32, %c0_i32_0 : i32, i32
  }
  func.func @transform_2(%arg0: i32) -> (i32, i32) {
    %c0_i32 = arith.constant 0 : i32
    %c0_i32_0 = arith.constant 0 : i32
    %c0_i32_1 = arith.constant 0 : i32
    return %c0_i32, %c0_i32_0 : i32, i32
  }
  func.func @transform_3(%arg0: i32) -> (i32, i32) {
    %c0_i32 = arith.constant 0 : i32
    %c0_i32_0 = arith.constant 0 : i32
    %c0_i32_1 = arith.constant 0 : i32
    return %c0_i32, %c0_i32_0 : i32, i32
  }
  func.func @transform_4(%arg0: i32) -> (i32, i32) {
    %c0_i32 = arith.constant 0 : i32
    %c0_i32_0 = arith.constant 0 : i32
    %c0_i32_1 = arith.constant 0 : i32
    return %c0_i32, %c0_i32_0 : i32, i32
  }
  func.func @transform_5(%arg0: i32) -> (i32, i32) {
    %c0_i32 = arith.constant 0 : i32
    %c0_i32_0 = arith.constant 0 : i32
    %c0_i32_1 = arith.constant 0 : i32
    return %c0_i32, %c0_i32_0 : i32, i32
  }
  func.func @transform_6(%arg0: i32) -> (i32, i32) {
    %c0_i32 = arith.constant 0 : i32
    %c0_i32_0 = arith.constant 0 : i32
    %c0_i32_1 = arith.constant 0 : i32
    return %c0_i32, %c0_i32_0 : i32, i32
  }
  func.func @transform_7(%arg0: i32) -> (i32, i32, i32) {
    %c0_i32 = arith.constant 0 : i32
    %c0_i32_0 = arith.constant 0 : i32
    %c0_i32_1 = arith.constant 0 : i32
    return %arg0, %c0_i32, %c0_i32_0 : i32, i32, i32
  }
}

module attributes {stable_mosaic.version = 11 : i64} {
  func.func @_self_attn_block_kernel(%arg0: i32, %arg1: memref<1x8x64xf32, #tpu.memory_space<vmem>>, %arg2: memref<1x8x8xf32, #tpu.memory_space<vmem>>, %arg3: memref<1x64xf32, #tpu.memory_space<vmem>>, %arg4: memref<1x64xf32, #tpu.memory_space<vmem>>, %arg5: memref<64x64xf32, #tpu.memory_space<vmem>>, %arg6: memref<1x64xf32, #tpu.memory_space<vmem>>, %arg7: memref<64x128xf32, #tpu.memory_space<vmem>>, %arg8: memref<1x128xf32, #tpu.memory_space<vmem>>, %arg9: memref<64x64xf32, #tpu.memory_space<vmem>>, %arg10: memref<1x64xf32, #tpu.memory_space<vmem>>, %arg11: memref<1x8x64xf32, #tpu.memory_space<vmem>>) attributes {dimension_semantics = [#tpu.dimension_semantics<parallel>], iteration_bounds = array<i64: 2>, scalar_prefetch = 0 : i64, scratch_operands = 0 : i64, tpu.core_type = #tpu.core_type<tc>, window_params = [{transform_indices = @transform_0, window_bounds = array<i64: 1, 8, 64>}, {transform_indices = @transform_1, window_bounds = array<i64: 1, 8, 8>}, {pipeline_mode = #tpu.pipeline_mode<synchronous>, transform_indices = @transform_2, window_bounds = array<i64: 1, 64>}, {pipeline_mode = #tpu.pipeline_mode<synchronous>, transform_indices = @transform_3, window_bounds = array<i64: 1, 64>}, {pipeline_mode = #tpu.pipeline_mode<synchronous>, transform_indices = @transform_4, window_bounds = array<i64: 64, 64>}, {pipeline_mode = #tpu.pipeline_mode<synchronous>, transform_indices = @transform_5, window_bounds = array<i64: 1, 64>}, {pipeline_mode = #tpu.pipeline_mode<synchronous>, transform_indices = @transform_6, window_bounds = array<i64: 64, 128>}, {pipeline_mode = #tpu.pipeline_mode<synchronous>, transform_indices = @transform_7, window_bounds = array<i64: 1, 128>}, {pipeline_mode = #tpu.pipeline_mode<synchronous>, transform_indices = @transform_8, window_bounds = array<i64: 64, 64>}, {pipeline_mode = #tpu.pipeline_mode<synchronous>, transform_indices = @transform_9, window_bounds = array<i64: 1, 64>}, {transform_indices = @transform_10, window_bounds = array<i64: 1, 8, 64>}]} {
    %c0 = arith.constant 0 : index
    %c0_0 = arith.constant 0 : index
    %c0_1 = arith.constant 0 : index
    %0 = vector.load %arg1[%c0, %c0_0, %c0_1] : memref<1x8x64xf32, #tpu.memory_space<vmem>>, vector<1x8x64xf32>
    %1 = vector.shape_cast %0 : vector<1x8x64xf32> to vector<8x64xf32>
    %c0_2 = arith.constant 0 : index
    %c0_3 = arith.constant 0 : index
    %2 = vector.load %arg3[%c0_2, %c0_3] : memref<1x64xf32, #tpu.memory_space<vmem>>, vector<1x64xf32>
    %c0_4 = arith.constant 0 : index
    %c0_5 = arith.constant 0 : index
    %3 = vector.load %arg4[%c0_4, %c0_5] : memref<1x64xf32, #tpu.memory_space<vmem>>, vector<1x64xf32>
    %cst = arith.constant dense<0.000000e+00> : vector<8xf32>
    %4 = vector.multi_reduction <add>, %1, %cst [1] : vector<8x64xf32> to vector<8xf32>
    %5 = vector.shape_cast %4 : vector<8xf32> to vector<8x1xf32>
    %cst_6 = arith.constant 6.400000e+01 : f32
    %6 = vector.broadcast %cst_6 : f32 to vector<8x1xf32>
    %7 = arith.divf %5, %6 : vector<8x1xf32>
    %8 = vector.broadcast %7 : vector<8x1xf32> to vector<8x64xf32>
    %9 = arith.subf %1, %8 : vector<8x64xf32>
    %10 = arith.mulf %9, %9 : vector<8x64xf32>
    %cst_7 = arith.constant dense<0.000000e+00> : vector<8xf32>
    %11 = vector.multi_reduction <add>, %10, %cst_7 [1] : vector<8x64xf32> to vector<8xf32>
    %12 = vector.shape_cast %11 : vector<8xf32> to vector<8x1xf32>
    %cst_8 = arith.constant 0.0158730168 : f32
    %13 = vector.broadcast %cst_8 : f32 to vector<8x1xf32>
    %14 = arith.mulf %12, %13 : vector<8x1xf32>
    %15 = math.sqrt %14 : vector<8x1xf32>
    %cst_9 = arith.constant 9.99999997E-7 : f32
    %16 = vector.broadcast %cst_9 : f32 to vector<8x1xf32>
    %17 = arith.addf %15, %16 : vector<8x1xf32>
    %18 = tpu.reciprocal %17 {approx = true} : vector<8x1xf32> -> vector<8x1xf32>
    %19 = vector.broadcast %2 : vector<1x64xf32> to vector<8x64xf32>
    %20 = arith.mulf %19, %9 : vector<8x64xf32>
    %21 = vector.broadcast %18 : vector<8x1xf32> to vector<8x64xf32>
    %22 = arith.mulf %20, %21 : vector<8x64xf32>
    %23 = vector.broadcast %3 : vector<1x64xf32> to vector<8x64xf32>
    %24 = arith.addf %22, %23 : vector<8x64xf32>
    %c0_10 = arith.constant 0 : index
    %c0_11 = arith.constant 0 : index
    %c0_12 = arith.constant 0 : index
    %25 = vector.load %arg2[%c0_10, %c0_11, %c0_12] : memref<1x8x8xf32, #tpu.memory_space<vmem>>, vector<1x8x8xf32>
    %26 = vector.shape_cast %25 : vector<1x8x8xf32> to vector<8x8xf32>
    %c0_13 = arith.constant 0 : index
    %c0_14 = arith.constant 0 : index
    %27 = vector.load %arg5[%c0_13, %c0_14] : memref<64x64xf32, #tpu.memory_space<vmem>>, vector<64x64xf32>
    %c0_15 = arith.constant 0 : index
    %c0_16 = arith.constant 0 : index
    %28 = vector.load %arg6[%c0_15, %c0_16] : memref<1x64xf32, #tpu.memory_space<vmem>>, vector<1x64xf32>
    %c0_17 = arith.constant 0 : index
    %c0_18 = arith.constant 0 : index
    %29 = vector.load %arg7[%c0_17, %c0_18] : memref<64x128xf32, #tpu.memory_space<vmem>>, vector<64x128xf32>
    %c0_19 = arith.constant 0 : index
    %c0_20 = arith.constant 0 : index
    %30 = vector.load %arg8[%c0_19, %c0_20] : memref<1x128xf32, #tpu.memory_space<vmem>>, vector<1x128xf32>
    %c0_21 = arith.constant 0 : index
    %c0_22 = arith.constant 0 : index
    %31 = vector.load %arg9[%c0_21, %c0_22] : memref<64x64xf32, #tpu.memory_space<vmem>>, vector<64x64xf32>
    %c0_23 = arith.constant 0 : index
    %c0_24 = arith.constant 0 : index
    %32 = vector.load %arg10[%c0_23, %c0_24] : memref<1x64xf32, #tpu.memory_space<vmem>>, vector<1x64xf32>
    %cst_25 = arith.constant dense<0.000000e+00> : vector<8x64xf32>
    %33 = tpu.matmul %24, %27, %cst_25 {dimension_numbers = #tpu.dot_dimension_numbers<[1], [0], [0], [1], [0, 0, 1, 1], [], []>} : vector<8x64xf32>, vector<64x64xf32>, vector<8x64xf32> -> vector<8x64xf32>
    %34 = vector.broadcast %28 : vector<1x64xf32> to vector<8x64xf32>
    %35 = arith.addf %33, %34 : vector<8x64xf32>
    %cst_26 = arith.constant dense<0.000000e+00> : vector<8x128xf32>
    %36 = tpu.matmul %24, %29, %cst_26 {dimension_numbers = #tpu.dot_dimension_numbers<[1], [0], [0], [1], [0, 0, 1, 1], [], []>} : vector<8x64xf32>, vector<64x128xf32>, vector<8x128xf32> -> vector<8x128xf32>
    %37 = vector.broadcast %30 : vector<1x128xf32> to vector<8x128xf32>
    %38 = arith.addf %36, %37 : vector<8x128xf32>
    %39 = vector.extract_strided_slice %38 {offsets = [0, 0], sizes = [8, 64], strides = [1, 1]} : vector<8x128xf32> to vector<8x64xf32>
    %40 = vector.extract_strided_slice %38 {offsets = [0, 64], sizes = [8, 64], strides = [1, 1]} : vector<8x128xf32> to vector<8x64xf32>
    %cst_27 = arith.constant 0.000000e+00 : f32
    %41 = vector.broadcast %cst_27 : f32 to vector<8x8xf32>
    %42 = arith.cmpf one, %26, %41 : vector<8x8xf32>
    %43 = vector.extract_strided_slice %35 {offsets = [0, 0], sizes = [8, 16], strides = [1, 1]} : vector<8x64xf32> to vector<8x16xf32>
    %44 = vector.extract_strided_slice %39 {offsets = [0, 0], sizes = [8, 16], strides = [1, 1]} : vector<8x64xf32> to vector<8x16xf32>
    %45 = vector.extract_strided_slice %40 {offsets = [0, 0], sizes = [8, 16], strides = [1, 1]} : vector<8x64xf32> to vector<8x16xf32>
    %46 = tpu.transpose %44, [1, 0] : vector<8x16xf32> -> vector<16x8xf32>
    %cst_28 = arith.constant dense<0.000000e+00> : vector<8x8xf32>
    %47 = tpu.matmul %43, %46, %cst_28 {dimension_numbers = #tpu.dot_dimension_numbers<[1], [0], [0], [1], [0, 0, 1, 1], [], []>} : vector<8x16xf32>, vector<16x8xf32>, vector<8x8xf32> -> vector<8x8xf32>
    %cst_29 = arith.constant -1.000000e+09 : f32
    %48 = vector.broadcast %cst_29 : f32 to vector<8x8xf32>
    %49 = arith.select %42, %47, %48 : vector<8x8xi1>, vector<8x8xf32>
    %cst_30 = arith.constant dense<0xFF800000> : vector<8xf32>
    %50 = vector.multi_reduction <maximumf>, %49, %cst_30 [1] : vector<8x8xf32> to vector<8xf32>
    %51 = vector.shape_cast %50 : vector<8xf32> to vector<8x1xf32>
    %52 = vector.broadcast %51 : vector<8x1xf32> to vector<8x8xf32>
    %53 = arith.subf %49, %52 : vector<8x8xf32>
    %54 = math.exp %53 : vector<8x8xf32>
    %cst_31 = arith.constant dense<0.000000e+00> : vector<8xf32>
    %55 = vector.multi_reduction <add>, %54, %cst_31 [1] : vector<8x8xf32> to vector<8xf32>
    %56 = vector.shape_cast %55 : vector<8xf32> to vector<8x1xf32>
    %57 = tpu.reciprocal %56 {approx = true} : vector<8x1xf32> -> vector<8x1xf32>
    %58 = vector.broadcast %57 : vector<8x1xf32> to vector<8x8xf32>
    %59 = arith.mulf %54, %58 : vector<8x8xf32>
    %cst_32 = arith.constant dense<0.000000e+00> : vector<8x16xf32>
    %60 = tpu.matmul %59, %45, %cst_32 {dimension_numbers = #tpu.dot_dimension_numbers<[1], [0], [0], [1], [0, 0, 1, 1], [], []>} : vector<8x8xf32>, vector<8x16xf32>, vector<8x16xf32> -> vector<8x16xf32>
    %61 = vector.extract_strided_slice %31 {offsets = [0, 0], sizes = [16, 64], strides = [1, 1]} : vector<64x64xf32> to vector<16x64xf32>
    %cst_33 = arith.constant dense<0.000000e+00> : vector<8x64xf32>
    %62 = tpu.matmul %60, %61, %cst_33 {dimension_numbers = #tpu.dot_dimension_numbers<[1], [0], [0], [1], [0, 0, 1, 1], [], []>} : vector<8x16xf32>, vector<16x64xf32>, vector<8x64xf32> -> vector<8x64xf32>
    %63 = vector.extract_strided_slice %35 {offsets = [0, 16], sizes = [8, 16], strides = [1, 1]} : vector<8x64xf32> to vector<8x16xf32>
    %64 = vector.extract_strided_slice %39 {offsets = [0, 16], sizes = [8, 16], strides = [1, 1]} : vector<8x64xf32> to vector<8x16xf32>
    %65 = vector.extract_strided_slice %40 {offsets = [0, 16], sizes = [8, 16], strides = [1, 1]} : vector<8x64xf32> to vector<8x16xf32>
    %66 = tpu.transpose %64, [1, 0] : vector<8x16xf32> -> vector<16x8xf32>
    %cst_34 = arith.constant dense<0.000000e+00> : vector<8x8xf32>
    %67 = tpu.matmul %63, %66, %cst_34 {dimension_numbers = #tpu.dot_dimension_numbers<[1], [0], [0], [1], [0, 0, 1, 1], [], []>} : vector<8x16xf32>, vector<16x8xf32>, vector<8x8xf32> -> vector<8x8xf32>
    %cst_35 = arith.constant -1.000000e+09 : f32
    %68 = vector.broadcast %cst_35 : f32 to vector<8x8xf32>
    %69 = arith.select %42, %67, %68 : vector<8x8xi1>, vector<8x8xf32>
    %cst_36 = arith.constant dense<0xFF800000> : vector<8xf32>
    %70 = vector.multi_reduction <maximumf>, %69, %cst_36 [1] : vector<8x8xf32> to vector<8xf32>
    %71 = vector.shape_cast %70 : vector<8xf32> to vector<8x1xf32>
    %72 = vector.broadcast %71 : vector<8x1xf32> to vector<8x8xf32>
    %73 = arith.subf %69, %72 : vector<8x8xf32>
    %74 = math.exp %73 : vector<8x8xf32>
    %cst_37 = arith.constant dense<0.000000e+00> : vector<8xf32>
    %75 = vector.multi_reduction <add>, %74, %cst_37 [1] : vector<8x8xf32> to vector<8xf32>
    %76 = vector.shape_cast %75 : vector<8xf32> to vector<8x1xf32>
    %77 = tpu.reciprocal %76 {approx = true} : vector<8x1xf32> -> vector<8x1xf32>
    %78 = vector.broadcast %77 : vector<8x1xf32> to vector<8x8xf32>
    %79 = arith.mulf %74, %78 : vector<8x8xf32>
    %cst_38 = arith.constant dense<0.000000e+00> : vector<8x16xf32>
    %80 = tpu.matmul %79, %65, %cst_38 {dimension_numbers = #tpu.dot_dimension_numbers<[1], [0], [0], [1], [0, 0, 1, 1], [], []>} : vector<8x8xf32>, vector<8x16xf32>, vector<8x16xf32> -> vector<8x16xf32>
    %81 = vector.extract_strided_slice %31 {offsets = [16, 0], sizes = [16, 64], strides = [1, 1]} : vector<64x64xf32> to vector<16x64xf32>
    %cst_39 = arith.constant dense<0.000000e+00> : vector<8x64xf32>
    %82 = tpu.matmul %80, %81, %cst_39 {dimension_numbers = #tpu.dot_dimension_numbers<[1], [0], [0], [1], [0, 0, 1, 1], [], []>} : vector<8x16xf32>, vector<16x64xf32>, vector<8x64xf32> -> vector<8x64xf32>
    %83 = arith.addf %62, %82 : vector<8x64xf32>
    %84 = vector.extract_strided_slice %35 {offsets = [0, 32], sizes = [8, 16], strides = [1, 1]} : vector<8x64xf32> to vector<8x16xf32>
    %85 = vector.extract_strided_slice %39 {offsets = [0, 32], sizes = [8, 16], strides = [1, 1]} : vector<8x64xf32> to vector<8x16xf32>
    %86 = vector.extract_strided_slice %40 {offsets = [0, 32], sizes = [8, 16], strides = [1, 1]} : vector<8x64xf32> to vector<8x16xf32>
    %87 = tpu.transpose %85, [1, 0] : vector<8x16xf32> -> vector<16x8xf32>
    %cst_40 = arith.constant dense<0.000000e+00> : vector<8x8xf32>
    %88 = tpu.matmul %84, %87, %cst_40 {dimension_numbers = #tpu.dot_dimension_numbers<[1], [0], [0], [1], [0, 0, 1, 1], [], []>} : vector<8x16xf32>, vector<16x8xf32>, vector<8x8xf32> -> vector<8x8xf32>
    %cst_41 = arith.constant -1.000000e+09 : f32
    %89 = vector.broadcast %cst_41 : f32 to vector<8x8xf32>
    %90 = arith.select %42, %88, %89 : vector<8x8xi1>, vector<8x8xf32>
    %cst_42 = arith.constant dense<0xFF800000> : vector<8xf32>
    %91 = vector.multi_reduction <maximumf>, %90, %cst_42 [1] : vector<8x8xf32> to vector<8xf32>
    %92 = vector.shape_cast %91 : vector<8xf32> to vector<8x1xf32>
    %93 = vector.broadcast %92 : vector<8x1xf32> to vector<8x8xf32>
    %94 = arith.subf %90, %93 : vector<8x8xf32>
    %95 = math.exp %94 : vector<8x8xf32>
    %cst_43 = arith.constant dense<0.000000e+00> : vector<8xf32>
    %96 = vector.multi_reduction <add>, %95, %cst_43 [1] : vector<8x8xf32> to vector<8xf32>
    %97 = vector.shape_cast %96 : vector<8xf32> to vector<8x1xf32>
    %98 = tpu.reciprocal %97 {approx = true} : vector<8x1xf32> -> vector<8x1xf32>
    %99 = vector.broadcast %98 : vector<8x1xf32> to vector<8x8xf32>
    %100 = arith.mulf %95, %99 : vector<8x8xf32>
    %cst_44 = arith.constant dense<0.000000e+00> : vector<8x16xf32>
    %101 = tpu.matmul %100, %86, %cst_44 {dimension_numbers = #tpu.dot_dimension_numbers<[1], [0], [0], [1], [0, 0, 1, 1], [], []>} : vector<8x8xf32>, vector<8x16xf32>, vector<8x16xf32> -> vector<8x16xf32>
    %102 = vector.extract_strided_slice %31 {offsets = [32, 0], sizes = [16, 64], strides = [1, 1]} : vector<64x64xf32> to vector<16x64xf32>
    %cst_45 = arith.constant dense<0.000000e+00> : vector<8x64xf32>
    %103 = tpu.matmul %101, %102, %cst_45 {dimension_numbers = #tpu.dot_dimension_numbers<[1], [0], [0], [1], [0, 0, 1, 1], [], []>} : vector<8x16xf32>, vector<16x64xf32>, vector<8x64xf32> -> vector<8x64xf32>
    %104 = arith.addf %83, %103 : vector<8x64xf32>
    %105 = vector.extract_strided_slice %35 {offsets = [0, 48], sizes = [8, 16], strides = [1, 1]} : vector<8x64xf32> to vector<8x16xf32>
    %106 = vector.extract_strided_slice %39 {offsets = [0, 48], sizes = [8, 16], strides = [1, 1]} : vector<8x64xf32> to vector<8x16xf32>
    %107 = vector.extract_strided_slice %40 {offsets = [0, 48], sizes = [8, 16], strides = [1, 1]} : vector<8x64xf32> to vector<8x16xf32>
    %108 = tpu.transpose %106, [1, 0] : vector<8x16xf32> -> vector<16x8xf32>
    %cst_46 = arith.constant dense<0.000000e+00> : vector<8x8xf32>
    %109 = tpu.matmul %105, %108, %cst_46 {dimension_numbers = #tpu.dot_dimension_numbers<[1], [0], [0], [1], [0, 0, 1, 1], [], []>} : vector<8x16xf32>, vector<16x8xf32>, vector<8x8xf32> -> vector<8x8xf32>
    %cst_47 = arith.constant -1.000000e+09 : f32
    %110 = vector.broadcast %cst_47 : f32 to vector<8x8xf32>
    %111 = arith.select %42, %109, %110 : vector<8x8xi1>, vector<8x8xf32>
    %cst_48 = arith.constant dense<0xFF800000> : vector<8xf32>
    %112 = vector.multi_reduction <maximumf>, %111, %cst_48 [1] : vector<8x8xf32> to vector<8xf32>
    %113 = vector.shape_cast %112 : vector<8xf32> to vector<8x1xf32>
    %114 = vector.broadcast %113 : vector<8x1xf32> to vector<8x8xf32>
    %115 = arith.subf %111, %114 : vector<8x8xf32>
    %116 = math.exp %115 : vector<8x8xf32>
    %cst_49 = arith.constant dense<0.000000e+00> : vector<8xf32>
    %117 = vector.multi_reduction <add>, %116, %cst_49 [1] : vector<8x8xf32> to vector<8xf32>
    %118 = vector.shape_cast %117 : vector<8xf32> to vector<8x1xf32>
    %119 = tpu.reciprocal %118 {approx = true} : vector<8x1xf32> -> vector<8x1xf32>
    %120 = vector.broadcast %119 : vector<8x1xf32> to vector<8x8xf32>
    %121 = arith.mulf %116, %120 : vector<8x8xf32>
    %cst_50 = arith.constant dense<0.000000e+00> : vector<8x16xf32>
    %122 = tpu.matmul %121, %107, %cst_50 {dimension_numbers = #tpu.dot_dimension_numbers<[1], [0], [0], [1], [0, 0, 1, 1], [], []>} : vector<8x8xf32>, vector<8x16xf32>, vector<8x16xf32> -> vector<8x16xf32>
    %123 = vector.extract_strided_slice %31 {offsets = [48, 0], sizes = [16, 64], strides = [1, 1]} : vector<64x64xf32> to vector<16x64xf32>
    %cst_51 = arith.constant dense<0.000000e+00> : vector<8x64xf32>
    %124 = tpu.matmul %122, %123, %cst_51 {dimension_numbers = #tpu.dot_dimension_numbers<[1], [0], [0], [1], [0, 0, 1, 1], [], []>} : vector<8x16xf32>, vector<16x64xf32>, vector<8x64xf32> -> vector<8x64xf32>
    %125 = arith.addf %104, %124 : vector<8x64xf32>
    %126 = arith.addf %1, %125 : vector<8x64xf32>
    %127 = vector.broadcast %32 : vector<1x64xf32> to vector<8x64xf32>
    %128 = arith.addf %126, %127 : vector<8x64xf32>
    %c0_52 = arith.constant 0 : index
    %c0_53 = arith.constant 0 : index
    %c0_54 = arith.constant 0 : index
    %129 = vector.load %arg11[%c0_52, %c0_53, %c0_54] : memref<1x8x64xf32, #tpu.memory_space<vmem>>, vector<1x8x64xf32>
    %130 = vector.shape_cast %129 : vector<1x8x64xf32> to vector<8x64xf32>
    %131 = vector.shape_cast %128 : vector<8x64xf32> to vector<1x8x64xf32>
    tpu.vector_store %arg11[%c0_52, %c0_53, %c0_54], %131 {strides = array<i32>} : memref<1x8x64xf32, #tpu.memory_space<vmem>>, vector<1x8x64xf32>,
    return
  }
  func.func @transform_0(%arg0: i32) -> (i32, i32, i32) {
    %c0_i32 = arith.constant 0 : i32
    %c0_i32_0 = arith.constant 0 : i32
    %c0_i32_1 = arith.constant 0 : i32
    return %arg0, %c0_i32, %c0_i32_0 : i32, i32, i32
  }
  func.func @transform_1(%arg0: i32) -> (i32, i32, i32) {
    %c0_i32 = arith.constant 0 : i32
    %c0_i32_0 = arith.constant 0 : i32
    %c0_i32_1 = arith.constant 0 : i32
    return %arg0, %c0_i32, %c0_i32_0 : i32, i32, i32
  }
  func.func @transform_2(%arg0: i32) -> (i32, i32) {
    %c0_i32 = arith.constant 0 : i32
    %c0_i32_0 = arith.constant 0 : i32
    %c0_i32_1 = arith.constant 0 : i32
    return %c0_i32, %c0_i32_0 : i32, i32
  }
  func.func @transform_3(%arg0: i32) -> (i32, i32) {
    %c0_i32 = arith.constant 0 : i32
    %c0_i32_0 = arith.constant 0 : i32
    %c0_i32_1 = arith.constant 0 : i32
    return %c0_i32, %c0_i32_0 : i32, i32
  }
  func.func @transform_4(%arg0: i32) -> (i32, i32) {
    %c0_i32 = arith.constant 0 : i32
    %c0_i32_0 = arith.constant 0 : i32
    %c0_i32_1 = arith.constant 0 : i32
    return %c0_i32, %c0_i32_0 : i32, i32
  }
  func.func @transform_5(%arg0: i32) -> (i32, i32) {
    %c0_i32 = arith.constant 0 : i32
    %c0_i32_0 = arith.constant 0 : i32
    %c0_i32_1 = arith.constant 0 : i32
    return %c0_i32, %c0_i32_0 : i32, i32
  }
  func.func @transform_6(%arg0: i32) -> (i32, i32) {
    %c0_i32 = arith.constant 0 : i32
    %c0_i32_0 = arith.constant 0 : i32
    %c0_i32_1 = arith.constant 0 : i32
    return %c0_i32, %c0_i32_0 : i32, i32
  }
  func.func @transform_7(%arg0: i32) -> (i32, i32) {
    %c0_i32 = arith.constant 0 : i32
    %c0_i32_0 = arith.constant 0 : i32
    %c0_i32_1 = arith.constant 0 : i32
    return %c0_i32, %c0_i32_0 : i32, i32
  }
  func.func @transform_8(%arg0: i32) -> (i32, i32) {
    %c0_i32 = arith.constant 0 : i32
    %c0_i32_0 = arith.constant 0 : i32
    %c0_i32_1 = arith.constant 0 : i32
    return %c0_i32, %c0_i32_0 : i32, i32
  }
  func.func @transform_9(%arg0: i32) -> (i32, i32) {
    %c0_i32 = arith.constant 0 : i32
    %c0_i32_0 = arith.constant 0 : i32
    %c0_i32_1 = arith.constant 0 : i32
    return %c0_i32, %c0_i32_0 : i32, i32
  }
  func.func @transform_10(%arg0: i32) -> (i32, i32, i32) {
    %c0_i32 = arith.constant 0 : i32
    %c0_i32_0 = arith.constant 0 : i32
    %c0_i32_1 = arith.constant 0 : i32
    return %arg0, %c0_i32, %c0_i32_0 : i32, i32, i32
  }
}

module attributes {stable_mosaic.version = 11 : i64} {
  func.func @_ln_linear_kernel(%arg0: memref<16x64xf32, #tpu.memory_space<vmem>>, %arg1: memref<1x64xf32, #tpu.memory_space<vmem>>, %arg2: memref<1x64xf32, #tpu.memory_space<vmem>>, %arg3: memref<64x3xf32, #tpu.memory_space<vmem>>, %arg4: memref<1x3xf32, #tpu.memory_space<vmem>>, %arg5: memref<16x3xf32, #tpu.memory_space<vmem>>) attributes {dimension_semantics = [], scalar_prefetch = 0 : i64, scratch_operands = 0 : i64, tpu.core_type = #tpu.core_type<tc>} {
    %c0 = arith.constant 0 : index
    %c0_0 = arith.constant 0 : index
    %0 = vector.load %arg0[%c0, %c0_0] : memref<16x64xf32, #tpu.memory_space<vmem>>, vector<16x64xf32>
    %c0_1 = arith.constant 0 : index
    %c0_2 = arith.constant 0 : index
    %1 = vector.load %arg1[%c0_1, %c0_2] : memref<1x64xf32, #tpu.memory_space<vmem>>, vector<1x64xf32>
    %c0_3 = arith.constant 0 : index
    %c0_4 = arith.constant 0 : index
    %2 = vector.load %arg2[%c0_3, %c0_4] : memref<1x64xf32, #tpu.memory_space<vmem>>, vector<1x64xf32>
    %cst = arith.constant dense<0.000000e+00> : vector<16xf32>
    %3 = vector.multi_reduction <add>, %0, %cst [1] : vector<16x64xf32> to vector<16xf32>
    %4 = vector.shape_cast %3 : vector<16xf32> to vector<16x1xf32>
    %cst_5 = arith.constant 6.400000e+01 : f32
    %5 = vector.broadcast %cst_5 : f32 to vector<16x1xf32>
    %6 = arith.divf %4, %5 : vector<16x1xf32>
    %7 = vector.broadcast %6 : vector<16x1xf32> to vector<16x64xf32>
    %8 = arith.subf %0, %7 : vector<16x64xf32>
    %9 = arith.mulf %8, %8 : vector<16x64xf32>
    %cst_6 = arith.constant dense<0.000000e+00> : vector<16xf32>
    %10 = vector.multi_reduction <add>, %9, %cst_6 [1] : vector<16x64xf32> to vector<16xf32>
    %11 = vector.shape_cast %10 : vector<16xf32> to vector<16x1xf32>
    %cst_7 = arith.constant 0.0158730168 : f32
    %12 = vector.broadcast %cst_7 : f32 to vector<16x1xf32>
    %13 = arith.mulf %11, %12 : vector<16x1xf32>
    %14 = math.sqrt %13 : vector<16x1xf32>
    %cst_8 = arith.constant 9.99999997E-7 : f32
    %15 = vector.broadcast %cst_8 : f32 to vector<16x1xf32>
    %16 = arith.addf %14, %15 : vector<16x1xf32>
    %17 = tpu.reciprocal %16 {approx = true} : vector<16x1xf32> -> vector<16x1xf32>
    %18 = vector.broadcast %1 : vector<1x64xf32> to vector<16x64xf32>
    %19 = arith.mulf %18, %8 : vector<16x64xf32>
    %20 = vector.broadcast %17 : vector<16x1xf32> to vector<16x64xf32>
    %21 = arith.mulf %19, %20 : vector<16x64xf32>
    %22 = vector.broadcast %2 : vector<1x64xf32> to vector<16x64xf32>
    %23 = arith.addf %21, %22 : vector<16x64xf32>
    %c0_9 = arith.constant 0 : index
    %c0_10 = arith.constant 0 : index
    %24 = vector.load %arg3[%c0_9, %c0_10] : memref<64x3xf32, #tpu.memory_space<vmem>>, vector<64x3xf32>
    %cst_11 = arith.constant dense<0.000000e+00> : vector<16x3xf32>
    %25 = tpu.matmul %23, %24, %cst_11 {dimension_numbers = #tpu.dot_dimension_numbers<[1], [0], [0], [1], [0, 0, 1, 1], [], []>} : vector<16x64xf32>, vector<64x3xf32>, vector<16x3xf32> -> vector<16x3xf32>
    %c0_12 = arith.constant 0 : index
    %c0_13 = arith.constant 0 : index
    %26 = vector.load %arg4[%c0_12, %c0_13] : memref<1x3xf32, #tpu.memory_space<vmem>>, vector<1x3xf32>
    %27 = vector.broadcast %26 : vector<1x3xf32> to vector<16x3xf32>
    %28 = arith.addf %25, %27 : vector<16x3xf32>
    %c0_14 = arith.constant 0 : index
    %c0_15 = arith.constant 0 : index
    %29 = vector.load %arg5[%c0_14, %c0_15] : memref<16x3xf32, #tpu.memory_space<vmem>>, vector<16x3xf32>
    tpu.vector_store %arg5[%c0_14, %c0_15], %28 {strides = array<i32>} : memref<16x3xf32, #tpu.memory_space<vmem>>, vector<16x3xf32>,
    return
  }
}

</mosaic_0001>

<bundles_post_ra>
// kernel: individual_tf_forward.14
= control target key start
LH: loop header
LB: loop body
LE: loop exit
PB: predicated region body
PF: predicated region fallthrough
CT: control target
= control target key end

     0   :  { %s337_s15 = smov 0   ;;  %s357_s0 = inlined_call_operand.vmem [shape: f32[2,8,2], index: 0, kind: input, shape index: {}]   ;;  %s358_s1 = inlined_call_operand.vmem [shape: f32[8,64], index: 1, kind: input, shape index: {}]   ;;  %s359_s2 = inlined_call_operand.vmem [shape: f32[2,64], index: 2, kind: input, shape index: {}]   ;;  %s360_s3 = inlined_call_operand.vmem [shape: f32[1,64], index: 3, kind: input, shape index: {}]   ;;  %s361_s4 = inlined_call_operand.vmem [shape: f32[2,8,64], index: 4, kind: output, shape index: {}]  }
   0x1 LB: > { %s284_s16 = sadd.s32 4294967295, %s310_s15   ;;  %p288_p0 = scmp.ge.s32.totalorder %s310_s15, 1  ;;  %s310_s15 = sphi %s337_s15, %s14_s15  }
   0x2   : > { %p161_p1 = scmp.lt.s32.totalorder %s310_s15, 3 }
   0x4   : > { %p162_p2 = pnand %p288_p0, %p161_p1 }
   0x5   : > { %p185_p3 = scmp.lt.s32.totalorder (!%p162_p2), %s284_s16, 1 }
   0x6   : > { %165 = sbr.rel (%p162_p2) target bundleno = 146 (0x92), region = 36 }
   0xb   : > { %v194_v0 = vld [vmem:[%s359_s2] sm:$0x3]  ;;  %vm203_vm0 = vcmask 1041408   ;;  %s363_s16 = smov (!%p185_p3, %s284_s16), 1  ;;  %vm199_vm1 = vcmask 15360   ;;  %vm229_vm2 = vcmask 523264  }
   0xc   : > { %291 = vmatpush.msk.msra.mxu0 %vm203_vm0, %v194_v0  ;;  %s289_s19 = sshll.u32 %s363_s16, 3  ;;  %v303_v2 = vld [vmem:[%s360_s3] ss:$0 sm:$0xff] }
   0xd   : > { %s188_s22 = scalar_lea.vmem %s357_s0, %s289_s19  ;;  %v227_v4 = vld [vmem:[%s358_s1] sm:$0xff]  ;;  %s192_s29 = scalar_lea.vmem %s361_s4, %s289_s19 }
   0xe   : > { %v193_v1 = vld [vmem:[%s188_s22] sm:$0xff] }
   0xf   : > { %292 = vmatmul.msk.f32.vlgmr.msra.gmra.mxu0 %vm199_vm1, %v193_v1 }
  0x8c   : > { %v224_v3 = vpop.f32.mrf.mxu0 }
  0x8d   : > { %v225_v5 = vadd.f32 %v303_v2, %v224_v3 }
  0x8f   : > { %v228_v6 = vadd.f32 %v227_v4, %v225_v5 }
  0x91   : > { %230 = vst.msk [vmem:[%s192_s29] sm:$0xff] %vm229_vm2, %v228_v6 }
  0x92 PF: > { %s14_s15 = sadd.s32 1, %s310_s15  }
  0x93   : > { %p11_p4 = scmp.ge.s32.totalorder %s14_s15, 4  }
  0x95   :  { %13 = sbr.rel (!%p11_p4) target bundleno = 1 (0x1), region = 66 }

// kernel: individual_tf_forward.15
= control target key start
LH: loop header
LB: loop body
LE: loop exit
PB: predicated region body
PF: predicated region fallthrough
CT: control target
= control target key end

     0   :  { %s1065_s13 = smov 0   ;;  %s1234_s0 = inlined_call_operand.vmem [shape: f32[2,8,64], index: 0, kind: input, shape index: {}]   ;;  %s1235_s1 = inlined_call_operand.vmem [shape: f32[2,8,8], index: 1, kind: input, shape index: {}]   ;;  %s1236_s2 = inlined_call_operand.vmem [shape: f32[1,64], index: 2, kind: input, shape index: {}]   ;;  %s1237_s3 = inlined_call_operand.vmem [shape: f32[1,64], index: 3, kind: input, shape index: {}]   ;;  %s1238_s4 = inlined_call_operand.vmem [shape: f32[64,64], index: 4, kind: input, shape index: {}]   ;;  %s1239_s5 = inlined_call_operand.vmem [shape: f32[1,64], index: 5, kind: input, shape index: {}]   ;;  %s1240_s6 = inlined_call_operand.vmem [shape: f32[64,128], index: 6, kind: input, shape index: {}]   ;;  %s1241_s7 = inlined_call_operand.vmem [shape: f32[1,128], index: 7, kind: input, shape index: {}]   ;;  %s1242_s8 = inlined_call_operand.vmem [shape: f32[64,64], index: 8, kind: input, shape index: {}]   ;;  %s1243_s9 = inlined_call_operand.vmem [shape: f32[1,64], index: 9, kind: input, shape index: {}]   ;;  %s1244_s10 = inlined_call_operand.vmem [shape: f32[2,8,64], index: 10, kind: output, shape index: {}]  }
   0x1 LB: > { %s923_s14 = sadd.s32 4294967295, %s1000_s13   ;;  %p927_p0 = scmp.ge.s32.totalorder %s1000_s13, 1  ;;  %s1000_s13 = sphi %s1065_s13, %s20_s13  }
   0x2   : > { %p320_p1 = scmp.lt.s32.totalorder %s1000_s13, 3 }
   0x4   : > { %p321_p2 = pnand %p927_p0, %p320_p1 }
   0x5   : > { %p360_p3 = scmp.lt.s32.totalorder (!%p321_p2), %s923_s14, 1  ;;  %s1003_s23 = smov (!%p321_p2), 64  }
   0x6   : > { %324 = sbr.rel (%p321_p2) target bundleno = 1866 (0x74a), region = 60  ;;  %s1004_s24 = smov (!%p321_p2), 112  }
   0x7   : > { %s1005_s25 = smov (!%p321_p2), 96   ;;  %s1006_s26 = smov (!%p321_p2), 80  }
   0x8   : > { %s1007_s30 = smov (!%p321_p2), 48   ;;  %s1008_s21 = smov (!%p321_p2), 32  }
   0x9   : > { %s1009_s22 = smov (!%p321_p2), 16  }
   0xb   : > { %s1246_s14 = smov (!%p360_p3, %s923_s14), 1  ;;  %vm375_vm0 = vcmask 523264   ;;  %v1002_v2 = vmov 64.0   ;;  %v424_v14 = vld [vmem:[%s1238_s4 + $0x38] sm:$0xff]  ;;  %v423_v16 = vld [vmem:[%s1238_s4 + $0x30] sm:$0xff]  ;;  %v422_v18 = vld [vmem:[%s1238_s4 + $0x28] sm:$0xff] }
   0xc   : > { %s1073_s15 = sshll.u32 %s1246_s14, 3  ;;  %972 = vrcp.f32 %v1002_v2  ;;  %v433_v15 = vld [vmem:[%s1240_s6 + $0x38] sm:$0xff]  ;;  %458 = vmatpush.msra.mxu0 %v424_v14  ;;  %v432_v17 = vld [vmem:[%s1240_s6 + $0x30] sm:$0xff]  ;;  %v431_v19 = vld [vmem:[%s1240_s6 + $0x28] sm:$0xff]  ;;  %vm494_vm4 = vcmask 130048   ;;  %vm522_vm6 = vcmask 64512  }
   0xd   : > { %s363_s18 = scalar_lea.vmem %s1234_s0, %s1073_s15  ;;  %481 = vmatpush.msra.mxu1 %v433_v15  ;;  %v421_v20 = vld [vmem:[%s1238_s4 + $0x20] sm:$0xff]  ;;  %v420_v22 = vld [vmem:[%s1238_s4 + $0x18] sm:$0xff]  ;;  %v419_v24 = vld [vmem:[%s1238_s4 + $0x10] sm:$0xff]  ;;  %s367_s29 = scalar_lea.vmem %s1235_s1, %s1073_s15 }
   0xe   : > { %v1079_v0 = vld [vmem:[%s363_s18] sm:$0xff]  ;;  %459 = vmatpush.msra.mxu0 %v423_v16  ;;  %v429_v23 = vld [vmem:[%s1240_s6 + $0x18] sm:$0xff]  ;;  %v428_v25 = vld [vmem:[%s1240_s6 + $0x10] sm:$0xff]  ;;  %s371_s17 = scalar_lea.vmem %s1244_s10, %s1073_s15 }
   0xf   : > { %v376_v1 = vsel %vm375_vm0, %v1079_v0, 0.0  ;;  %482 = vmatpush.msra.mxu1 %v432_v17  ;;  %v430_v21 = vld [vmem:[%s1240_s6 + $0x20] sm:$0xff]  ;;  %v418_v26 = vld [vmem:[%s1238_s4 + $0x8] sm:$0xff] }
  0x10   : > { %377 = vadd.xlane.f32.xlu0 %v376_v1  ;;  %460 = vmatpush.msra.mxu0 %v422_v18  ;;  %v427_v27 = vld [vmem:[%s1240_s6 + $0x8] sm:$0xff]  ;;  %v417_v28 = vld [vmem:[%s1238_s4] sm:$0xff] }
  0x11   : > { %483 = vmatpush.msra.mxu1 %v431_v19  ;;  %v426_v29 = vld [vmem:[%s1240_s6] sm:$0xff]  ;;  %v436_v19 = vld [vmem:[%s1242_s8 + $0x8] sm:$0xff] }
  0x12   : > { %v973_v3 = vpop.eup %972  ;;  %461 = vmatpush.msra.mxu0 %v421_v20  ;;  %v967_v43 = vld [vmem:[%s1236_s2] ss:$0 sm:$0xff] }
  0x13   : > { %v380_v4 = vmul.f32 64.0, %v973_v3  ;;  %vm384_vm1 = vweird.f32 %v973_v3  ;;  %484 = vmatpush.msra.mxu1 %v430_v21  ;;  %v968_v45 = vld [vmem:[%s1237_s3] ss:$0 sm:$0xff] }
  0x14   : > { %462 = vmatpush.msra.mxu0 %v420_v22  ;;  %v969_v49 = vld [vmem:[%s1239_s5] ss:$0 sm:$0xff]  ;;  %v438_v22 = vld [vmem:[%s1242_s8 + $0x18] sm:$0xff] }
  0x15   : > { %v381_v5 = vsub.f32 1.0, %v380_v4  ;;  %485 = vmatpush.msra.mxu1 %v429_v23  ;;  %v970_v50 = vld [vmem:[%s1241_s7] ss:$0 sm:$0xff] }
  0x16   : > { %463 = vmatpush.msra.mxu0 %v419_v24  ;;  %v1163_v59 = vld [vmem:[%s367_s29] sm:$0xff] }
  0x17   : > { %v382_v6 = vmul.f32 %v973_v3, %v381_v5  ;;  %486 = vmatpush.msra.mxu1 %v428_v25  ;;  %vm493_vm5 = vcmp.ne.f32.partialorder %v1163_v59, 0.0  ;;  %v435_v20 = vld [vmem:[%s1242_s8] sm:$0xff] }
  0x18   : > { %464 = vmatpush.msra.mxu0 %v418_v26 }
  0x19   : > { %v383_v7 = vadd.f32 %v973_v3, %v382_v6  ;;  %487 = vmatpush.msra.mxu1 %v427_v27 }
  0x1a   : > { %465 = vmatpush.msra.mxu0 %v417_v28 }
  0x1b   : > { %v385_v8 = vsel %vm384_vm1, %v973_v3, %v383_v7  ;;  %488 = vmatpush.msra.mxu1 %v426_v29 }
  0x83   : > { %v378_v9 = vpop.xlane.xlu0 %377 }
  0x84   : > { %v386_v10 = vmul.f32 %v385_v8, %v378_v9 }
  0x86   : > { %v387_v11 = vsub.f32 %v1079_v0, %v386_v10 }
  0x88   : > { %v388_v12 = vmul.f32 %v387_v11, %v387_v11  ;;  %v410_v44 = vmul.f32 %v967_v43, %v387_v11 }
  0x8a   : > { %v389_v13 = vsel %vm375_vm0, %v388_v12, 0.0 }
  0x8b   : > { %390 = vadd.xlane.f32.xlu0 %v389_v13 }
  0xfe   : > { %v391_v30 = vpop.xlane.xlu0 %390 }
  0xff   : > { %v392_v31 = vmul.f32 0.015873017, %v391_v30  ;;  %v437_v30 = vld [vmem:[%s1242_s8 + $0x10] sm:$0xff] }
 0x101   : > { %974 = vrsqrt.f32 %v392_v31  ;;  %vm400_vm2 = vcmp.eq.f32.partialorder %v392_v31, inf  ;;  %v403_v39 = vand.u32 2147483648, %v392_v31  ;;  %vm402_vm3 = vcmp.eq.f32.partialorder %v392_v31, 0.0 }
 0x107   : > { %v975_v32 = vpop.eup %974 }
 0x108   : > { %v394_v33 = vmul.f32 %v975_v32, %v392_v31 }
 0x10a   : > { %v395_v34 = vmul.f32 %v975_v32, %v394_v33 }
 0x10c   : > { %v396_v35 = vmul.f32 0.5, %v395_v34 }
 0x10e   : > { %v397_v36 = vsub.f32 1.5, %v396_v35 }
 0x110   : > { %v398_v37 = vmul.f32 %v975_v32, %v397_v36 }
 0x112   : > { %v399_v38 = vmul.f32 %v398_v37, %v392_v31 }
 0x114   : > { %v401_v40 = vsel %vm400_vm2, %v392_v31, %v399_v38 }
 0x115   : > { %v404_v41 = vsel %vm402_vm3, %v403_v39, %v401_v40 }
 0x116   : > { %v405_v42 = vadd.f32 1e-06, %v404_v41 }
 0x118   : > { %976 = vrcp.f32 %v405_v42 }
 0x11e   : > { %v977_v46 = vpop.eup %976 }
 0x11f   : > { %v411_v47 = vmul.f32 %v977_v46, %v410_v44 }
 0x121   : > { %v415_v48 = vadd.f32 %v968_v45, %v411_v47 }
 0x123   : > { %931 = vmatmul.msk.f32.vlgmr.msra.gmra.mxu0 %vm375_vm0, %v415_v48  ;;  %932 = vmatmul.msk.f32.vlgmr.msra.gmra.mxu1 %vm375_vm0, %v415_v48 }
 0x1a0   : > { %v467_v51 = vpop.f32.mrf.mxu0  ;;  %v490_v52 = vpop.f32.mrf.mxu1 }
 0x1a1   : > { %v468_v53 = vadd.f32 %v969_v49, %v467_v51  ;;  %v1147_v54 = vadd.f32 %v970_v50, %v490_v52  ;;  %v440_v50 = vld [vmem:[%s1242_s8 + $0x28] sm:$0xff]  ;;  %v439_v51 = vld [vmem:[%s1242_s8 + $0x20] sm:$0xff]  ;;  %v442_v52 = vld [vmem:[%s1242_s8 + $0x38] sm:$0xff] }
 0x1a3   : > { %534 = vrot.lane.b32.xlu2 %v1147_v54, %s1003_s23  ;;  %933 = vmatpush.xpose.msk.msra.mxu2 %vm494_vm4, %v1147_v54 }
 0x1a4   : > { %560 = vrot.lane.b32.xlu0 %v468_v53, %s1004_s24 }
 0x1a6   : > { %934 = vmatmul.msk.f32.vlgmr.msra.gmra.mxu2 %vm494_vm4, %v468_v53 }
 0x1ab   : > { %562 = vrot.lane.b32.xlu2 %v1147_v54, %s1004_s24 }
 0x1ac   : > { %674 = vrot.lane.b32.xlu0 %v1147_v54, %s1005_s25 }
 0x1b4   : > { %764 = vrot.lane.b32.xlu0 %v1147_v54, %s1006_s26 }
 0x1bc   : > { %762 = vrot.lane.b32.xlu0 %v468_v53, %s1006_s26 }
 0x1fd   : > { %v535_v55 = vpop.permute.xlu2 %534 }
 0x1fe   : > { %555 = vmatpush.msra.mxu3 %v535_v55 }
 0x205   : > { %v563_v56 = vpop.permute.xlu2 %562 }
 0x206   : > { %936 = vmatpush.xpose.msk.msrb.mxu3 %vm494_vm4, %v563_v56 }
 0x216   : > { %v561_v57 = vpop.permute.xlu0 %560 }
 0x21e   : > { %v675_v58 = vpop.permute.xlu0 %674 }
 0x21f   : > { %941 = vmatpush.xpose.msk.msrb.mxu0 %vm494_vm4, %v675_v58  ;;  %v441_v58 = vld [vmem:[%s1242_s8 + $0x30] sm:$0xff] }
 0x226   : > { %v765_v25 = vpop.permute.xlu0 %764 }
 0x229   : > { %v518_v60 = vpop.f32.mrf.mxu2 }
 0x22a   : > { %v521_v61 = vsel %vm493_vm5, %v518_v60, -1e+09 }
 0x22b   : > { %v523_v62 = vsel %vm522_vm6, %v521_v61, -inf }
 0x22c   : > { %524 = vmax.xlane.f32.xlu1 %v523_v62 }
 0x22e   : > { %v763_v26 = vpop.permute.xlu0 %762 }
 0x29f   : > { %v525_v63 = vpop.xlane.xlu1 %524 }
 0x2a0   : > { %v526_v1 = vsub.f32 %v521_v61, %v525_v63 }
 0x2a2   : > { %v527_v2 = vmul.f32 1.442695, %v526_v1 }
 0x2a4   : > { %978 = vpow2.f32 %v527_v2 }
 0x2aa   : > { %v979_v3 = vpop.eup %978 }
 0x2ab   : > { %v529_v4 = vsel %vm522_vm6, %v979_v3, 0.0 }
 0x2ac   : > { %530 = vadd.xlane.f32.xlu1 %v529_v4 }
 0x31f   : > { %v531_v5 = vpop.xlane.xlu1 %530 }
 0x320   : > { %980 = vrcp.f32 %v531_v5 }
 0x326   : > { %v981_v6 = vpop.eup %980 }
 0x327   : > { %v533_v7 = vmul.f32 %v981_v6, %v979_v3  ;;  %v971_v3 = vld [vmem:[%s1243_s9] ss:$0 sm:$0xff] }
 0x329   : > { %935 = vmatmul.msk.f32.vlgmr.msra.gmra.mxu3 %vm522_vm6, %v533_v7 }
 0x32a   : > { %643 = vmatpush.msra.mxu3 %v438_v22 }
 0x32c   : > { %644 = vmatpush.msra.mxu3 %v437_v30 }
 0x331   : > { %937 = vmatmul.msk.f32.vlgmr.msrb.gmra.mxu3 %vm494_vm4, %v561_v57 }
 0x332   : > { %755 = vmatpush.msrb.mxu3 %v440_v50 }
 0x334   : > { %756 = vmatpush.msrb.mxu3 %v439_v51 }
 0x3ac   : > { %v557_v8 = vpop.f32.mrf.mxu3 }
 0x3b4   : > { %v585_v9 = vpop.f32.mrf.mxu3 }
 0x3b5   : > { %v588_v10 = vsel %vm493_vm5, %v585_v9, -1e+09 }
 0x3b6   : > { %v589_v11 = vsel %vm522_vm6, %v588_v10, -inf }
 0x3b7   : > { %590 = vmax.xlane.f32.xlu1 %v589_v11 }
 0x3d0   : > { %600 = vrot.lane.b32.xlu1 %v1147_v54, %s1007_s30 }
 0x3d8   : > { %672 = vrot.lane.b32.xlu1 %v468_v53, %s1005_s25 }
 0x42a   : > { %v591_v12 = vpop.xlane.xlu1 %590 }
 0x42b   : > { %v592_v13 = vsub.f32 %v588_v10, %v591_v12 }
 0x42d   : > { %v593_v14 = vmul.f32 1.442695, %v592_v13 }
 0x42f   : > { %982 = vpow2.f32 %v593_v14 }
 0x435   : > { %v983_v15 = vpop.eup %982 }
 0x436   : > { %v595_v16 = vsel %vm522_vm6, %v983_v15, 0.0 }
 0x437   : > { %596 = vadd.xlane.f32.xlu2 %v595_v16 }
 0x442   : > { %v601_v17 = vpop.permute.xlu1 %600 }
 0x443   : > { %621 = vmatpush.msrb.mxu2 %v601_v17 }
 0x445   : > { %666 = vmatpush.msra.mxu2 %v436_v19 }
 0x447   : > { %667 = vmatpush.msra.mxu2 %v435_v20 }
 0x44a   : > { %v673_v18 = vpop.permute.xlu1 %672 }
 0x44b   : > { %942 = vmatmul.msk.f32.vlgmr.msrb.gmra.mxu0 %vm494_vm4, %v673_v18 }
 0x4aa   : > { %v597_v21 = vpop.xlane.xlu2 %596 }
 0x4ab   : > { %984 = vrcp.f32 %v597_v21 }
 0x4b1   : > { %v985_v23 = vpop.eup %984 }
 0x4b2   : > { %v599_v24 = vmul.f32 %v985_v23, %v983_v15 }
 0x4b4   : > { %938 = vmatmul.msk.f32.vlgmr.msrb.gmra.mxu2 %vm522_vm6, %v599_v24 }
 0x4b5   : > { %945 = vmatpush.xpose.msk.msrb.mxu2 %vm494_vm4, %v765_v25 }
 0x4bc   : > { %940 = vmatmul.msk.f32.vlgmr.msra.gmra.mxu2 %vm494_vm4, %v557_v8 }
 0x4c4   : > { %946 = vmatmul.msk.f32.vlgmr.msrb.gmra.mxu2 %vm494_vm4, %v763_v26 }
 0x4c8   : > { %v697_v27 = vpop.f32.mrf.mxu0 }
 0x4c9   : > { %v700_v28 = vsel %vm493_vm5, %v697_v27, -1e+09 }
 0x4ca   : > { %v701_v29 = vsel %vm522_vm6, %v700_v28, -inf }
 0x4cb   : > { %702 = vmax.xlane.f32.xlu1 %v701_v29 }
 0x537   : > { %v623_v31 = vpop.f32.mrf.mxu2 }
 0x538   : > { %939 = vmatmul.msk.f32.vlgmr.msra.gmra.mxu3 %vm494_vm4, %v623_v31 }
 0x53e   : > { %v703_v32 = vpop.xlane.xlu1 %702 }
 0x53f   : > { %v704_v33 = vsub.f32 %v700_v28, %v703_v32  ;;  %v669_v34 = vpop.f32.mrf.mxu2 }
 0x541   : > { %v705_v35 = vmul.f32 1.442695, %v704_v33 }
 0x543   : > { %986 = vpow2.f32 %v705_v35 }
 0x547   : > { %v787_v36 = vpop.f32.mrf.mxu2 }
 0x548   : > { %v790_v37 = vsel %vm493_vm5, %v787_v36, -1e+09 }
 0x549   : > { %v987_v38 = vpop.eup %986  ;;  %v791_v39 = vsel %vm522_vm6, %v790_v37, -inf }
 0x54a   : > { %792 = vmax.xlane.f32.xlu2 %v791_v39  ;;  %v707_v40 = vsel %vm522_vm6, %v987_v38, 0.0 }
 0x54b   : > { %708 = vadd.xlane.f32.xlu0 %v707_v40 }
 0x562   : > { %712 = vrot.lane.b32.xlu2 %v1147_v54, %s1008_s21 }
 0x5bb   : > { %v646_v60 = vpop.f32.mrf.mxu3 }
 0x5bc   : > { %v670_v62 = vadd.f32 %v669_v34, %v646_v60 }
 0x5bd   : > { %v793_v41 = vpop.xlane.xlu2 %792 }
 0x5be   : > { %v794_v42 = vsub.f32 %v790_v37, %v793_v41  ;;  %v709_v43 = vpop.xlane.xlu0 %708 }
 0x5bf   : > { %988 = vrcp.f32 %v709_v43 }
 0x5c0   : > { %v795_v44 = vmul.f32 1.442695, %v794_v42 }
 0x5c2   : > { %990 = vpow2.f32 %v795_v44 }
 0x5c5   : > { %v989_v45 = vpop.eup %988  ;;  %v713_v46 = vpop.permute.xlu2 %712 }
 0x5c6   : > { %v711_v47 = vmul.f32 %v989_v45, %v987_v38  ;;  %733 = vmatpush.msrb.mxu1 %v713_v46 }
 0x5c8   : > { %v991_v48 = vpop.eup %990  ;;  %943 = vmatmul.msk.f32.vlgmr.msrb.gmra.mxu1 %vm522_vm6, %v711_v47 }
 0x5c9   : > { %v797_v49 = vsel %vm522_vm6, %v991_v48, 0.0  ;;  %845 = vmatpush.msra.mxu1 %v442_v52 }
 0x5ca   : > { %798 = vadd.xlane.f32.xlu2 %v797_v49 }
 0x5cb   : > { %846 = vmatpush.msra.mxu1 %v441_v58 }
 0x5e2   : > { %802 = vrot.lane.b32.xlu2 %v1147_v54, %s1009_s22 }
 0x63d   : > { %v799_v53 = vpop.xlane.xlu2 %798 }
 0x63e   : > { %992 = vrcp.f32 %v799_v53 }
 0x644   : > { %v993_v55 = vpop.eup %992 }
 0x645   : > { %v801_v56 = vmul.f32 %v993_v55, %v991_v48  ;;  %v803_v54 = vpop.permute.xlu2 %802  ;;  %v735_v57 = vpop.f32.mrf.mxu1 }
 0x646   : > { %944 = vmatmul.msk.f32.vlgmr.msrb.gmra.mxu3 %vm494_vm4, %v735_v57  ;;  %823 = vmatpush.msra.mxu0 %v803_v54 }
 0x647   : > { %947 = vmatmul.msk.f32.vlgmr.msra.gmra.mxu0 %vm522_vm6, %v801_v56 }
 0x6c4   : > { %v825_v59 = vpop.f32.mrf.mxu0 }
 0x6c5   : > { %948 = vmatmul.msk.f32.vlgmr.msra.gmra.mxu1 %vm494_vm4, %v825_v59 }
 0x6c9   : > { %v758_v61 = vpop.f32.mrf.mxu3 }
 0x6ca   : > { %v761_v63 = vadd.f32 %v758_v61, %v670_v62 }
 0x742   : > { %v848_v1 = vpop.f32.mrf.mxu1 }
 0x743   : > { %v851_v2 = vadd.f32 %v848_v1, %v761_v63 }
 0x745   : > { %v852_v4 = vadd.f32 %v851_v2, %v1079_v0 }
 0x747   : > { %v856_v5 = vadd.f32 %v971_v3, %v852_v4 }
 0x749   : > { %857 = vst.msk [vmem:[%s371_s17] sm:$0xff] %vm375_vm0, %v856_v5 }
 0x74a PF: > { %s20_s13 = sadd.s32 1, %s1000_s13  }
 0x74b   : > { %p17_p4 = scmp.ge.s32.totalorder %s20_s13, 4  }
 0x74d   :  { %19 = sbr.rel (!%p17_p4) target bundleno = 1 (0x1), region = 93 }

// kernel: individual_tf_forward.16
= control target key start
LH: loop header
LB: loop body
LE: loop exit
PB: predicated region body
PF: predicated region fallthrough
CT: control target
= control target key end

     0   :  { %s528_s24 = smov 0   ;;  %s650_s0 = inlined_call_operand.vmem [shape: f32[2,8,64], index: 0, kind: input, shape index: {}]   ;;  %s651_s1 = inlined_call_operand.vmem [shape: f32[1,64], index: 1, kind: input, shape index: {}]   ;;  %s652_s2 = inlined_call_operand.vmem [shape: f32[1,64], index: 2, kind: input, shape index: {}]   ;;  %s653_s3 = inlined_call_operand.vmem [shape: f32[64,128], index: 3, kind: input, shape index: {}]   ;;  %s654_s4 = inlined_call_operand.vmem [shape: f32[1,128], index: 4, kind: input, shape index: {}]   ;;  %s655_s5 = inlined_call_operand.vmem [shape: f32[128,64], index: 5, kind: input, shape index: {}]   ;;  %s656_s6 = inlined_call_operand.vmem [shape: f32[1,64], index: 6, kind: input, shape index: {}]   ;;  %s657_s7 = inlined_call_operand.vmem [shape: f32[2,8,64], index: 7, kind: output, shape index: {}]  }
   0x1 LB: > { %s450_s25 = sadd.s32 4294967295, %s485_s24   ;;  %p454_p0 = scmp.ge.s32.totalorder %s485_s24, 1  ;;  %s485_s24 = sphi %s528_s24, %s17_s24  }
   0x2   : > { %p236_p1 = scmp.lt.s32.totalorder %s485_s24, 3 }
   0x4   : > { %p237_p2 = pnand %p454_p0, %p236_p1 }
   0x5   : > { %p266_p3 = scmp.lt.s32.totalorder (!%p237_p2), %s450_s25, 1 }
   0x6   : > { %240 = sbr.rel (%p237_p2) target bundleno = 552 (0x228), region = 48 }
   0xb   : > { %s659_s25 = smov (!%p266_p3, %s450_s25), 1  ;;  %vm277_vm0 = vcmask 523264   ;;  %v487_v2 = vmov 64.0   ;;  %v325_v14 = vld [vmem:[%s653_s3 + $0x38] sm:$0xff]  ;;  %v324_v15 = vld [vmem:[%s653_s3 + $0x30] sm:$0xff]  ;;  %v323_v16 = vld [vmem:[%s653_s3 + $0x28] sm:$0xff] }
   0xc   : > { %s455_s26 = sshll.u32 %s659_s25, 3  ;;  %473 = vrcp.f32 %v487_v2  ;;  %341 = vmatpush.msra.mxu0 %v325_v14  ;;  %v322_v17 = vld [vmem:[%s653_s3 + $0x20] sm:$0xff]  ;;  %v321_v18 = vld [vmem:[%s653_s3 + $0x18] sm:$0xff]  ;;  %v320_v19 = vld [vmem:[%s653_s3 + $0x10] sm:$0xff] }
   0xd   : > { %s269_s29 = scalar_lea.vmem %s650_s0, %s455_s26  ;;  %v319_v20 = vld [vmem:[%s653_s3 + $0x8] sm:$0xff]  ;;  %v318_v21 = vld [vmem:[%s653_s3] sm:$0xff]  ;;  %v369_v24 = vld [vmem:[%s655_s5 + $0x78] sm:$0xff]  ;;  %s273_s28 = scalar_lea.vmem %s657_s7, %s455_s26 }
   0xe   : > { %v544_v0 = vld [vmem:[%s269_s29] sm:$0xff]  ;;  %342 = vmatpush.msra.mxu0 %v324_v15  ;;  %v368_v25 = vld [vmem:[%s655_s5 + $0x70] sm:$0xff]  ;;  %370 = vmatpush.msra.mxu1 %v369_v24  ;;  %v367_v26 = vld [vmem:[%s655_s5 + $0x68] sm:$0xff] }
   0xf   : > { %v278_v1 = vsel %vm277_vm0, %v544_v0, 0.0  ;;  %v366_v28 = vld [vmem:[%s655_s5 + $0x60] sm:$0xff]  ;;  %v365_v30 = vld [vmem:[%s655_s5 + $0x58] sm:$0xff]  ;;  %v364_v32 = vld [vmem:[%s655_s5 + $0x50] sm:$0xff] }
  0x10   : > { %279 = vadd.xlane.f32.xlu0 %v278_v1  ;;  %343 = vmatpush.msra.mxu0 %v323_v16  ;;  %v363_v34 = vld [vmem:[%s655_s5 + $0x48] sm:$0xff]  ;;  %v362_v36 = vld [vmem:[%s655_s5 + $0x40] sm:$0xff]  ;;  %v361_v38 = vld [vmem:[%s655_s5 + $0x38] sm:$0xff] }
  0x11   : > { %371 = vmatpush.msra.mxu1 %v368_v25  ;;  %v360_v41 = vld [vmem:[%s655_s5 + $0x30] sm:$0xff]  ;;  %v359_v44 = vld [vmem:[%s655_s5 + $0x28] sm:$0xff]  ;;  %v358_v46 = vld [vmem:[%s655_s5 + $0x20] sm:$0xff] }
  0x12   : > { %v474_v3 = vpop.eup %473  ;;  %344 = vmatpush.msra.mxu0 %v322_v17  ;;  %v469_v47 = vld [vmem:[%s651_s1] ss:$0 sm:$0xff]  ;;  %v357_v48 = vld [vmem:[%s655_s5 + $0x18] sm:$0xff]  ;;  %v356_v54 = vld [vmem:[%s655_s5 + $0x10] sm:$0xff] }
  0x13   : > { %v282_v4 = vmul.f32 64.0, %v474_v3  ;;  %vm286_vm1 = vweird.f32 %v474_v3  ;;  %372 = vmatpush.msra.mxu1 %v367_v26  ;;  %v470_v50 = vld [vmem:[%s652_s2] ss:$0 sm:$0xff]  ;;  %v355_v55 = vld [vmem:[%s655_s5 + $0x8] sm:$0xff] }
  0x14   : > { %345 = vmatpush.msra.mxu0 %v321_v18  ;;  %v354_v56 = vld [vmem:[%s655_s5] sm:$0xff] }
  0x15   : > { %v283_v5 = vsub.f32 1.0, %v282_v4  ;;  %373 = vmatpush.msra.mxu1 %v366_v28  ;;  %v471_v57 = vld [vmem:[%s654_s4] ss:$0 sm:$0xff] }
  0x16   : > { %346 = vmatpush.msra.mxu0 %v320_v19  ;;  %v472_v61 = vld [vmem:[%s656_s6] ss:$0 sm:$0xff] }
  0x17   : > { %v284_v6 = vmul.f32 %v474_v3, %v283_v5  ;;  %374 = vmatpush.msra.mxu1 %v365_v30 }
  0x18   : > { %347 = vmatpush.msra.mxu0 %v319_v20 }
  0x19   : > { %v285_v7 = vadd.f32 %v474_v3, %v284_v6  ;;  %375 = vmatpush.msra.mxu1 %v364_v32 }
  0x1a   : > { %348 = vmatpush.msra.mxu0 %v318_v21 }
  0x1b   : > { %v287_v8 = vsel %vm286_vm1, %v474_v3, %v285_v7  ;;  %376 = vmatpush.msra.mxu1 %v363_v34 }
  0x1d   : > { %377 = vmatpush.msra.mxu1 %v362_v36 }
  0x1f   : > { %378 = vmatpush.msra.mxu1 %v361_v38 }
  0x21   : > { %379 = vmatpush.msra.mxu1 %v360_v41 }
  0x23   : > { %380 = vmatpush.msra.mxu1 %v359_v44 }
  0x25   : > { %381 = vmatpush.msra.mxu1 %v358_v46 }
  0x27   : > { %382 = vmatpush.msra.mxu1 %v357_v48 }
  0x29   : > { %383 = vmatpush.msra.mxu1 %v356_v54 }
  0x2b   : > { %384 = vmatpush.msra.mxu1 %v355_v55 }
  0x2d   : > { %385 = vmatpush.msra.mxu1 %v354_v56 }
  0x83   : > { %v280_v9 = vpop.xlane.xlu0 %279 }
  0x84   : > { %v288_v10 = vmul.f32 %v287_v8, %v280_v9 }
  0x86   : > { %v549_v11 = vsub.f32 %v544_v0, %v288_v10 }
  0x88   : > { %v290_v12 = vmul.f32 %v549_v11, %v549_v11  ;;  %v312_v49 = vmul.f32 %v469_v47, %v549_v11 }
  0x8a   : > { %v291_v13 = vsel %vm277_vm0, %v290_v12, 0.0 }
  0x8b   : > { %292 = vadd.xlane.f32.xlu0 %v291_v13 }
  0xfe   : > { %v293_v22 = vpop.xlane.xlu0 %292 }
  0xff   : > { %v294_v23 = vmul.f32 0.015873017, %v293_v22 }
 0x101   : > { %475 = vrsqrt.f32 %v294_v23  ;;  %vm302_vm2 = vcmp.eq.f32.partialorder %v294_v23, inf  ;;  %v305_v40 = vand.u32 2147483648, %v294_v23  ;;  %vm304_vm3 = vcmp.eq.f32.partialorder %v294_v23, 0.0 }
 0x107   : > { %v476_v27 = vpop.eup %475 }
 0x108   : > { %v296_v29 = vmul.f32 %v476_v27, %v294_v23 }
 0x10a   : > { %v297_v31 = vmul.f32 %v476_v27, %v296_v29 }
 0x10c   : > { %v298_v33 = vmul.f32 0.5, %v297_v31 }
 0x10e   : > { %v299_v35 = vsub.f32 1.5, %v298_v33 }
 0x110   : > { %v300_v37 = vmul.f32 %v476_v27, %v299_v35 }
 0x112   : > { %v301_v39 = vmul.f32 %v300_v37, %v294_v23 }
 0x114   : > { %v303_v42 = vsel %vm302_vm2, %v294_v23, %v301_v39 }
 0x115   : > { %v306_v43 = vsel %vm304_vm3, %v305_v40, %v303_v42 }
 0x116   : > { %v307_v45 = vadd.f32 1e-06, %v306_v43 }
 0x118   : > { %477 = vrcp.f32 %v307_v45 }
 0x11e   : > { %v478_v51 = vpop.eup %477 }
 0x11f   : > { %v313_v52 = vmul.f32 %v478_v51, %v312_v49 }
 0x121   : > { %v317_v53 = vadd.f32 %v470_v50, %v313_v52 }
 0x123   : > { %457 = vmatmul.msk.f32.vlgmr.msra.gmra.mxu0 %vm277_vm0, %v317_v53 }
 0x1a0   : > { %v350_v58 = vpop.f32.mrf.mxu0 }
 0x1a1   : > { %v351_v59 = vadd.f32 %v471_v57, %v350_v58 }
 0x1a3   : > { %v353_v60 = vmax.f32 %v351_v59, 0.0 }
 0x1a5   : > { %386 = vmatmul.f32.vlgmr.msra.gmra.mxu1 %v353_v60 }
 0x222   : > { %v387_v62 = vpop.f32.mrf.mxu1 }
 0x223   : > { %v390_v63 = vadd.f32 %v387_v62, %v544_v0 }
 0x225   : > { %v395_v1 = vadd.f32 %v472_v61, %v390_v63 }
 0x227   : > { %396 = vst.msk [vmem:[%s273_s28] sm:$0xff] %vm277_vm0, %v395_v1 }
 0x228 PF: > { %s17_s24 = sadd.s32 1, %s485_s24  }
 0x229   : > { %p14_p4 = scmp.ge.s32.totalorder %s17_s24, 4  }
 0x22b   :  { %16 = sbr.rel (!%p14_p4) target bundleno = 1 (0x1), region = 78 }

// kernel: individual_tf_forward.19
= control target key start
LH: loop header
LB: loop body
LE: loop exit
PB: predicated region body
PF: predicated region fallthrough
CT: control target
= control target key end

     0   :  { %vm18_vm0 = vcmask 523264   ;;  %v105_v4 = vmov 64.0   ;;  %s150_s0 = inlined_call_operand.vmem [shape: f32[16,64], index: 0, kind: input, shape index: {}]   ;;  %s151_s1 = inlined_call_operand.vmem [shape: f32[1,64], index: 1, kind: input, shape index: {}]   ;;  %s152_s2 = inlined_call_operand.vmem [shape: f32[1,64], index: 2, kind: input, shape index: {}]   ;;  %s153_s3 = inlined_call_operand.vmem [shape: f32[16,64], index: 3, kind: output, shape index: {}]  }
   0x1   :  { %v14_v0 = vld [vmem:[%s150_s0] sm:$0xff]  ;;  %v15_v2 = vld [vmem:[%s150_s0 + $0x8] sm:$0xff]  ;;  %95 = vrcp.f32 %v105_v4 }
   0x2   :  { %v19_v1 = vsel %vm18_vm0, %v14_v0, 0.0  ;;  %v22_v3 = vsel %vm18_vm0, %v15_v2, 0.0  ;;  %v93_v12 = vld [vmem:[%s151_s1] ss:$0 sm:$0xff] }
   0x3   :  { %20 = vadd.xlane.f32.xlu0 %v19_v1  ;;  %v94_v48 = vld [vmem:[%s152_s2] ss:$0 sm:$0xff] }
   0x7   :  { %v96_v5 = vpop.eup %95 }
   0x8   :  { %v26_v6 = vmul.f32 64.0, %v96_v5  ;;  %vm30_vm1 = vweird.f32 %v96_v5 }
   0xa   :  { %v27_v7 = vsub.f32 1.0, %v26_v6 }
   0xb   :  { %23 = vadd.xlane.f32.xlu0 %v22_v3 }
   0xc   :  { %v28_v8 = vmul.f32 %v96_v5, %v27_v7 }
   0xe   :  { %v29_v9 = vadd.f32 %v96_v5, %v28_v8 }
  0x10   :  { %v31_v10 = vsel %vm30_vm1, %v96_v5, %v29_v9 }
  0x76   :  { %v21_v11 = vpop.xlane.xlu0 %20 }
  0x77   :  { %v32_v13 = vmul.f32 %v31_v10, %v21_v11 }
  0x79   :  { %v34_v14 = vsub.f32 %v14_v0, %v32_v13 }
  0x7b   :  { %v77_v15 = vmul.f32 %v93_v12, %v34_v14  ;;  %v36_v16 = vmul.f32 %v34_v14, %v34_v14 }
  0x7d   :  { %v38_v17 = vsel %vm18_vm0, %v36_v16, 0.0 }
  0x7e   :  { %39 = vadd.xlane.f32.xlu1 %v38_v17  ;;  %v24_v18 = vpop.xlane.xlu0 %23 }
  0x7f   :  { %v33_v19 = vmul.f32 %v31_v10, %v24_v18 }
  0x81   :  { %v35_v20 = vsub.f32 %v15_v2, %v33_v19 }
  0x83   :  { %v78_v21 = vmul.f32 %v93_v12, %v35_v20  ;;  %v37_v22 = vmul.f32 %v35_v20, %v35_v20 }
  0x85   :  { %v41_v23 = vsel %vm18_vm0, %v37_v22, 0.0 }
  0x86   :  { %42 = vadd.xlane.f32.xlu1 %v41_v23 }
  0xf1   :  { %v40_v24 = vpop.xlane.xlu1 %39 }
  0xf2   :  { %v44_v25 = vmul.f32 0.015873017, %v40_v24 }
  0xf4   :  { %97 = vrsqrt.f32 %v44_v25  ;;  %vm53_vm2 = vcmp.eq.f32.partialorder %v44_v25, inf  ;;  %v56_v38 = vand.u32 2147483648, %v44_v25  ;;  %vm55_vm3 = vcmp.eq.f32.partialorder %v44_v25, 0.0 }
  0xf9   :  { %v43_v26 = vpop.xlane.xlu1 %42 }
  0xfa   :  { %v98_v27 = vpop.eup %97  ;;  %v45_v28 = vmul.f32 0.015873017, %v43_v26 }
  0xfb   :  { %v47_v29 = vmul.f32 %v98_v27, %v44_v25 }
  0xfc   :  { %99 = vrsqrt.f32 %v45_v28  ;;  %vm65_vm4 = vcmp.eq.f32.partialorder %v45_v28, inf  ;;  %v68_v46 = vand.u32 2147483648, %v45_v28  ;;  %vm67_vm5 = vcmp.eq.f32.partialorder %v45_v28, 0.0 }
  0xfd   :  { %v48_v30 = vmul.f32 %v98_v27, %v47_v29 }
  0xff   :  { %v49_v31 = vmul.f32 0.5, %v48_v30 }
 0x101   :  { %v50_v32 = vsub.f32 1.5, %v49_v31 }
 0x102   :  { %v100_v33 = vpop.eup %99 }
 0x103   :  { %v51_v34 = vmul.f32 %v98_v27, %v50_v32  ;;  %v59_v35 = vmul.f32 %v100_v33, %v45_v28 }
 0x105   :  { %v52_v36 = vmul.f32 %v51_v34, %v44_v25  ;;  %v60_v37 = vmul.f32 %v100_v33, %v59_v35 }
 0x107   :  { %v54_v39 = vsel %vm53_vm2, %v44_v25, %v52_v36  ;;  %v61_v40 = vmul.f32 0.5, %v60_v37 }
 0x108   :  { %v57_v41 = vsel %vm55_vm3, %v56_v38, %v54_v39 }
 0x109   :  { %v70_v42 = vadd.f32 1e-06, %v57_v41  ;;  %v62_v43 = vsub.f32 1.5, %v61_v40 }
 0x10b   :  { %101 = vrcp.f32 %v70_v42  ;;  %v63_v44 = vmul.f32 %v100_v33, %v62_v43 }
 0x10d   :  { %v64_v45 = vmul.f32 %v63_v44, %v45_v28 }
 0x10f   :  { %v66_v47 = vsel %vm65_vm4, %v45_v28, %v64_v45 }
 0x110   :  { %v69_v49 = vsel %vm67_vm5, %v68_v46, %v66_v47 }
 0x111   :  { %v102_v50 = vpop.eup %101  ;;  %v71_v51 = vadd.f32 1e-06, %v69_v49 }
 0x112   :  { %v79_v52 = vmul.f32 %v102_v50, %v77_v15 }
 0x113   :  { %103 = vrcp.f32 %v71_v51 }
 0x114   :  { %v84_v53 = vadd.f32 %v94_v48, %v79_v52 }
 0x116   :  { %86 = vst.msk [vmem:[%s153_s3] sm:$0xff] %vm18_vm0, %v84_v53 }
 0x119   :  { %v104_v54 = vpop.eup %103 }
 0x11a   :  { %v80_v55 = vmul.f32 %v104_v54, %v78_v21 }
 0x11c   :  { %v85_v56 = vadd.f32 %v94_v48, %v80_v55 }
 0x11e   :  { %87 = vst.msk [vmem:[%s153_s3 + $0x8] sm:$0xff] %vm18_vm0, %v85_v56 }

// kernel: individual_tf_forward.17
= control target key start
LH: loop header
LB: loop body
LE: loop exit
PB: predicated region body
PF: predicated region fallthrough
CT: control target
= control target key end

     0   :  { %15 = vsyncpa [#allocation3], 0  ;;  %s1360_s0 = inlined_call_operand.vmem [shape: f32[2,8,64], index: 0, kind: input, shape index: {}]   ;;  %s1361_s1 = inlined_call_operand.vmem [shape: f32[2,8,8], index: 1, kind: input, shape index: {}]   ;;  %s1362_s2 = inlined_call_operand.vmem [shape: f32[1,64], index: 2, kind: input, shape index: {}]   ;;  %s1363_s3 = inlined_call_operand.vmem [shape: f32[1,64], index: 3, kind: input, shape index: {}]   ;;  %s1364_s4 = inlined_call_operand.vmem [shape: f32[64,64], index: 4, kind: input, shape index: {}]   ;;  %s1365_s5 = inlined_call_operand.vmem [shape: f32[1,64], index: 5, kind: input, shape index: {}]   ;;  %s1366_s6 = inlined_call_operand.hbm [shape: f32[64,128], index: 6, kind: input, shape index: {}]   ;;  %s1367_s7 = inlined_call_operand.vmem [shape: f32[1,128], index: 7, kind: input, shape index: {}]   ;;  %s1368_s8 = inlined_call_operand.hbm [shape: f32[64,64], index: 8, kind: input, shape index: {}]   ;;  %s1369_s9 = inlined_call_operand.vmem [shape: f32[1,64], index: 9, kind: input, shape index: {}]   ;;  %s1370_s10 = inlined_call_operand.vmem [shape: f32[2,8,64], index: 10, kind: output, shape index: {}]  }
   0x1   :  { %16 = vsyncpa [#allocation5], 0  ;;  %s1220_s13 = smov 0  }
   0x2 LB: > { %s296_s16 = sshll.u32 %s1366_s6, 4  ;;  %s979_s17 = sadd.s32 4294967295, %s1151_s13   ;;  %s1151_s13 = sphi %s1220_s13, %s22_s13   ;;  %s297_s16 = int_to_ptr.hbm [resolvable:$true] %s296_s16 }
   0x3   : > { %p981_p0 = scmp.ge.s32.totalorder %s1151_s13, 1  ;;  %p273_p1 = scmp.lt.s32.totalorder %s1151_s13, 3 }
   0x4   : > { %p1026_p2 = scmp.eq.s32.totalorder %s979_s17, 0  ;;  %s1153_s19 = smov [#allocation2]  }
   0x5   : > { %p1231_p3 = pnand %p981_p0, %p273_p1  ;;  %s298_s20 = sshll.u32 %s1153_s19, 4  ;;  %s299_s20 = int_to_ptr.vmem [resolvable:$true] %s298_s20 }
   0x6   : > { %s313_s23 = sshll.u32 %s1368_s8, 4  ;;  %s1154_s24 = smov [#allocation4]   ;;  %s314_s23 = int_to_ptr.hbm [resolvable:$true] %s313_s23 }
   0x7   : > { %p1019_p4 = pneg %p1231_p3  ;;  %s315_s25 = sshll.u32 %s1154_s24, 4  ;;  %s316_s25 = int_to_ptr.vmem [resolvable:$true] %s315_s25 }
   0x8   : > { %s1155_s26 = smov 128   ;;  %s1156_s27 = smov 8  }
   0x9   : > { %p1020_p5 = pnand %p1026_p2, %p1019_p4  ;;  %348 = sbr.rel (%p1231_p3) target bundleno = 1874 (0x752), region = 60 }
   0xb   : > { %1022 = dma.hbm_to_vmem [thread:$0]  (!%p1020_p5), %s297_s16, 1024, %s299_s20, [#allocation3], %s1155_s26, %s1155_s26, %s1156_s27  }
   0xc   : > { %1025 = dma.hbm_to_vmem [thread:$0]  (!%p1020_p5), %s314_s23, 1024, %s316_s25, [#allocation5], %s1155_s26, %s1155_s26, %s1156_s27  }
   0xe   : > { %1142 = dma.done.wait (%p1026_p2), [#allocation3], 1024  }
   0xf   : > { %1144 = vsyncadd (%p1026_p2), [#allocation3], 4294966272 }
  0x10   : > { %1146 = dma.done.wait (%p1026_p2), [#allocation5], 1024  }
  0x11   : > { %1148 = vsyncadd (%p1026_p2), [#allocation5], 4294966272  ;;  %p394_p6 = scmp.lt.s32.totalorder %s979_s17, 1  ;;  %vm409_vm0 = vcmask 523264   ;;  %v1157_v2 = vmov 64.0   ;;  %v458_v14 = vld [vmem:[%s1364_s4 + $0x38] sm:$0xff] }
  0x12   : > { %1055 = vrcp.f32 %v1157_v2  ;;  %v467_v15 = vld [vmem:[#allocation2 + $0x38] sm:$0xff]  ;;  %v457_v16 = vld [vmem:[%s1364_s4 + $0x30] sm:$0xff]  ;;  %492 = vmatpush.msra.mxu0 %v458_v14  ;;  %v456_v18 = vld [vmem:[%s1364_s4 + $0x28] sm:$0xff]  ;;  %vm528_vm4 = vcmask 130048   ;;  %s1158_s19 = smov 64   ;;  %s1159_s20 = smov 112  }
  0x13   : > { %s1373_s17 = smov (!%p394_p6, %s979_s17), 1  ;;  %515 = vmatpush.msra.mxu1 %v467_v15  ;;  %v466_v17 = vld [vmem:[#allocation2 + $0x30] sm:$0xff]  ;;  %v465_v19 = vld [vmem:[#allocation2 + $0x28] sm:$0xff]  ;;  %v455_v20 = vld [vmem:[%s1364_s4 + $0x20] sm:$0xff]  ;;  %s1160_s21 = smov 96   ;;  %vm556_vm6 = vcmask 64512  }
  0x14   : > { %s1247_s28 = sshll.u32 %s1373_s17, 3  ;;  %493 = vmatpush.msra.mxu0 %v457_v16  ;;  %v464_v21 = vld [vmem:[#allocation2 + $0x20] sm:$0xff]  ;;  %v454_v22 = vld [vmem:[%s1364_s4 + $0x18] sm:$0xff]  ;;  %v453_v24 = vld [vmem:[%s1364_s4 + $0x10] sm:$0xff]  ;;  %s1161_s22 = smov 80  }
  0x15   : > { %s397_s11 = scalar_lea.vmem %s1360_s0, %s1247_s28  ;;  %516 = vmatpush.msra.mxu1 %v466_v17  ;;  %v463_v23 = vld [vmem:[#allocation2 + $0x18] sm:$0xff]  ;;  %v462_v25 = vld [vmem:[#allocation2 + $0x10] sm:$0xff]  ;;  %v452_v26 = vld [vmem:[%s1364_s4 + $0x8] sm:$0xff]  ;;  %s401_s25 = scalar_lea.vmem %s1361_s1, %s1247_s28 }
  0x16   : > { %v1253_v0 = vld [vmem:[%s397_s11] sm:$0xff]  ;;  %494 = vmatpush.msra.mxu0 %v456_v18  ;;  %v461_v27 = vld [vmem:[#allocation2 + $0x8] sm:$0xff]  ;;  %s1162_s26 = smov 48   ;;  %s1163_s27 = smov 32  }
  0x17   : > { %v410_v1 = vsel %vm409_vm0, %v1253_v0, 0.0  ;;  %517 = vmatpush.msra.mxu1 %v465_v19  ;;  %v451_v28 = vld [vmem:[%s1364_s4] sm:$0xff]  ;;  %v470_v19 = vld [vmem:[#allocation4 + $0x8] sm:$0xff]  ;;  %s1164_s29 = smov 16   ;;  %s405_s15 = scalar_lea.vmem %s1370_s10, %s1247_s28 }
  0x18   : > { %411 = vadd.xlane.f32.xlu0 %v410_v1  ;;  %v1056_v3 = vpop.eup %1055  ;;  %495 = vmatpush.msra.mxu0 %v455_v20  ;;  %v460_v29 = vld [vmem:[#allocation2] sm:$0xff] }
  0x19   : > { %v414_v4 = vmul.f32 64.0, %v1056_v3  ;;  %vm418_vm1 = vweird.f32 %v1056_v3  ;;  %518 = vmatpush.msra.mxu1 %v464_v21  ;;  %v1050_v43 = vld [vmem:[%s1362_s2] ss:$0 sm:$0xff] }
  0x1a   : > { %496 = vmatpush.msra.mxu0 %v454_v22  ;;  %v1051_v45 = vld [vmem:[%s1363_s3] ss:$0 sm:$0xff]  ;;  %v472_v22 = vld [vmem:[#allocation4 + $0x18] sm:$0xff] }
  0x1b   : > { %v415_v5 = vsub.f32 1.0, %v414_v4  ;;  %519 = vmatpush.msra.mxu1 %v463_v23  ;;  %v1052_v49 = vld [vmem:[%s1365_s5] ss:$0 sm:$0xff] }
  0x1c   : > { %497 = vmatpush.msra.mxu0 %v453_v24  ;;  %v1053_v50 = vld [vmem:[%s1367_s7] ss:$0 sm:$0xff] }
  0x1d   : > { %v416_v6 = vmul.f32 %v1056_v3, %v415_v5  ;;  %520 = vmatpush.msra.mxu1 %v462_v25  ;;  %v1313_v59 = vld [vmem:[%s401_s25] sm:$0xff] }
  0x1e   : > { %498 = vmatpush.msra.mxu0 %v452_v26  ;;  %vm527_vm5 = vcmp.ne.f32.partialorder %v1313_v59, 0.0  ;;  %v469_v20 = vld [vmem:[#allocation4] sm:$0xff]  ;;  %v475_v59 = vld [vmem:[#allocation4 + $0x30] sm:$0xff] }
  0x1f   : > { %v417_v7 = vadd.f32 %v1056_v3, %v416_v6  ;;  %521 = vmatpush.msra.mxu1 %v461_v27 }
  0x20   : > { %499 = vmatpush.msra.mxu0 %v451_v28 }
  0x21   : > { %v419_v8 = vsel %vm418_vm1, %v1056_v3, %v417_v7  ;;  %522 = vmatpush.msra.mxu1 %v460_v29 }
  0x8b   : > { %v412_v9 = vpop.xlane.xlu0 %411 }
  0x8c   : > { %v420_v10 = vmul.f32 %v419_v8, %v412_v9 }
  0x8e   : > { %v421_v11 = vsub.f32 %v1253_v0, %v420_v10 }
  0x90   : > { %v422_v12 = vmul.f32 %v421_v11, %v421_v11  ;;  %v444_v44 = vmul.f32 %v1050_v43, %v421_v11 }
  0x92   : > { %v423_v13 = vsel %vm409_vm0, %v422_v12, 0.0 }
  0x93   : > { %424 = vadd.xlane.f32.xlu0 %v423_v13 }
 0x106   : > { %v425_v30 = vpop.xlane.xlu0 %424 }
 0x107   : > { %v426_v31 = vmul.f32 0.015873017, %v425_v30  ;;  %v471_v30 = vld [vmem:[#allocation4 + $0x10] sm:$0xff] }
 0x109   : > { %1057 = vrsqrt.f32 %v426_v31  ;;  %vm434_vm2 = vcmp.eq.f32.partialorder %v426_v31, inf  ;;  %v437_v39 = vand.u32 2147483648, %v426_v31  ;;  %vm436_vm3 = vcmp.eq.f32.partialorder %v426_v31, 0.0 }
 0x10f   : > { %v1058_v32 = vpop.eup %1057 }
 0x110   : > { %v428_v33 = vmul.f32 %v1058_v32, %v426_v31 }
 0x112   : > { %v429_v34 = vmul.f32 %v1058_v32, %v428_v33 }
 0x114   : > { %v430_v35 = vmul.f32 0.5, %v429_v34 }
 0x116   : > { %v431_v36 = vsub.f32 1.5, %v430_v35 }
 0x118   : > { %v432_v37 = vmul.f32 %v1058_v32, %v431_v36 }
 0x11a   : > { %v433_v38 = vmul.f32 %v432_v37, %v426_v31 }
 0x11c   : > { %v435_v40 = vsel %vm434_vm2, %v426_v31, %v433_v38 }
 0x11d   : > { %v438_v41 = vsel %vm436_vm3, %v437_v39, %v435_v40 }
 0x11e   : > { %v439_v42 = vadd.f32 1e-06, %v438_v41 }
 0x120   : > { %1059 = vrcp.f32 %v439_v42 }
 0x126   : > { %v1060_v46 = vpop.eup %1059 }
 0x127   : > { %v445_v47 = vmul.f32 %v1060_v46, %v444_v44 }
 0x129   : > { %v449_v48 = vadd.f32 %v1051_v45, %v445_v47 }
 0x12b   : > { %991 = vmatmul.msk.f32.vlgmr.msra.gmra.mxu0 %vm409_vm0, %v449_v48  ;;  %992 = vmatmul.msk.f32.vlgmr.msra.gmra.mxu1 %vm409_vm0, %v449_v48 }
 0x1a8   : > { %v501_v51 = vpop.f32.mrf.mxu0  ;;  %v524_v52 = vpop.f32.mrf.mxu1 }
 0x1a9   : > { %v502_v53 = vadd.f32 %v1052_v49, %v501_v51  ;;  %v1297_v54 = vadd.f32 %v1053_v50, %v524_v52  ;;  %v474_v50 = vld [vmem:[#allocation4 + $0x28] sm:$0xff]  ;;  %v473_v51 = vld [vmem:[#allocation4 + $0x20] sm:$0xff]  ;;  %v476_v52 = vld [vmem:[#allocation4 + $0x38] sm:$0xff] }
 0x1ab   : > { %568 = vrot.lane.b32.xlu2 %v1297_v54, %s1158_s19  ;;  %993 = vmatpush.xpose.msk.msra.mxu2 %vm528_vm4, %v1297_v54 }
 0x1ac   : > { %594 = vrot.lane.b32.xlu0 %v502_v53, %s1159_s20 }
 0x1ae   : > { %994 = vmatmul.msk.f32.vlgmr.msra.gmra.mxu2 %vm528_vm4, %v502_v53 }
 0x1b3   : > { %596 = vrot.lane.b32.xlu2 %v1297_v54, %s1159_s20 }
 0x1b4   : > { %708 = vrot.lane.b32.xlu0 %v1297_v54, %s1160_s21 }
 0x1bc   : > { %798 = vrot.lane.b32.xlu0 %v1297_v54, %s1161_s22 }
 0x1c4   : > { %796 = vrot.lane.b32.xlu0 %v502_v53, %s1161_s22 }
 0x205   : > { %v569_v55 = vpop.permute.xlu2 %568 }
 0x206   : > { %589 = vmatpush.msra.mxu3 %v569_v55 }
 0x20d   : > { %v597_v56 = vpop.permute.xlu2 %596 }
 0x20e   : > { %996 = vmatpush.xpose.msk.msrb.mxu3 %vm528_vm4, %v597_v56 }
 0x21e   : > { %v595_v57 = vpop.permute.xlu0 %594 }
 0x226   : > { %v709_v58 = vpop.permute.xlu0 %708 }
 0x227   : > { %1001 = vmatpush.xpose.msk.msrb.mxu0 %vm528_vm4, %v709_v58 }
 0x22e   : > { %v799_v25 = vpop.permute.xlu0 %798 }
 0x231   : > { %v552_v60 = vpop.f32.mrf.mxu2 }
 0x232   : > { %v555_v61 = vsel %vm527_vm5, %v552_v60, -1e+09 }
 0x233   : > { %v557_v62 = vsel %vm556_vm6, %v555_v61, -inf }
 0x234   : > { %558 = vmax.xlane.f32.xlu1 %v557_v62 }
 0x236   : > { %v797_v26 = vpop.permute.xlu0 %796 }
 0x2a7   : > { %v559_v63 = vpop.xlane.xlu1 %558 }
 0x2a8   : > { %v560_v1 = vsub.f32 %v555_v61, %v559_v63 }
 0x2aa   : > { %v561_v2 = vmul.f32 1.442695, %v560_v1 }
 0x2ac   : > { %1061 = vpow2.f32 %v561_v2 }
 0x2b2   : > { %v1062_v3 = vpop.eup %1061 }
 0x2b3   : > { %v563_v4 = vsel %vm556_vm6, %v1062_v3, 0.0 }
 0x2b4   : > { %564 = vadd.xlane.f32.xlu1 %v563_v4 }
 0x327   : > { %v565_v5 = vpop.xlane.xlu1 %564 }
 0x328   : > { %1063 = vrcp.f32 %v565_v5 }
 0x32e   : > { %v1064_v6 = vpop.eup %1063 }
 0x32f   : > { %v567_v7 = vmul.f32 %v1064_v6, %v1062_v3  ;;  %v1054_v3 = vld [vmem:[%s1369_s9] ss:$0 sm:$0xff] }
 0x331   : > { %995 = vmatmul.msk.f32.vlgmr.msra.gmra.mxu3 %vm556_vm6, %v567_v7 }
 0x332   : > { %677 = vmatpush.msra.mxu3 %v472_v22 }
 0x334   : > { %678 = vmatpush.msra.mxu3 %v471_v30 }
 0x339   : > { %997 = vmatmul.msk.f32.vlgmr.msrb.gmra.mxu3 %vm528_vm4, %v595_v57 }
 0x33a   : > { %789 = vmatpush.msrb.mxu3 %v474_v50 }
 0x33c   : > { %790 = vmatpush.msrb.mxu3 %v473_v51 }
 0x3b4   : > { %v591_v8 = vpop.f32.mrf.mxu3 }
 0x3bc   : > { %v619_v9 = vpop.f32.mrf.mxu3 }
 0x3bd   : > { %v622_v10 = vsel %vm527_vm5, %v619_v9, -1e+09 }
 0x3be   : > { %v623_v11 = vsel %vm556_vm6, %v622_v10, -inf }
 0x3bf   : > { %624 = vmax.xlane.f32.xlu1 %v623_v11 }
 0x3d8   : > { %634 = vrot.lane.b32.xlu1 %v1297_v54, %s1162_s26 }
 0x3e0   : > { %706 = vrot.lane.b32.xlu1 %v502_v53, %s1160_s21 }
 0x432   : > { %v625_v12 = vpop.xlane.xlu1 %624 }
 0x433   : > { %v626_v13 = vsub.f32 %v622_v10, %v625_v12 }
 0x435   : > { %v627_v14 = vmul.f32 1.442695, %v626_v13 }
 0x437   : > { %1065 = vpow2.f32 %v627_v14 }
 0x43d   : > { %v1066_v15 = vpop.eup %1065 }
 0x43e   : > { %v629_v16 = vsel %vm556_vm6, %v1066_v15, 0.0 }
 0x43f   : > { %630 = vadd.xlane.f32.xlu2 %v629_v16 }
 0x44a   : > { %v635_v17 = vpop.permute.xlu1 %634 }
 0x44b   : > { %655 = vmatpush.msrb.mxu2 %v635_v17 }
 0x44d   : > { %700 = vmatpush.msra.mxu2 %v470_v19 }
 0x44f   : > { %701 = vmatpush.msra.mxu2 %v469_v20 }
 0x452   : > { %v707_v18 = vpop.permute.xlu1 %706 }
 0x453   : > { %1002 = vmatmul.msk.f32.vlgmr.msrb.gmra.mxu0 %vm528_vm4, %v707_v18 }
 0x4b2   : > { %v631_v21 = vpop.xlane.xlu2 %630 }
 0x4b3   : > { %1067 = vrcp.f32 %v631_v21 }
 0x4b9   : > { %v1068_v23 = vpop.eup %1067 }
 0x4ba   : > { %v633_v24 = vmul.f32 %v1068_v23, %v1066_v15 }
 0x4bc   : > { %998 = vmatmul.msk.f32.vlgmr.msrb.gmra.mxu2 %vm556_vm6, %v633_v24 }
 0x4bd   : > { %1005 = vmatpush.xpose.msk.msrb.mxu2 %vm528_vm4, %v799_v25 }
 0x4c4   : > { %1000 = vmatmul.msk.f32.vlgmr.msra.gmra.mxu2 %vm528_vm4, %v591_v8 }
 0x4cc   : > { %1006 = vmatmul.msk.f32.vlgmr.msrb.gmra.mxu2 %vm528_vm4, %v797_v26 }
 0x4d0   : > { %v731_v27 = vpop.f32.mrf.mxu0 }
 0x4d1   : > { %v734_v28 = vsel %vm527_vm5, %v731_v27, -1e+09 }
 0x4d2   : > { %v735_v29 = vsel %vm556_vm6, %v734_v28, -inf }
 0x4d3   : > { %736 = vmax.xlane.f32.xlu1 %v735_v29 }
 0x53f   : > { %v657_v31 = vpop.f32.mrf.mxu2 }
 0x540   : > { %999 = vmatmul.msk.f32.vlgmr.msra.gmra.mxu3 %vm528_vm4, %v657_v31 }
 0x546   : > { %v737_v32 = vpop.xlane.xlu1 %736 }
 0x547   : > { %v738_v33 = vsub.f32 %v734_v28, %v737_v32  ;;  %v703_v34 = vpop.f32.mrf.mxu2 }
 0x549   : > { %v739_v35 = vmul.f32 1.442695, %v738_v33 }
 0x54b   : > { %1069 = vpow2.f32 %v739_v35 }
 0x54f   : > { %v821_v36 = vpop.f32.mrf.mxu2 }
 0x550   : > { %v824_v37 = vsel %vm527_vm5, %v821_v36, -1e+09 }
 0x551   : > { %v1070_v38 = vpop.eup %1069  ;;  %v825_v39 = vsel %vm556_vm6, %v824_v37, -inf }
 0x552   : > { %826 = vmax.xlane.f32.xlu2 %v825_v39  ;;  %v741_v40 = vsel %vm556_vm6, %v1070_v38, 0.0 }
 0x553   : > { %742 = vadd.xlane.f32.xlu0 %v741_v40 }
 0x56a   : > { %746 = vrot.lane.b32.xlu2 %v1297_v54, %s1163_s27 }
 0x5c3   : > { %v680_v60 = vpop.f32.mrf.mxu3 }
 0x5c4   : > { %v704_v62 = vadd.f32 %v703_v34, %v680_v60 }
 0x5c5   : > { %v827_v41 = vpop.xlane.xlu2 %826 }
 0x5c6   : > { %v828_v42 = vsub.f32 %v824_v37, %v827_v41  ;;  %v743_v43 = vpop.xlane.xlu0 %742 }
 0x5c7   : > { %1071 = vrcp.f32 %v743_v43 }
 0x5c8   : > { %v829_v44 = vmul.f32 1.442695, %v828_v42 }
 0x5ca   : > { %1073 = vpow2.f32 %v829_v44 }
 0x5cd   : > { %v1072_v45 = vpop.eup %1071  ;;  %v747_v46 = vpop.permute.xlu2 %746 }
 0x5ce   : > { %v745_v47 = vmul.f32 %v1072_v45, %v1070_v38  ;;  %767 = vmatpush.msrb.mxu1 %v747_v46 }
 0x5d0   : > { %v1074_v48 = vpop.eup %1073  ;;  %1003 = vmatmul.msk.f32.vlgmr.msrb.gmra.mxu1 %vm556_vm6, %v745_v47 }
 0x5d1   : > { %v831_v49 = vsel %vm556_vm6, %v1074_v48, 0.0  ;;  %879 = vmatpush.msra.mxu1 %v476_v52 }
 0x5d2   : > { %832 = vadd.xlane.f32.xlu2 %v831_v49 }
 0x5d3   : > { %880 = vmatpush.msra.mxu1 %v475_v59 }
 0x5ea   : > { %836 = vrot.lane.b32.xlu2 %v1297_v54, %s1164_s29 }
 0x645   : > { %v833_v53 = vpop.xlane.xlu2 %832 }
 0x646   : > { %1075 = vrcp.f32 %v833_v53 }
 0x64c   : > { %v1076_v55 = vpop.eup %1075 }
 0x64d   : > { %v835_v56 = vmul.f32 %v1076_v55, %v1074_v48  ;;  %v837_v57 = vpop.permute.xlu2 %836  ;;  %v769_v58 = vpop.f32.mrf.mxu1 }
 0x64e   : > { %1004 = vmatmul.msk.f32.vlgmr.msrb.gmra.mxu3 %vm528_vm4, %v769_v58  ;;  %857 = vmatpush.msra.mxu0 %v837_v57 }
 0x64f   : > { %1007 = vmatmul.msk.f32.vlgmr.msra.gmra.mxu0 %vm556_vm6, %v835_v56 }
 0x6cc   : > { %v859_v54 = vpop.f32.mrf.mxu0 }
 0x6cd   : > { %1008 = vmatmul.msk.f32.vlgmr.msra.gmra.mxu1 %vm528_vm4, %v859_v54 }
 0x6d1   : > { %v792_v61 = vpop.f32.mrf.mxu3 }
 0x6d2   : > { %v795_v63 = vadd.f32 %v792_v61, %v704_v62 }
 0x74a   : > { %v882_v1 = vpop.f32.mrf.mxu1 }
 0x74b   : > { %v885_v2 = vadd.f32 %v882_v1, %v795_v63 }
 0x74d   : > { %v886_v4 = vadd.f32 %v885_v2, %v1253_v0 }
 0x74f   : > { %v890_v5 = vadd.f32 %v1054_v3, %v886_v4 }
 0x751   : > { %891 = vst.msk [vmem:[%s405_s15] sm:$0xff] %vm409_vm0, %v890_v5 }
 0x752 PF: > { %s22_s13 = sadd.s32 1, %s1151_s13  }
 0x753   : > { %p19_p7 = scmp.ge.s32.totalorder %s22_s13, 4  }
 0x755   :  { %21 = sbr.rel (!%p19_p7) target bundleno = 2 (0x2), region = 102 }
 0x75a   :  { %911 = vsyncpa [#allocation3], 1 }
 0x75b   :  { %913 = vsyncpa [#allocation3 + $0x1], 1 }
 0x75c   :  { %914 = vsyncpa [#allocation5], 1 }

// kernel: individual_tf_forward.20
= control target key start
LH: loop header
LB: loop body
LE: loop exit
PB: predicated region body
PF: predicated region fallthrough
CT: control target
= control target key end

     0   :  { %s337_s15 = smov 0   ;;  %s357_s0 = inlined_call_operand.vmem [shape: f32[2,8,3], index: 0, kind: input, shape index: {}]   ;;  %s358_s1 = inlined_call_operand.vmem [shape: f32[8,64], index: 1, kind: input, shape index: {}]   ;;  %s359_s2 = inlined_call_operand.vmem [shape: f32[3,64], index: 2, kind: input, shape index: {}]   ;;  %s360_s3 = inlined_call_operand.vmem [shape: f32[1,64], index: 3, kind: input, shape index: {}]   ;;  %s361_s4 = inlined_call_operand.vmem [shape: f32[2,8,64], index: 4, kind: output, shape index: {}]  }
   0x1 LB: > { %s284_s16 = sadd.s32 4294967295, %s310_s15   ;;  %p288_p0 = scmp.ge.s32.totalorder %s310_s15, 1  ;;  %s310_s15 = sphi %s337_s15, %s14_s15  }
   0x2   : > { %p161_p1 = scmp.lt.s32.totalorder %s310_s15, 3 }
   0x4   : > { %p162_p2 = pnand %p288_p0, %p161_p1 }
   0x5   : > { %p185_p3 = scmp.lt.s32.totalorder (!%p162_p2), %s284_s16, 1 }
   0x6   : > { %165 = sbr.rel (%p162_p2) target bundleno = 146 (0x92), region = 36 }
   0xb   : > { %v194_v0 = vld [vmem:[%s359_s2] sm:$0x7]  ;;  %vm203_vm0 = vcmask 1042432   ;;  %s363_s16 = smov (!%p185_p3, %s284_s16), 1  ;;  %vm199_vm1 = vcmask 23552   ;;  %vm229_vm2 = vcmask 523264  }
   0xc   : > { %291 = vmatpush.msk.msra.mxu0 %vm203_vm0, %v194_v0  ;;  %s289_s19 = sshll.u32 %s363_s16, 3  ;;  %v303_v2 = vld [vmem:[%s360_s3] ss:$0 sm:$0xff] }
   0xd   : > { %s188_s22 = scalar_lea.vmem %s357_s0, %s289_s19  ;;  %v227_v4 = vld [vmem:[%s358_s1] sm:$0xff]  ;;  %s192_s29 = scalar_lea.vmem %s361_s4, %s289_s19 }
   0xe   : > { %v193_v1 = vld [vmem:[%s188_s22] sm:$0xff] }
   0xf   : > { %292 = vmatmul.msk.f32.vlgmr.msra.gmra.mxu0 %vm199_vm1, %v193_v1 }
  0x8c   : > { %v224_v3 = vpop.f32.mrf.mxu0 }
  0x8d   : > { %v225_v5 = vadd.f32 %v303_v2, %v224_v3 }
  0x8f   : > { %v228_v6 = vadd.f32 %v227_v4, %v225_v5 }
  0x91   : > { %230 = vst.msk [vmem:[%s192_s29] sm:$0xff] %vm229_vm2, %v228_v6 }
  0x92 PF: > { %s14_s15 = sadd.s32 1, %s310_s15  }
  0x93   : > { %p11_p4 = scmp.ge.s32.totalorder %s14_s15, 4  }
  0x95   :  { %13 = sbr.rel (!%p11_p4) target bundleno = 1 (0x1), region = 66 }

// kernel: individual_tf_forward.22
= control target key start
LH: loop header
LB: loop body
LE: loop exit
PB: predicated region body
PF: predicated region fallthrough
CT: control target
= control target key end

     0   :  { %s1789_s0 = inlined_call_operand.vmem [shape: f32[2,8,64], index: 0, kind: input, shape index: {}]   ;;  %s1790_s1 = inlined_call_operand.vmem [shape: f32[2,8,64], index: 1, kind: input, shape index: {}]   ;;  %s1791_s2 = inlined_call_operand.vmem [shape: f32[2,8,8], index: 2, kind: input, shape index: {}]   ;;  %s1792_s3 = inlined_call_operand.vmem [shape: f32[1,64], index: 3, kind: input, shape index: {}]   ;;  %s1793_s4 = inlined_call_operand.hbm [shape: f32[1,64], index: 4, kind: input, shape index: {}]   ;;  %s1794_s5 = inlined_call_operand.hbm [shape: f32[64,64], index: 5, kind: input, shape index: {}]   ;;  %s1795_s6 = inlined_call_operand.hbm [shape: f32[1,64], index: 6, kind: input, shape index: {}]   ;;  %s1796_s7 = inlined_call_operand.hbm [shape: f32[64,128], index: 7, kind: input, shape index: {}]   ;;  %s1797_s8 = inlined_call_operand.hbm [shape: f32[1,128], index: 8, kind: input, shape index: {}]   ;;  %s1798_s9 = inlined_call_operand.hbm [shape: f32[64,64], index: 9, kind: input, shape index: {}]   ;;  %s1799_s10 = inlined_call_operand.hbm [shape: f32[1,64], index: 10, kind: input, shape index: {}]   ;;  %s1800_s11 = inlined_call_operand.vmem [shape: f32[2,8,64], index: 11, kind: output, shape index: {}]  }
   0x1   :  { %1801 = sst [smem:[#allocation17_spill]] %s1794_s5 }
   0x2   :  { %16 = vsyncpa [#allocation3], 0 }
   0x3   :  { %17 = vsyncpa [#allocation5], 0 }
   0x4   :  { %18 = vsyncpa [#allocation8], 0 }
   0x5   :  { %19 = vsyncpa [#allocation11], 0  ;;  %s1630_s17 = smov 0  }
   0x6 LB: > { %s1802_s5 = sld [smem:[#allocation17_spill]]  ;;  %s1639_s21 = sadd.s32 4294967295, %s1551_s17   ;;  %s1551_s17 = sphi %s1630_s17, %s25_s17  }
   0x7   : > { %p1162_p0 = scmp.ge.s32.totalorder %s1551_s17, 1  ;;  %p302_p1 = scmp.lt.s32.totalorder %s1551_s17, 3 }
   0x8   : > { %p1253_p2 = scmp.eq.s32.totalorder %s1639_s21, 0  ;;  %s1553_s23 = smov [#allocation4]  }
   0x9   : > { %p1644_p3 = pnand %p1162_p0, %p302_p1  ;;  %s330_s24 = sshll.u32 %s1553_s23, 4  ;;  %s331_s24 = int_to_ptr.vmem [resolvable:$true] %s330_s24 }
   0xa   : > { %s354_s27 = sshll.u32 %s1796_s7, 4  ;;  %s1554_s29 = smov [#allocation7]   ;;  %s355_s27 = int_to_ptr.hbm [resolvable:$true] %s354_s27 }
   0xb   : > { %p1231_p4 = pneg %p1644_p3  ;;  %s356_s30 = sshll.u32 %s1554_s29, 4  ;;  %s357_s30 = int_to_ptr.vmem [resolvable:$true] %s356_s30 }
   0xc   : > { %s328_s20 = sshll.u32 %s1802_s5, 4  ;;  %s380_s14 = sshll.u32 %s1798_s9, 4  ;;  %s329_s20 = int_to_ptr.hbm [resolvable:$true] %s328_s20  ;;  %s381_s14 = int_to_ptr.hbm [resolvable:$true] %s380_s14 }
   0xd   : > { %p1655_p5 = pnand %p1253_p2, %p1231_p4  ;;  %s1555_s15 = smov 128  }
   0xe   : > { %s1556_s16 = smov 8   ;;  %s1557_s18 = smov [#allocation10]  }
   0xf   : > { %1237 = dma.hbm_to_vmem [thread:$0]  (!%p1655_p5), %s329_s20, 1024, %s331_s24, [#allocation5], %s1555_s15, %s1555_s15, %s1556_s16  }
  0x10   : > { %1243 = dma.hbm_to_vmem [thread:$0]  (!%p1655_p5), %s355_s27, 1024, %s357_s30, [#allocation8], %s1555_s15, %s1555_s15, %s1556_s16  }
  0x11   : > { %s382_s19 = sshll.u32 %s1557_s18, 4  ;;  %s317_s26 = sshll.u32 %s1793_s4, 4  ;;  %s383_s19 = int_to_ptr.vmem [resolvable:$true] %s382_s19  ;;  %s318_s26 = int_to_ptr.hbm [resolvable:$true] %s317_s26 }
  0x12   : > { %1249 = dma.hbm_to_vmem [thread:$0]  (!%p1655_p5), %s381_s14, 1024, %s383_s19, [#allocation11], %s1555_s15, %s1555_s15, %s1556_s16  }
  0x13   : > { %s343_s13 = sshll.u32 %s1795_s6, 4  ;;  %s1558_s5 = smov [#allocation2]   ;;  %s344_s13 = int_to_ptr.hbm [resolvable:$true] %s343_s13 }
  0x14   : > { %s319_s20 = sshll.u32 %s1558_s5, 4  ;;  %s1559_s24 = smov [#allocation6]   ;;  %s320_s20 = int_to_ptr.vmem [resolvable:$true] %s319_s20 }
  0x15   : > { %1234 = dma.hbm_to_vmem [thread:$0]  (!%p1655_p5), %s318_s26, 16, %s320_s20, [#allocation3]  }
  0x16   : > { %s345_s27 = sshll.u32 %s1559_s24, 4  ;;  %s369_s23 = sshll.u32 %s1797_s8, 4  ;;  %s346_s27 = int_to_ptr.vmem [resolvable:$true] %s345_s27  ;;  %s370_s23 = int_to_ptr.hbm [resolvable:$true] %s369_s23 }
  0x17   : > { %1240 = dma.hbm_to_vmem [thread:$0]  (!%p1655_p5), %s344_s13, 16, %s346_s27, [#allocation5]  }
  0x18   : > { %s395_s16 = sshll.u32 %s1799_s10, 4  ;;  %s1560_s5 = smov [#allocation9]   ;;  %s396_s16 = int_to_ptr.hbm [resolvable:$true] %s395_s16 }
  0x19   : > { %s371_s19 = sshll.u32 %s1560_s5, 4  ;;  %s1561_s25 = smov [#allocation12]   ;;  %s372_s19 = int_to_ptr.vmem [resolvable:$true] %s371_s19 }
  0x1a   : > { %1246 = dma.hbm_to_vmem [thread:$0]  (!%p1655_p5), %s370_s23, 16, %s372_s19, [#allocation8]  }
  0x1b   : > { %s397_s26 = sshll.u32 %s1561_s25, 4  ;;  %431 = sbr.rel (%p1644_p3) target bundleno = 1893 (0x765), region = 64  ;;  %s398_s26 = int_to_ptr.vmem [resolvable:$true] %s397_s26 }
  0x1c   : > { %1252 = dma.hbm_to_vmem [thread:$0]  (!%p1655_p5), %s396_s16, 16, %s398_s26, [#allocation11]  }
  0x20   : > { %1534 = dma.done.wait (%p1253_p2), [#allocation3], 16  }
  0x21   : > { %1536 = vsyncadd (%p1253_p2), [#allocation3], 4294967280 }
  0x22   : > { %1538 = dma.done.wait (%p1253_p2), [#allocation5], 1040  }
  0x23   : > { %1540 = vsyncadd (%p1253_p2), [#allocation5], 4294966256 }
  0x24   : > { %1542 = dma.done.wait (%p1253_p2), [#allocation8], 1040  }
  0x25   : > { %1544 = vsyncadd (%p1253_p2), [#allocation8], 4294966256 }
  0x26   : > { %1546 = dma.done.wait (%p1253_p2), [#allocation11], 1040  }
  0x27   : > { %1548 = vsyncadd (%p1253_p2), [#allocation11], 4294966256  ;;  %p508_p6 = scmp.lt.s32.totalorder %s1639_s21, 1  ;;  %vm527_vm0 = vcmask 523264   ;;  %v1562_v2 = vmov 64.0   ;;  %v586_v14 = vld [vmem:[#allocation7 + $0x38] sm:$0xff] }
  0x28   : > { %1297 = vrcp.f32 %v1562_v2  ;;  %v585_v15 = vld [vmem:[#allocation7 + $0x30] sm:$0xff]  ;;  %637 = vmatpush.msra.mxu1 %v586_v14  ;;  %v584_v16 = vld [vmem:[#allocation7 + $0x28] sm:$0xff]  ;;  %v583_v19 = vld [vmem:[#allocation7 + $0x20] sm:$0xff]  ;;  %s1563_s30 = smov 64   ;;  %vm650_vm4 = vcmask 130048   ;;  %s1564_s18 = smov 112  }
  0x29   : > { %s1806_s21 = smov (!%p508_p6, %s1639_s21), 1  ;;  %v577_v17 = vld [vmem:[#allocation4 + $0x38] sm:$0xff]  ;;  %v576_v18 = vld [vmem:[#allocation4 + $0x30] sm:$0xff]  ;;  %v575_v20 = vld [vmem:[#allocation4 + $0x28] sm:$0xff]  ;;  %s1565_s23 = smov 96   ;;  %vm678_vm6 = vcmask 64512  }
  0x2a   : > { %s1708_s22 = sshll.u32 %s1806_s21, 3  ;;  %638 = vmatpush.msra.mxu1 %v585_v15  ;;  %611 = vmatpush.msra.mxu0 %v577_v17  ;;  %v582_v21 = vld [vmem:[#allocation7 + $0x18] sm:$0xff]  ;;  %v581_v23 = vld [vmem:[#allocation7 + $0x10] sm:$0xff]  ;;  %v580_v25 = vld [vmem:[#allocation7 + $0x8] sm:$0xff]  ;;  %s1566_s14 = smov 80  }
  0x2b   : > { %s511_s12 = scalar_lea.vmem %s1789_s0, %s1708_s22  ;;  %v574_v22 = vld [vmem:[#allocation4 + $0x20] sm:$0xff]  ;;  %v573_v24 = vld [vmem:[#allocation4 + $0x18] sm:$0xff]  ;;  %s515_s20 = scalar_lea.vmem %s1790_s1, %s1708_s22  ;;  %v572_v26 = vld [vmem:[#allocation4 + $0x10] sm:$0xff] }
  0x2c   : > { %v1714_v0 = vld [vmem:[%s511_s12] sm:$0xff]  ;;  %639 = vmatpush.msra.mxu1 %v584_v16  ;;  %612 = vmatpush.msra.mxu0 %v576_v18  ;;  %v571_v28 = vld [vmem:[#allocation4 + $0x8] sm:$0xff]  ;;  %s519_s5 = scalar_lea.vmem %s1791_s2, %s1708_s22  ;;  %s1567_s19 = smov 48  }
  0x2d   : > { %v528_v1 = vsel %vm527_vm0, %v1714_v0, 0.0  ;;  %v579_v27 = vld [vmem:[#allocation7] sm:$0xff]  ;;  %v1292_v44 = vld [vmem:[%s1792_s3] ss:$0 sm:$0xff]  ;;  %v1295_v53 = vld [vmem:[#allocation6] ss:$0 sm:$0xff]  ;;  %s523_s12 = scalar_lea.vmem %s1800_s11, %s1708_s22 }
  0x2e   : > { %529 = vadd.xlane.f32.xlu0 %v528_v1  ;;  %v1298_v3 = vpop.eup %1297  ;;  %640 = vmatpush.msra.mxu1 %v583_v19  ;;  %v568_v29 = vld [vmem:[%s515_s20] sm:$0xff]  ;;  %s1568_s25 = smov 32   ;;  %s1569_s26 = smov 16  }
  0x2f   : > { %v532_v4 = vmul.f32 64.0, %v1298_v3  ;;  %vm536_vm1 = vweird.f32 %v1298_v3  ;;  %613 = vmatpush.msra.mxu0 %v575_v20  ;;  %v570_v30 = vld [vmem:[#allocation4] sm:$0xff]  ;;  %v1293_v46 = vld [vmem:[#allocation2] ss:$0 sm:$0xff]  ;;  %v589_v20 = vld [vmem:[#allocation10 + $0x8] sm:$0xff] }
  0x30   : > { %641 = vmatpush.msra.mxu1 %v582_v21  ;;  %v1294_v50 = vld [vmem:[#allocation9] ss:$0 sm:$0xff]  ;;  %v588_v21 = vld [vmem:[#allocation10] sm:$0xff] }
  0x31   : > { %v533_v5 = vsub.f32 1.0, %v532_v4  ;;  %614 = vmatpush.msra.mxu0 %v574_v22  ;;  %v1745_v60 = vld [vmem:[%s519_s5] sm:$0xff] }
  0x32   : > { %642 = vmatpush.msra.mxu1 %v581_v23  ;;  %vm649_vm5 = vcmp.ne.f32.partialorder %v1745_v60, 0.0  ;;  %v591_v23 = vld [vmem:[#allocation10 + $0x18] sm:$0xff]  ;;  %v594_v60 = vld [vmem:[#allocation10 + $0x30] sm:$0xff] }
  0x33   : > { %v534_v6 = vmul.f32 %v1298_v3, %v533_v5  ;;  %615 = vmatpush.msra.mxu0 %v573_v24 }
  0x34   : > { %643 = vmatpush.msra.mxu1 %v580_v25 }
  0x35   : > { %v535_v7 = vadd.f32 %v1298_v3, %v534_v6  ;;  %616 = vmatpush.msra.mxu0 %v572_v26 }
  0x36   : > { %644 = vmatpush.msra.mxu1 %v579_v27 }
  0x37   : > { %v537_v8 = vsel %vm536_vm1, %v1298_v3, %v535_v7  ;;  %617 = vmatpush.msra.mxu0 %v571_v28  ;;  %1184 = vmatmul.msk.f32.vlgmr.msra.gmra.mxu1 %vm527_vm0, %v568_v29 }
  0x39   : > { %618 = vmatpush.msra.mxu0 %v570_v30 }
  0xa1   : > { %v530_v9 = vpop.xlane.xlu0 %529 }
  0xa2   : > { %v538_v10 = vmul.f32 %v537_v8, %v530_v9 }
  0xa4   : > { %v539_v11 = vsub.f32 %v1714_v0, %v538_v10 }
  0xa6   : > { %v540_v12 = vmul.f32 %v539_v11, %v539_v11  ;;  %v562_v45 = vmul.f32 %v1292_v44, %v539_v11 }
  0xa8   : > { %v541_v13 = vsel %vm527_vm0, %v540_v12, 0.0 }
  0xa9   : > { %542 = vadd.xlane.f32.xlu0 %v541_v13 }
  0xb4   : > { %v646_v51 = vpop.f32.mrf.mxu1 }
  0xb5   : > { %v1729_v52 = vadd.f32 %v1294_v50, %v646_v51  ;;  %v593_v51 = vld [vmem:[#allocation10 + $0x28] sm:$0xff] }
  0xb7   : > { %690 = vrot.lane.b32.xlu2 %v1729_v52, %s1563_s30  ;;  %1185 = vmatpush.xpose.msk.msra.mxu2 %vm650_vm4, %v1729_v52 }
  0xbf   : > { %718 = vrot.lane.b32.xlu2 %v1729_v52, %s1564_s18 }
 0x111   : > { %v691_v56 = vpop.permute.xlu2 %690 }
 0x112   : > { %711 = vmatpush.msra.mxu3 %v691_v56 }
 0x119   : > { %v719_v57 = vpop.permute.xlu2 %718 }
 0x11a   : > { %1188 = vmatpush.xpose.msk.msrb.mxu3 %vm650_vm4, %v719_v57 }
 0x11c   : > { %v543_v31 = vpop.xlane.xlu0 %542 }
 0x11d   : > { %v544_v32 = vmul.f32 0.015873017, %v543_v31  ;;  %v590_v31 = vld [vmem:[#allocation10 + $0x10] sm:$0xff] }
 0x11f   : > { %1299 = vrsqrt.f32 %v544_v32  ;;  %vm552_vm2 = vcmp.eq.f32.partialorder %v544_v32, inf  ;;  %v555_v40 = vand.u32 2147483648, %v544_v32  ;;  %vm554_vm3 = vcmp.eq.f32.partialorder %v544_v32, 0.0 }
 0x125   : > { %v1300_v33 = vpop.eup %1299 }
 0x126   : > { %v546_v34 = vmul.f32 %v1300_v33, %v544_v32 }
 0x128   : > { %v547_v35 = vmul.f32 %v1300_v33, %v546_v34 }
 0x12a   : > { %v548_v36 = vmul.f32 0.5, %v547_v35 }
 0x12c   : > { %v549_v37 = vsub.f32 1.5, %v548_v36 }
 0x12e   : > { %v550_v38 = vmul.f32 %v1300_v33, %v549_v37 }
 0x130   : > { %v551_v39 = vmul.f32 %v550_v38, %v544_v32 }
 0x132   : > { %v553_v41 = vsel %vm552_vm2, %v544_v32, %v551_v39 }
 0x133   : > { %v556_v42 = vsel %vm554_vm3, %v555_v40, %v553_v41 }
 0x134   : > { %v557_v43 = vadd.f32 1e-06, %v556_v42 }
 0x136   : > { %1301 = vrcp.f32 %v557_v43 }
 0x13c   : > { %v1302_v47 = vpop.eup %1301 }
 0x13d   : > { %v563_v48 = vmul.f32 %v1302_v47, %v562_v45 }
 0x13f   : > { %v567_v49 = vadd.f32 %v1293_v46, %v563_v48 }
 0x141   : > { %1183 = vmatmul.msk.f32.vlgmr.msra.gmra.mxu0 %vm527_vm0, %v567_v49 }
 0x1be   : > { %v620_v54 = vpop.f32.mrf.mxu0 }
 0x1bf   : > { %v621_v55 = vadd.f32 %v1295_v53, %v620_v54  ;;  %v592_v53 = vld [vmem:[#allocation10 + $0x20] sm:$0xff]  ;;  %v595_v54 = vld [vmem:[#allocation10 + $0x38] sm:$0xff] }
 0x1c1   : > { %716 = vrot.lane.b32.xlu0 %v621_v55, %s1564_s18  ;;  %1186 = vmatmul.msk.f32.vlgmr.msra.gmra.mxu2 %vm650_vm4, %v621_v55 }
 0x1c9   : > { %830 = vrot.lane.b32.xlu0 %v1729_v52, %s1565_s23 }
 0x1d1   : > { %920 = vrot.lane.b32.xlu0 %v1729_v52, %s1566_s14 }
 0x1d9   : > { %918 = vrot.lane.b32.xlu0 %v621_v55, %s1566_s14 }
 0x233   : > { %v717_v58 = vpop.permute.xlu0 %716 }
 0x23b   : > { %v831_v59 = vpop.permute.xlu0 %830 }
 0x23c   : > { %1193 = vmatpush.xpose.msk.msrb.mxu0 %vm650_vm4, %v831_v59 }
 0x243   : > { %v921_v26 = vpop.permute.xlu0 %920 }
 0x244   : > { %v674_v61 = vpop.f32.mrf.mxu2 }
 0x245   : > { %v677_v62 = vsel %vm649_vm5, %v674_v61, -1e+09 }
 0x246   : > { %v679_v63 = vsel %vm678_vm6, %v677_v62, -inf }
 0x247   : > { %680 = vmax.xlane.f32.xlu1 %v679_v63 }
 0x24b   : > { %v919_v27 = vpop.permute.xlu0 %918 }
 0x2ba   : > { %v681_v1 = vpop.xlane.xlu1 %680 }
 0x2bb   : > { %v682_v2 = vsub.f32 %v677_v62, %v681_v1 }
 0x2bd   : > { %v683_v3 = vmul.f32 1.442695, %v682_v2 }
 0x2bf   : > { %1303 = vpow2.f32 %v683_v3 }
 0x2c5   : > { %v1304_v4 = vpop.eup %1303 }
 0x2c6   : > { %v685_v5 = vsel %vm678_vm6, %v1304_v4, 0.0 }
 0x2c7   : > { %686 = vadd.xlane.f32.xlu1 %v685_v5 }
 0x33a   : > { %v687_v6 = vpop.xlane.xlu1 %686 }
 0x33b   : > { %1305 = vrcp.f32 %v687_v6 }
 0x341   : > { %v1306_v7 = vpop.eup %1305 }
 0x342   : > { %v689_v8 = vmul.f32 %v1306_v7, %v1304_v4  ;;  %v1296_v4 = vld [vmem:[#allocation12] ss:$0 sm:$0xff] }
 0x344   : > { %1187 = vmatmul.msk.f32.vlgmr.msra.gmra.mxu3 %vm678_vm6, %v689_v8 }
 0x345   : > { %799 = vmatpush.msra.mxu3 %v591_v23 }
 0x347   : > { %800 = vmatpush.msra.mxu3 %v590_v31 }
 0x34c   : > { %1189 = vmatmul.msk.f32.vlgmr.msrb.gmra.mxu3 %vm650_vm4, %v717_v58 }
 0x34d   : > { %911 = vmatpush.msrb.mxu3 %v593_v51 }
 0x34f   : > { %912 = vmatpush.msrb.mxu3 %v592_v53 }
 0x3c7   : > { %v713_v9 = vpop.f32.mrf.mxu3 }
 0x3cf   : > { %v741_v10 = vpop.f32.mrf.mxu3 }
 0x3d0   : > { %v744_v11 = vsel %vm649_vm5, %v741_v10, -1e+09 }
 0x3d1   : > { %v745_v12 = vsel %vm678_vm6, %v744_v11, -inf }
 0x3d2   : > { %746 = vmax.xlane.f32.xlu1 %v745_v12 }
 0x3eb   : > { %756 = vrot.lane.b32.xlu1 %v1729_v52, %s1567_s19 }
 0x3f3   : > { %828 = vrot.lane.b32.xlu1 %v621_v55, %s1565_s23 }
 0x445   : > { %v747_v13 = vpop.xlane.xlu1 %746 }
 0x446   : > { %v748_v14 = vsub.f32 %v744_v11, %v747_v13 }
 0x448   : > { %v749_v15 = vmul.f32 1.442695, %v748_v14 }
 0x44a   : > { %1307 = vpow2.f32 %v749_v15 }
 0x450   : > { %v1308_v16 = vpop.eup %1307 }
 0x451   : > { %v751_v17 = vsel %vm678_vm6, %v1308_v16, 0.0 }
 0x452   : > { %752 = vadd.xlane.f32.xlu2 %v751_v17 }
 0x45d   : > { %v757_v18 = vpop.permute.xlu1 %756 }
 0x45e   : > { %777 = vmatpush.msrb.mxu2 %v757_v18 }
 0x460   : > { %822 = vmatpush.msra.mxu2 %v589_v20 }
 0x462   : > { %823 = vmatpush.msra.mxu2 %v588_v21 }
 0x465   : > { %v829_v19 = vpop.permute.xlu1 %828 }
 0x466   : > { %1194 = vmatmul.msk.f32.vlgmr.msrb.gmra.mxu0 %vm650_vm4, %v829_v19 }
 0x4c5   : > { %v753_v22 = vpop.xlane.xlu2 %752 }
 0x4c6   : > { %1309 = vrcp.f32 %v753_v22 }
 0x4cc   : > { %v1310_v24 = vpop.eup %1309 }
 0x4cd   : > { %v755_v25 = vmul.f32 %v1310_v24, %v1308_v16 }
 0x4cf   : > { %1190 = vmatmul.msk.f32.vlgmr.msrb.gmra.mxu2 %vm678_vm6, %v755_v25 }
 0x4d0   : > { %1197 = vmatpush.xpose.msk.msrb.mxu2 %vm650_vm4, %v921_v26 }
 0x4d7   : > { %1192 = vmatmul.msk.f32.vlgmr.msra.gmra.mxu2 %vm650_vm4, %v713_v9 }
 0x4df   : > { %1198 = vmatmul.msk.f32.vlgmr.msrb.gmra.mxu2 %vm650_vm4, %v919_v27 }
 0x4e3   : > { %v853_v28 = vpop.f32.mrf.mxu0 }
 0x4e4   : > { %v856_v29 = vsel %vm649_vm5, %v853_v28, -1e+09 }
 0x4e5   : > { %v857_v30 = vsel %vm678_vm6, %v856_v29, -inf }
 0x4e6   : > { %858 = vmax.xlane.f32.xlu1 %v857_v30 }
 0x552   : > { %v779_v32 = vpop.f32.mrf.mxu2 }
 0x553   : > { %1191 = vmatmul.msk.f32.vlgmr.msra.gmra.mxu3 %vm650_vm4, %v779_v32 }
 0x559   : > { %v859_v33 = vpop.xlane.xlu1 %858 }
 0x55a   : > { %v860_v34 = vsub.f32 %v856_v29, %v859_v33  ;;  %v825_v35 = vpop.f32.mrf.mxu2 }
 0x55c   : > { %v861_v36 = vmul.f32 1.442695, %v860_v34 }
 0x55e   : > { %1311 = vpow2.f32 %v861_v36 }
 0x562   : > { %v943_v37 = vpop.f32.mrf.mxu2 }
 0x563   : > { %v946_v38 = vsel %vm649_vm5, %v943_v37, -1e+09 }
 0x564   : > { %v1312_v39 = vpop.eup %1311  ;;  %v947_v40 = vsel %vm678_vm6, %v946_v38, -inf }
 0x565   : > { %948 = vmax.xlane.f32.xlu2 %v947_v40  ;;  %v863_v41 = vsel %vm678_vm6, %v1312_v39, 0.0 }
 0x566   : > { %864 = vadd.xlane.f32.xlu0 %v863_v41 }
 0x57d   : > { %868 = vrot.lane.b32.xlu2 %v1729_v52, %s1568_s25 }
 0x5d6   : > { %v802_v61 = vpop.f32.mrf.mxu3 }
 0x5d7   : > { %v826_v63 = vadd.f32 %v825_v35, %v802_v61 }
 0x5d8   : > { %v949_v42 = vpop.xlane.xlu2 %948 }
 0x5d9   : > { %v950_v43 = vsub.f32 %v946_v38, %v949_v42  ;;  %v865_v44 = vpop.xlane.xlu0 %864 }
 0x5da   : > { %1313 = vrcp.f32 %v865_v44 }
 0x5db   : > { %v951_v45 = vmul.f32 1.442695, %v950_v43 }
 0x5dd   : > { %1315 = vpow2.f32 %v951_v45 }
 0x5e0   : > { %v1314_v46 = vpop.eup %1313  ;;  %v869_v47 = vpop.permute.xlu2 %868 }
 0x5e1   : > { %v867_v48 = vmul.f32 %v1314_v46, %v1312_v39  ;;  %889 = vmatpush.msrb.mxu1 %v869_v47 }
 0x5e3   : > { %v1316_v49 = vpop.eup %1315  ;;  %1195 = vmatmul.msk.f32.vlgmr.msrb.gmra.mxu1 %vm678_vm6, %v867_v48 }
 0x5e4   : > { %v953_v50 = vsel %vm678_vm6, %v1316_v49, 0.0  ;;  %1001 = vmatpush.msra.mxu1 %v595_v54 }
 0x5e5   : > { %954 = vadd.xlane.f32.xlu2 %v953_v50 }
 0x5e6   : > { %1002 = vmatpush.msra.mxu1 %v594_v60 }
 0x5fd   : > { %958 = vrot.lane.b32.xlu2 %v1729_v52, %s1569_s26 }
 0x658   : > { %v955_v55 = vpop.xlane.xlu2 %954 }
 0x659   : > { %1317 = vrcp.f32 %v955_v55 }
 0x65f   : > { %v1318_v56 = vpop.eup %1317 }
 0x660   : > { %v957_v57 = vmul.f32 %v1318_v56, %v1316_v49  ;;  %v959_v58 = vpop.permute.xlu2 %958  ;;  %v891_v59 = vpop.f32.mrf.mxu1 }
 0x661   : > { %1196 = vmatmul.msk.f32.vlgmr.msrb.gmra.mxu3 %vm650_vm4, %v891_v59  ;;  %979 = vmatpush.msra.mxu0 %v959_v58 }
 0x662   : > { %1199 = vmatmul.msk.f32.vlgmr.msra.gmra.mxu0 %vm678_vm6, %v957_v57 }
 0x6df   : > { %v981_v52 = vpop.f32.mrf.mxu0 }
 0x6e0   : > { %1200 = vmatmul.msk.f32.vlgmr.msra.gmra.mxu1 %vm650_vm4, %v981_v52 }
 0x6e4   : > { %v914_v62 = vpop.f32.mrf.mxu3 }
 0x6e5   : > { %v917_v1 = vadd.f32 %v914_v62, %v826_v63 }
 0x75d   : > { %v1004_v2 = vpop.f32.mrf.mxu1 }
 0x75e   : > { %v1007_v3 = vadd.f32 %v1004_v2, %v917_v1 }
 0x760   : > { %v1008_v5 = vadd.f32 %v1007_v3, %v1714_v0 }
 0x762   : > { %v1012_v6 = vadd.f32 %v1296_v4, %v1008_v5 }
 0x764   : > { %1013 = vst.msk [vmem:[%s523_s12] sm:$0xff] %vm527_vm0, %v1012_v6 }
 0x765 PF: > { %s25_s17 = sadd.s32 1, %s1551_s17  }
 0x766   : > { %p22_p7 = scmp.ge.s32.totalorder %s25_s17, 4  }
 0x768   :  { %24 = sbr.rel (!%p22_p7) target bundleno = 6 (0x6), region = 129 }
 0x76d   :  { %1033 = vsyncpa [#allocation3], 1 }
 0x76e   :  { %1035 = vsyncpa [#allocation3 + $0x1], 1 }
 0x76f   :  { %1036 = vsyncpa [#allocation5], 1 }
 0x770   :  { %1037 = vsyncpa [#allocation8], 1 }
 0x771   :  { %1038 = vsyncpa [#allocation11], 1 }

// kernel: individual_tf_forward.21
= control target key start
LH: loop header
LB: loop body
LE: loop exit
PB: predicated region body
PF: predicated region fallthrough
CT: control target
= control target key end

     0   :  { %15 = vsyncpa [#allocation3], 0  ;;  %s1592_s0 = inlined_call_operand.vmem [shape: f32[2,8,64], index: 0, kind: input, shape index: {}]   ;;  %s1593_s1 = inlined_call_operand.vmem [shape: f32[2,8,8], index: 1, kind: input, shape index: {}]   ;;  %s1594_s2 = inlined_call_operand.vmem [shape: f32[1,64], index: 2, kind: input, shape index: {}]   ;;  %s1595_s3 = inlined_call_operand.vmem [shape: f32[1,64], index: 3, kind: input, shape index: {}]   ;;  %s1596_s4 = inlined_call_operand.vmem [shape: f32[64,64], index: 4, kind: input, shape index: {}]   ;;  %s1597_s5 = inlined_call_operand.hbm [shape: f32[1,64], index: 5, kind: input, shape index: {}]   ;;  %s1598_s6 = inlined_call_operand.hbm [shape: f32[64,128], index: 6, kind: input, shape index: {}]   ;;  %s1599_s7 = inlined_call_operand.hbm [shape: f32[1,128], index: 7, kind: input, shape index: {}]   ;;  %s1600_s8 = inlined_call_operand.hbm [shape: f32[64,64], index: 8, kind: input, shape index: {}]   ;;  %s1601_s9 = inlined_call_operand.hbm [shape: f32[1,64], index: 9, kind: input, shape index: {}]   ;;  %s1602_s10 = inlined_call_operand.vmem [shape: f32[2,8,64], index: 10, kind: output, shape index: {}]  }
   0x1   :  { %16 = vsyncpa [#allocation5], 0 }
   0x2   :  { %17 = vsyncpa [#allocation8], 0  ;;  %s1424_s13 = smov 0  }
   0x3 LB: > { %s306_s16 = sshll.u32 %s1598_s6, 4  ;;  %s1433_s17 = sadd.s32 4294967295, %s1352_s13   ;;  %s1352_s13 = sphi %s1424_s13, %s23_s13   ;;  %s307_s16 = int_to_ptr.hbm [resolvable:$true] %s306_s16 }
   0x4   : > { %p1052_p0 = scmp.ge.s32.totalorder %s1352_s13, 1  ;;  %p274_p1 = scmp.lt.s32.totalorder %s1352_s13, 3 }
   0x5   : > { %p1124_p2 = scmp.eq.s32.totalorder %s1433_s17, 0  ;;  %s1354_s19 = smov [#allocation4]  }
   0x6   : > { %p1438_p3 = pnand %p1052_p0, %p274_p1  ;;  %s308_s20 = sshll.u32 %s1354_s19, 4  ;;  %s309_s20 = int_to_ptr.vmem [resolvable:$true] %s308_s20 }
   0x7   : > { %s332_s23 = sshll.u32 %s1600_s8, 4  ;;  %s1355_s25 = smov [#allocation7]   ;;  %s333_s23 = int_to_ptr.hbm [resolvable:$true] %s332_s23 }
   0x8   : > { %p1108_p4 = pneg %p1438_p3  ;;  %s334_s26 = sshll.u32 %s1355_s25, 4  ;;  %s335_s26 = int_to_ptr.vmem [resolvable:$true] %s334_s26 }
   0x9   : > { %s295_s29 = sshll.u32 %s1597_s5, 4  ;;  %s1356_s30 = smov 128   ;;  %s296_s29 = int_to_ptr.hbm [resolvable:$true] %s295_s29 }
   0xa   : > { %p1449_p5 = pnand %p1124_p2, %p1108_p4  ;;  %s1357_s11 = smov 8  }
   0xb   : > { %s1358_s12 = smov [#allocation2]   ;;  %s321_s21 = sshll.u32 %s1599_s7, 4  ;;  %s322_s21 = int_to_ptr.hbm [resolvable:$true] %s321_s21 }
   0xc   : > { %1114 = dma.hbm_to_vmem [thread:$0]  (!%p1449_p5), %s307_s16, 1024, %s309_s20, [#allocation5], %s1356_s30, %s1356_s30, %s1357_s11  }
   0xd   : > { %1120 = dma.hbm_to_vmem [thread:$0]  (!%p1449_p5), %s333_s23, 1024, %s335_s26, [#allocation8], %s1356_s30, %s1356_s30, %s1357_s11  }
   0xe   : > { %s297_s14 = sshll.u32 %s1358_s12, 4  ;;  %s347_s27 = sshll.u32 %s1601_s9, 4  ;;  %s298_s14 = int_to_ptr.vmem [resolvable:$true] %s297_s14  ;;  %s348_s27 = int_to_ptr.hbm [resolvable:$true] %s347_s27 }
   0xf   : > { %1111 = dma.hbm_to_vmem [thread:$0]  (!%p1449_p5), %s296_s29, 16, %s298_s14, [#allocation3]  }
  0x10   : > { %s1359_s28 = smov [#allocation6]   ;;  %s1360_s20 = smov [#allocation9]  }
  0x11   : > { %s323_s16 = sshll.u32 %s1359_s28, 4  ;;  %s349_s23 = sshll.u32 %s1360_s20, 4  ;;  %s324_s16 = int_to_ptr.vmem [resolvable:$true] %s323_s16  ;;  %s350_s23 = int_to_ptr.vmem [resolvable:$true] %s349_s23 }
  0x12   : > { %1117 = dma.hbm_to_vmem [thread:$0]  (!%p1449_p5), %s322_s21, 16, %s324_s16, [#allocation5]  }
  0x13   : > { %1123 = dma.hbm_to_vmem [thread:$0]  (!%p1449_p5), %s348_s27, 16, %s350_s23, [#allocation8]  }
  0x14   : > { %376 = sbr.rel (%p1438_p3) target bundleno = 1887 (0x75f), region = 60 }
  0x19   : > { %1339 = dma.done.wait (%p1124_p2), [#allocation3], 16  }
  0x1a   : > { %1341 = vsyncadd (%p1124_p2), [#allocation3], 4294967280 }
  0x1b   : > { %1343 = dma.done.wait (%p1124_p2), [#allocation5], 1040  }
  0x1c   : > { %1345 = vsyncadd (%p1124_p2), [#allocation5], 4294966256 }
  0x1d   : > { %1347 = dma.done.wait (%p1124_p2), [#allocation8], 1040  }
  0x1e   : > { %1349 = vsyncadd (%p1124_p2), [#allocation8], 4294966256  ;;  %p437_p6 = scmp.lt.s32.totalorder %s1433_s17, 1  ;;  %vm452_vm0 = vcmask 523264   ;;  %v1361_v2 = vmov 64.0   ;;  %v501_v14 = vld [vmem:[%s1596_s4 + $0x38] sm:$0xff] }
  0x1f   : > { %1162 = vrcp.f32 %v1361_v2  ;;  %v510_v15 = vld [vmem:[#allocation4 + $0x38] sm:$0xff]  ;;  %v500_v16 = vld [vmem:[%s1596_s4 + $0x30] sm:$0xff]  ;;  %535 = vmatpush.msra.mxu0 %v501_v14  ;;  %v499_v18 = vld [vmem:[%s1596_s4 + $0x28] sm:$0xff]  ;;  %vm571_vm4 = vcmask 130048   ;;  %s1362_s11 = smov 64   ;;  %s1363_s12 = smov 112  }
  0x20   : > { %s1606_s17 = smov (!%p437_p6, %s1433_s17), 1  ;;  %558 = vmatpush.msra.mxu1 %v510_v15  ;;  %v509_v17 = vld [vmem:[#allocation4 + $0x30] sm:$0xff]  ;;  %v508_v19 = vld [vmem:[#allocation4 + $0x28] sm:$0xff]  ;;  %v498_v20 = vld [vmem:[%s1596_s4 + $0x20] sm:$0xff]  ;;  %s1364_s14 = smov 96   ;;  %vm599_vm6 = vcmask 64512  }
  0x21   : > { %s1488_s18 = sshll.u32 %s1606_s17, 3  ;;  %536 = vmatpush.msra.mxu0 %v500_v16  ;;  %v507_v21 = vld [vmem:[#allocation4 + $0x20] sm:$0xff]  ;;  %v497_v22 = vld [vmem:[%s1596_s4 + $0x18] sm:$0xff]  ;;  %v496_v24 = vld [vmem:[%s1596_s4 + $0x10] sm:$0xff]  ;;  %s1365_s15 = smov 80  }
  0x22   : > { %s440_s29 = scalar_lea.vmem %s1592_s0, %s1488_s18  ;;  %559 = vmatpush.msra.mxu1 %v509_v17  ;;  %v506_v23 = vld [vmem:[#allocation4 + $0x18] sm:$0xff]  ;;  %v505_v25 = vld [vmem:[#allocation4 + $0x10] sm:$0xff]  ;;  %v495_v26 = vld [vmem:[%s1596_s4 + $0x8] sm:$0xff]  ;;  %s444_s22 = scalar_lea.vmem %s1593_s1, %s1488_s18 }
  0x23   : > { %v1494_v0 = vld [vmem:[%s440_s29] sm:$0xff]  ;;  %537 = vmatpush.msra.mxu0 %v499_v18  ;;  %v504_v27 = vld [vmem:[#allocation4 + $0x8] sm:$0xff]  ;;  %s1366_s25 = smov 48   ;;  %s1367_s27 = smov 32  }
  0x24   : > { %v453_v1 = vsel %vm452_vm0, %v1494_v0, 0.0  ;;  %560 = vmatpush.msra.mxu1 %v508_v19  ;;  %v494_v28 = vld [vmem:[%s1596_s4] sm:$0xff]  ;;  %v513_v19 = vld [vmem:[#allocation7 + $0x8] sm:$0xff]  ;;  %s1368_s28 = smov 16   ;;  %s448_s23 = scalar_lea.vmem %s1602_s10, %s1488_s18 }
  0x25   : > { %454 = vadd.xlane.f32.xlu0 %v453_v1  ;;  %v1163_v3 = vpop.eup %1162  ;;  %538 = vmatpush.msra.mxu0 %v498_v20  ;;  %v503_v29 = vld [vmem:[#allocation4] sm:$0xff]  ;;  %v1157_v43 = vld [vmem:[%s1594_s2] ss:$0 sm:$0xff] }
  0x26   : > { %v457_v4 = vmul.f32 64.0, %v1163_v3  ;;  %vm461_vm1 = vweird.f32 %v1163_v3  ;;  %561 = vmatpush.msra.mxu1 %v507_v21  ;;  %v1158_v45 = vld [vmem:[%s1595_s3] ss:$0 sm:$0xff]  ;;  %v1160_v50 = vld [vmem:[#allocation6] ss:$0 sm:$0xff]  ;;  %v512_v20 = vld [vmem:[#allocation7] sm:$0xff] }
  0x27   : > { %539 = vmatpush.msra.mxu0 %v497_v22  ;;  %v1159_v49 = vld [vmem:[#allocation2] ss:$0 sm:$0xff] }
  0x28   : > { %v458_v5 = vsub.f32 1.0, %v457_v4  ;;  %562 = vmatpush.msra.mxu1 %v506_v23  ;;  %v1548_v59 = vld [vmem:[%s444_s22] sm:$0xff] }
  0x29   : > { %540 = vmatpush.msra.mxu0 %v496_v24  ;;  %vm570_vm5 = vcmp.ne.f32.partialorder %v1548_v59, 0.0  ;;  %v515_v22 = vld [vmem:[#allocation7 + $0x18] sm:$0xff]  ;;  %v518_v59 = vld [vmem:[#allocation7 + $0x30] sm:$0xff] }
  0x2a   : > { %v459_v6 = vmul.f32 %v1163_v3, %v458_v5  ;;  %563 = vmatpush.msra.mxu1 %v505_v25 }
  0x2b   : > { %541 = vmatpush.msra.mxu0 %v495_v26 }
  0x2c   : > { %v460_v7 = vadd.f32 %v1163_v3, %v459_v6  ;;  %564 = vmatpush.msra.mxu1 %v504_v27 }
  0x2d   : > { %542 = vmatpush.msra.mxu0 %v494_v28 }
  0x2e   : > { %v462_v8 = vsel %vm461_vm1, %v1163_v3, %v460_v7  ;;  %565 = vmatpush.msra.mxu1 %v503_v29 }
  0x98   : > { %v455_v9 = vpop.xlane.xlu0 %454 }
  0x99   : > { %v463_v10 = vmul.f32 %v462_v8, %v455_v9 }
  0x9b   : > { %v464_v11 = vsub.f32 %v1494_v0, %v463_v10 }
  0x9d   : > { %v465_v12 = vmul.f32 %v464_v11, %v464_v11  ;;  %v487_v44 = vmul.f32 %v1157_v43, %v464_v11 }
  0x9f   : > { %v466_v13 = vsel %vm452_vm0, %v465_v12, 0.0 }
  0xa0   : > { %467 = vadd.xlane.f32.xlu0 %v466_v13 }
 0x113   : > { %v468_v30 = vpop.xlane.xlu0 %467 }
 0x114   : > { %v469_v31 = vmul.f32 0.015873017, %v468_v30  ;;  %v514_v30 = vld [vmem:[#allocation7 + $0x10] sm:$0xff] }
 0x116   : > { %1164 = vrsqrt.f32 %v469_v31  ;;  %vm477_vm2 = vcmp.eq.f32.partialorder %v469_v31, inf  ;;  %v480_v39 = vand.u32 2147483648, %v469_v31  ;;  %vm479_vm3 = vcmp.eq.f32.partialorder %v469_v31, 0.0 }
 0x11c   : > { %v1165_v32 = vpop.eup %1164 }
 0x11d   : > { %v471_v33 = vmul.f32 %v1165_v32, %v469_v31 }
 0x11f   : > { %v472_v34 = vmul.f32 %v1165_v32, %v471_v33 }
 0x121   : > { %v473_v35 = vmul.f32 0.5, %v472_v34 }
 0x123   : > { %v474_v36 = vsub.f32 1.5, %v473_v35 }
 0x125   : > { %v475_v37 = vmul.f32 %v1165_v32, %v474_v36 }
 0x127   : > { %v476_v38 = vmul.f32 %v475_v37, %v469_v31 }
 0x129   : > { %v478_v40 = vsel %vm477_vm2, %v469_v31, %v476_v38 }
 0x12a   : > { %v481_v41 = vsel %vm479_vm3, %v480_v39, %v478_v40 }
 0x12b   : > { %v482_v42 = vadd.f32 1e-06, %v481_v41 }
 0x12d   : > { %1166 = vrcp.f32 %v482_v42 }
 0x133   : > { %v1167_v46 = vpop.eup %1166 }
 0x134   : > { %v488_v47 = vmul.f32 %v1167_v46, %v487_v44 }
 0x136   : > { %v492_v48 = vadd.f32 %v1158_v45, %v488_v47 }
 0x138   : > { %1068 = vmatmul.msk.f32.vlgmr.msra.gmra.mxu0 %vm452_vm0, %v492_v48  ;;  %1069 = vmatmul.msk.f32.vlgmr.msra.gmra.mxu1 %vm452_vm0, %v492_v48 }
 0x1b5   : > { %v544_v51 = vpop.f32.mrf.mxu0  ;;  %v567_v52 = vpop.f32.mrf.mxu1 }
 0x1b6   : > { %v545_v53 = vadd.f32 %v1159_v49, %v544_v51  ;;  %v1532_v54 = vadd.f32 %v1160_v50, %v567_v52  ;;  %v517_v50 = vld [vmem:[#allocation7 + $0x28] sm:$0xff]  ;;  %v516_v51 = vld [vmem:[#allocation7 + $0x20] sm:$0xff]  ;;  %v519_v52 = vld [vmem:[#allocation7 + $0x38] sm:$0xff] }
 0x1b8   : > { %611 = vrot.lane.b32.xlu2 %v1532_v54, %s1362_s11  ;;  %1070 = vmatpush.xpose.msk.msra.mxu2 %vm571_vm4, %v1532_v54 }
 0x1b9   : > { %637 = vrot.lane.b32.xlu0 %v545_v53, %s1363_s12 }
 0x1bb   : > { %1071 = vmatmul.msk.f32.vlgmr.msra.gmra.mxu2 %vm571_vm4, %v545_v53 }
 0x1c0   : > { %639 = vrot.lane.b32.xlu2 %v1532_v54, %s1363_s12 }
 0x1c1   : > { %751 = vrot.lane.b32.xlu0 %v1532_v54, %s1364_s14 }
 0x1c9   : > { %841 = vrot.lane.b32.xlu0 %v1532_v54, %s1365_s15 }
 0x1d1   : > { %839 = vrot.lane.b32.xlu0 %v545_v53, %s1365_s15 }
 0x212   : > { %v612_v55 = vpop.permute.xlu2 %611 }
 0x213   : > { %632 = vmatpush.msra.mxu3 %v612_v55 }
 0x21a   : > { %v640_v56 = vpop.permute.xlu2 %639 }
 0x21b   : > { %1073 = vmatpush.xpose.msk.msrb.mxu3 %vm571_vm4, %v640_v56 }
 0x22b   : > { %v638_v57 = vpop.permute.xlu0 %637 }
 0x233   : > { %v752_v58 = vpop.permute.xlu0 %751 }
 0x234   : > { %1078 = vmatpush.xpose.msk.msrb.mxu0 %vm571_vm4, %v752_v58 }
 0x23b   : > { %v842_v25 = vpop.permute.xlu0 %841 }
 0x23e   : > { %v595_v60 = vpop.f32.mrf.mxu2 }
 0x23f   : > { %v598_v61 = vsel %vm570_vm5, %v595_v60, -1e+09 }
 0x240   : > { %v600_v62 = vsel %vm599_vm6, %v598_v61, -inf }
 0x241   : > { %601 = vmax.xlane.f32.xlu1 %v600_v62 }
 0x243   : > { %v840_v26 = vpop.permute.xlu0 %839 }
 0x2b4   : > { %v602_v63 = vpop.xlane.xlu1 %601 }
 0x2b5   : > { %v603_v1 = vsub.f32 %v598_v61, %v602_v63 }
 0x2b7   : > { %v604_v2 = vmul.f32 1.442695, %v603_v1 }
 0x2b9   : > { %1168 = vpow2.f32 %v604_v2 }
 0x2bf   : > { %v1169_v3 = vpop.eup %1168 }
 0x2c0   : > { %v606_v4 = vsel %vm599_vm6, %v1169_v3, 0.0 }
 0x2c1   : > { %607 = vadd.xlane.f32.xlu1 %v606_v4 }
 0x334   : > { %v608_v5 = vpop.xlane.xlu1 %607 }
 0x335   : > { %1170 = vrcp.f32 %v608_v5 }
 0x33b   : > { %v1171_v6 = vpop.eup %1170 }
 0x33c   : > { %v610_v7 = vmul.f32 %v1171_v6, %v1169_v3  ;;  %v1161_v3 = vld [vmem:[#allocation9] ss:$0 sm:$0xff] }
 0x33e   : > { %1072 = vmatmul.msk.f32.vlgmr.msra.gmra.mxu3 %vm599_vm6, %v610_v7 }
 0x33f   : > { %720 = vmatpush.msra.mxu3 %v515_v22 }
 0x341   : > { %721 = vmatpush.msra.mxu3 %v514_v30 }
 0x346   : > { %1074 = vmatmul.msk.f32.vlgmr.msrb.gmra.mxu3 %vm571_vm4, %v638_v57 }
 0x347   : > { %832 = vmatpush.msrb.mxu3 %v517_v50 }
 0x349   : > { %833 = vmatpush.msrb.mxu3 %v516_v51 }
 0x3c1   : > { %v634_v8 = vpop.f32.mrf.mxu3 }
 0x3c9   : > { %v662_v9 = vpop.f32.mrf.mxu3 }
 0x3ca   : > { %v665_v10 = vsel %vm570_vm5, %v662_v9, -1e+09 }
 0x3cb   : > { %v666_v11 = vsel %vm599_vm6, %v665_v10, -inf }
 0x3cc   : > { %667 = vmax.xlane.f32.xlu1 %v666_v11 }
 0x3e5   : > { %677 = vrot.lane.b32.xlu1 %v1532_v54, %s1366_s25 }
 0x3ed   : > { %749 = vrot.lane.b32.xlu1 %v545_v53, %s1364_s14 }
 0x43f   : > { %v668_v12 = vpop.xlane.xlu1 %667 }
 0x440   : > { %v669_v13 = vsub.f32 %v665_v10, %v668_v12 }
 0x442   : > { %v670_v14 = vmul.f32 1.442695, %v669_v13 }
 0x444   : > { %1172 = vpow2.f32 %v670_v14 }
 0x44a   : > { %v1173_v15 = vpop.eup %1172 }
 0x44b   : > { %v672_v16 = vsel %vm599_vm6, %v1173_v15, 0.0 }
 0x44c   : > { %673 = vadd.xlane.f32.xlu2 %v672_v16 }
 0x457   : > { %v678_v17 = vpop.permute.xlu1 %677 }
 0x458   : > { %698 = vmatpush.msrb.mxu2 %v678_v17 }
 0x45a   : > { %743 = vmatpush.msra.mxu2 %v513_v19 }
 0x45c   : > { %744 = vmatpush.msra.mxu2 %v512_v20 }
 0x45f   : > { %v750_v18 = vpop.permute.xlu1 %749 }
 0x460   : > { %1079 = vmatmul.msk.f32.vlgmr.msrb.gmra.mxu0 %vm571_vm4, %v750_v18 }
 0x4bf   : > { %v674_v21 = vpop.xlane.xlu2 %673 }
 0x4c0   : > { %1174 = vrcp.f32 %v674_v21 }
 0x4c6   : > { %v1175_v23 = vpop.eup %1174 }
 0x4c7   : > { %v676_v24 = vmul.f32 %v1175_v23, %v1173_v15 }
 0x4c9   : > { %1075 = vmatmul.msk.f32.vlgmr.msrb.gmra.mxu2 %vm599_vm6, %v676_v24 }
 0x4ca   : > { %1082 = vmatpush.xpose.msk.msrb.mxu2 %vm571_vm4, %v842_v25 }
 0x4d1   : > { %1077 = vmatmul.msk.f32.vlgmr.msra.gmra.mxu2 %vm571_vm4, %v634_v8 }
 0x4d9   : > { %1083 = vmatmul.msk.f32.vlgmr.msrb.gmra.mxu2 %vm571_vm4, %v840_v26 }
 0x4dd   : > { %v774_v27 = vpop.f32.mrf.mxu0 }
 0x4de   : > { %v777_v28 = vsel %vm570_vm5, %v774_v27, -1e+09 }
 0x4df   : > { %v778_v29 = vsel %vm599_vm6, %v777_v28, -inf }
 0x4e0   : > { %779 = vmax.xlane.f32.xlu1 %v778_v29 }
 0x54c   : > { %v700_v31 = vpop.f32.mrf.mxu2 }
 0x54d   : > { %1076 = vmatmul.msk.f32.vlgmr.msra.gmra.mxu3 %vm571_vm4, %v700_v31 }
 0x553   : > { %v780_v32 = vpop.xlane.xlu1 %779 }
 0x554   : > { %v781_v33 = vsub.f32 %v777_v28, %v780_v32  ;;  %v746_v34 = vpop.f32.mrf.mxu2 }
 0x556   : > { %v782_v35 = vmul.f32 1.442695, %v781_v33 }
 0x558   : > { %1176 = vpow2.f32 %v782_v35 }
 0x55c   : > { %v864_v36 = vpop.f32.mrf.mxu2 }
 0x55d   : > { %v867_v37 = vsel %vm570_vm5, %v864_v36, -1e+09 }
 0x55e   : > { %v1177_v38 = vpop.eup %1176  ;;  %v868_v39 = vsel %vm599_vm6, %v867_v37, -inf }
 0x55f   : > { %869 = vmax.xlane.f32.xlu2 %v868_v39  ;;  %v784_v40 = vsel %vm599_vm6, %v1177_v38, 0.0 }
 0x560   : > { %785 = vadd.xlane.f32.xlu0 %v784_v40 }
 0x577   : > { %789 = vrot.lane.b32.xlu2 %v1532_v54, %s1367_s27 }
 0x5d0   : > { %v723_v60 = vpop.f32.mrf.mxu3 }
 0x5d1   : > { %v747_v62 = vadd.f32 %v746_v34, %v723_v60 }
 0x5d2   : > { %v870_v41 = vpop.xlane.xlu2 %869 }
 0x5d3   : > { %v871_v42 = vsub.f32 %v867_v37, %v870_v41  ;;  %v786_v43 = vpop.xlane.xlu0 %785 }
 0x5d4   : > { %1178 = vrcp.f32 %v786_v43 }
 0x5d5   : > { %v872_v44 = vmul.f32 1.442695, %v871_v42 }
 0x5d7   : > { %1180 = vpow2.f32 %v872_v44 }
 0x5da   : > { %v1179_v45 = vpop.eup %1178  ;;  %v790_v46 = vpop.permute.xlu2 %789 }
 0x5db   : > { %v788_v47 = vmul.f32 %v1179_v45, %v1177_v38  ;;  %810 = vmatpush.msrb.mxu1 %v790_v46 }
 0x5dd   : > { %v1181_v48 = vpop.eup %1180  ;;  %1080 = vmatmul.msk.f32.vlgmr.msrb.gmra.mxu1 %vm599_vm6, %v788_v47 }
 0x5de   : > { %v874_v49 = vsel %vm599_vm6, %v1181_v48, 0.0  ;;  %922 = vmatpush.msra.mxu1 %v519_v52 }
 0x5df   : > { %875 = vadd.xlane.f32.xlu2 %v874_v49 }
 0x5e0   : > { %923 = vmatpush.msra.mxu1 %v518_v59 }
 0x5f7   : > { %879 = vrot.lane.b32.xlu2 %v1532_v54, %s1368_s28 }
 0x652   : > { %v876_v53 = vpop.xlane.xlu2 %875 }
 0x653   : > { %1182 = vrcp.f32 %v876_v53 }
 0x659   : > { %v1183_v55 = vpop.eup %1182 }
 0x65a   : > { %v878_v56 = vmul.f32 %v1183_v55, %v1181_v48  ;;  %v880_v57 = vpop.permute.xlu2 %879  ;;  %v812_v58 = vpop.f32.mrf.mxu1 }
 0x65b   : > { %1081 = vmatmul.msk.f32.vlgmr.msrb.gmra.mxu3 %vm571_vm4, %v812_v58  ;;  %900 = vmatpush.msra.mxu0 %v880_v57 }
 0x65c   : > { %1084 = vmatmul.msk.f32.vlgmr.msra.gmra.mxu0 %vm599_vm6, %v878_v56 }
 0x6d9   : > { %v902_v54 = vpop.f32.mrf.mxu0 }
 0x6da   : > { %1085 = vmatmul.msk.f32.vlgmr.msra.gmra.mxu1 %vm571_vm4, %v902_v54 }
 0x6de   : > { %v835_v61 = vpop.f32.mrf.mxu3 }
 0x6df   : > { %v838_v63 = vadd.f32 %v835_v61, %v747_v62 }
 0x757   : > { %v925_v1 = vpop.f32.mrf.mxu1 }
 0x758   : > { %v928_v2 = vadd.f32 %v925_v1, %v838_v63 }
 0x75a   : > { %v929_v4 = vadd.f32 %v928_v2, %v1494_v0 }
 0x75c   : > { %v933_v5 = vadd.f32 %v1161_v3, %v929_v4 }
 0x75e   : > { %934 = vst.msk [vmem:[%s448_s23] sm:$0xff] %vm452_vm0, %v933_v5 }
 0x75f PF: > { %s23_s13 = sadd.s32 1, %s1352_s13  }
 0x760   : > { %p20_p7 = scmp.ge.s32.totalorder %s23_s13, 4  }
 0x762   :  { %22 = sbr.rel (!%p20_p7) target bundleno = 3 (0x3), region = 114 }
 0x767   :  { %954 = vsyncpa [#allocation3], 1 }
 0x768   :  { %956 = vsyncpa [#allocation3 + $0x1], 1 }
 0x769   :  { %957 = vsyncpa [#allocation5], 1 }
 0x76a   :  { %958 = vsyncpa [#allocation8], 1 }

// kernel: individual_tf_forward.23
= control target key start
LH: loop header
LB: loop body
LE: loop exit
PB: predicated region body
PF: predicated region fallthrough
CT: control target
= control target key end

     0   :  { %12 = vsyncpa [#allocation3], 0  ;;  %s974_s0 = inlined_call_operand.vmem [shape: f32[2,8,64], index: 0, kind: input, shape index: {}]   ;;  %s975_s1 = inlined_call_operand.hbm [shape: f32[1,64], index: 1, kind: input, shape index: {}]   ;;  %s976_s2 = inlined_call_operand.hbm [shape: f32[1,64], index: 2, kind: input, shape index: {}]   ;;  %s977_s3 = inlined_call_operand.vmem [shape: f32[64,128], index: 3, kind: input, shape index: {}]   ;;  %s978_s4 = inlined_call_operand.hbm [shape: f32[1,128], index: 4, kind: input, shape index: {}]   ;;  %s979_s5 = inlined_call_operand.vmem [shape: f32[128,64], index: 5, kind: input, shape index: {}]   ;;  %s980_s6 = inlined_call_operand.hbm [shape: f32[1,64], index: 6, kind: input, shape index: {}]   ;;  %s981_s7 = inlined_call_operand.vmem [shape: f32[2,8,64], index: 7, kind: output, shape index: {}]  }
   0x1   :  { %13 = vsyncpa [#allocation5], 0 }
   0x2   :  { %14 = vsyncpa [#allocation8], 0  ;;  %s813_s24 = smov 0  }
   0x3 LB: > { %s227_s27 = sshll.u32 %s976_s2, 4  ;;  %s822_s28 = sadd.s32 4294967295, %s766_s24   ;;  %s766_s24 = sphi %s813_s24, %s20_s24   ;;  %s228_s27 = int_to_ptr.hbm [resolvable:$true] %s227_s27 }
   0x4   : > { %p552_p0 = scmp.ge.s32.totalorder %s766_s24, 1  ;;  %p203_p1 = scmp.lt.s32.totalorder %s766_s24, 3 }
   0x5   : > { %p597_p2 = scmp.eq.s32.totalorder %s822_s28, 0  ;;  %s768_s30 = smov [#allocation4]  }
   0x6   : > { %p827_p3 = pnand %p552_p0, %p203_p1  ;;  %s229_s8 = sshll.u32 %s768_s30, 4  ;;  %s230_s8 = int_to_ptr.vmem [resolvable:$true] %s229_s8 }
   0x7   : > { %s215_s11 = sshll.u32 %s975_s1, 4  ;;  %s242_s14 = sshll.u32 %s978_s4, 4  ;;  %s216_s11 = int_to_ptr.hbm [resolvable:$true] %s215_s11  ;;  %s243_s14 = int_to_ptr.hbm [resolvable:$true] %s242_s14 }
   0x8   : > { %p584_p4 = pneg %p827_p3  ;;  %s769_s16 = smov [#allocation2]  }
   0x9   : > { %s217_s17 = sshll.u32 %s769_s16, 4  ;;  %s770_s18 = smov [#allocation6]   ;;  %s218_s17 = int_to_ptr.vmem [resolvable:$true] %s217_s17 }
   0xa   : > { %p841_p5 = pnand %p597_p2, %p584_p4  ;;  %s244_s19 = sshll.u32 %s770_s18, 4  ;;  %s245_s19 = int_to_ptr.vmem [resolvable:$true] %s244_s19 }
   0xb   : > { %s257_s22 = sshll.u32 %s980_s6, 4  ;;  %s771_s23 = smov [#allocation7]   ;;  %s258_s22 = int_to_ptr.hbm [resolvable:$true] %s257_s22 }
   0xc   : > { %590 = dma.hbm_to_vmem [thread:$0]  (!%p841_p5), %s228_s27, 16, %s230_s8, [#allocation5]  }
   0xd   : > { %587 = dma.hbm_to_vmem [thread:$0]  (!%p841_p5), %s216_s11, 16, %s218_s17, [#allocation3]  }
   0xe   : > { %593 = dma.hbm_to_vmem [thread:$0]  (!%p841_p5), %s243_s14, 16, %s245_s19, [#allocation5]  }
   0xf   : > { %s259_s25 = sshll.u32 %s771_s23, 4  ;;  %279 = sbr.rel (%p827_p3) target bundleno = 568 (0x238), region = 48  ;;  %s260_s25 = int_to_ptr.vmem [resolvable:$true] %s259_s25 }
  0x10   : > { %596 = dma.hbm_to_vmem [thread:$0]  (!%p841_p5), %s258_s22, 16, %s260_s25, [#allocation8]  }
  0x14   : > { %753 = dma.done.wait (%p597_p2), [#allocation3], 16  }
  0x15   : > { %755 = vsyncadd (%p597_p2), [#allocation3], 4294967280 }
  0x16   : > { %757 = dma.done.wait (%p597_p2), [#allocation5], 32  }
  0x17   : > { %759 = vsyncadd (%p597_p2), [#allocation5], 4294967264 }
  0x18   : > { %761 = dma.done.wait (%p597_p2), [#allocation8], 16  }
  0x19   : > { %763 = vsyncadd (%p597_p2), [#allocation8], 4294967280  ;;  %p325_p6 = scmp.lt.s32.totalorder %s822_s28, 1  ;;  %vm336_vm0 = vcmask 523264   ;;  %v772_v2 = vmov 64.0   ;;  %v384_v14 = vld [vmem:[%s977_s3 + $0x38] sm:$0xff] }
  0x1a   : > { %622 = vrcp.f32 %v772_v2  ;;  %v383_v15 = vld [vmem:[%s977_s3 + $0x30] sm:$0xff]  ;;  %400 = vmatpush.msra.mxu0 %v384_v14  ;;  %v382_v16 = vld [vmem:[%s977_s3 + $0x28] sm:$0xff]  ;;  %v381_v17 = vld [vmem:[%s977_s3 + $0x20] sm:$0xff] }
  0x1b   : > { %s985_s28 = smov (!%p325_p6, %s822_s28), 1  ;;  %v380_v18 = vld [vmem:[%s977_s3 + $0x18] sm:$0xff]  ;;  %v379_v19 = vld [vmem:[%s977_s3 + $0x10] sm:$0xff]  ;;  %v378_v20 = vld [vmem:[%s977_s3 + $0x8] sm:$0xff] }
  0x1c   : > { %s563_s26 = sshll.u32 %s985_s28, 3  ;;  %401 = vmatpush.msra.mxu0 %v383_v15  ;;  %v377_v21 = vld [vmem:[%s977_s3] sm:$0xff]  ;;  %v428_v24 = vld [vmem:[%s979_s5 + $0x78] sm:$0xff]  ;;  %v427_v25 = vld [vmem:[%s979_s5 + $0x70] sm:$0xff] }
  0x1d   : > { %s328_s30 = scalar_lea.vmem %s974_s0, %s563_s26  ;;  %429 = vmatpush.msra.mxu1 %v428_v24  ;;  %v426_v26 = vld [vmem:[%s979_s5 + $0x68] sm:$0xff]  ;;  %v425_v28 = vld [vmem:[%s979_s5 + $0x60] sm:$0xff]  ;;  %v424_v30 = vld [vmem:[%s979_s5 + $0x58] sm:$0xff]  ;;  %s332_s18 = scalar_lea.vmem %s981_s7, %s563_s26 }
  0x1e   : > { %v880_v0 = vld [vmem:[%s328_s30] sm:$0xff]  ;;  %402 = vmatpush.msra.mxu0 %v382_v16  ;;  %v423_v32 = vld [vmem:[%s979_s5 + $0x50] sm:$0xff]  ;;  %v422_v34 = vld [vmem:[%s979_s5 + $0x48] sm:$0xff] }
  0x1f   : > { %v337_v1 = vsel %vm336_vm0, %v880_v0, 0.0  ;;  %430 = vmatpush.msra.mxu1 %v427_v25  ;;  %v421_v36 = vld [vmem:[%s979_s5 + $0x40] sm:$0xff]  ;;  %v420_v38 = vld [vmem:[%s979_s5 + $0x38] sm:$0xff]  ;;  %v419_v41 = vld [vmem:[%s979_s5 + $0x30] sm:$0xff] }
  0x20   : > { %338 = vadd.xlane.f32.xlu0 %v337_v1  ;;  %v623_v3 = vpop.eup %622  ;;  %403 = vmatpush.msra.mxu0 %v381_v17  ;;  %v418_v44 = vld [vmem:[%s979_s5 + $0x28] sm:$0xff]  ;;  %v417_v46 = vld [vmem:[%s979_s5 + $0x20] sm:$0xff]  ;;  %v416_v48 = vld [vmem:[%s979_s5 + $0x18] sm:$0xff] }
  0x21   : > { %v341_v4 = vmul.f32 64.0, %v623_v3  ;;  %vm345_vm1 = vweird.f32 %v623_v3  ;;  %431 = vmatpush.msra.mxu1 %v426_v26  ;;  %v618_v47 = vld [vmem:[#allocation2] ss:$0 sm:$0xff]  ;;  %v619_v50 = vld [vmem:[#allocation4] ss:$0 sm:$0xff]  ;;  %v415_v54 = vld [vmem:[%s979_s5 + $0x10] sm:$0xff] }
  0x22   : > { %404 = vmatpush.msra.mxu0 %v380_v18  ;;  %v414_v55 = vld [vmem:[%s979_s5 + $0x8] sm:$0xff]  ;;  %v413_v56 = vld [vmem:[%s979_s5] sm:$0xff] }
  0x23   : > { %v342_v5 = vsub.f32 1.0, %v341_v4  ;;  %432 = vmatpush.msra.mxu1 %v425_v28  ;;  %v620_v57 = vld [vmem:[#allocation6] ss:$0 sm:$0xff]  ;;  %v621_v61 = vld [vmem:[#allocation7] ss:$0 sm:$0xff] }
  0x24   : > { %405 = vmatpush.msra.mxu0 %v379_v19 }
  0x25   : > { %v343_v6 = vmul.f32 %v623_v3, %v342_v5  ;;  %433 = vmatpush.msra.mxu1 %v424_v30 }
  0x26   : > { %406 = vmatpush.msra.mxu0 %v378_v20 }
  0x27   : > { %v344_v7 = vadd.f32 %v623_v3, %v343_v6  ;;  %434 = vmatpush.msra.mxu1 %v423_v32 }
  0x28   : > { %407 = vmatpush.msra.mxu0 %v377_v21 }
  0x29   : > { %v346_v8 = vsel %vm345_vm1, %v623_v3, %v344_v7  ;;  %435 = vmatpush.msra.mxu1 %v422_v34 }
  0x2b   : > { %436 = vmatpush.msra.mxu1 %v421_v36 }
  0x2d   : > { %437 = vmatpush.msra.mxu1 %v420_v38 }
  0x2f   : > { %438 = vmatpush.msra.mxu1 %v419_v41 }
  0x31   : > { %439 = vmatpush.msra.mxu1 %v418_v44 }
  0x33   : > { %440 = vmatpush.msra.mxu1 %v417_v46 }
  0x35   : > { %441 = vmatpush.msra.mxu1 %v416_v48 }
  0x37   : > { %442 = vmatpush.msra.mxu1 %v415_v54 }
  0x39   : > { %443 = vmatpush.msra.mxu1 %v414_v55 }
  0x3b   : > { %444 = vmatpush.msra.mxu1 %v413_v56 }
  0x93   : > { %v339_v9 = vpop.xlane.xlu0 %338 }
  0x94   : > { %v347_v10 = vmul.f32 %v346_v8, %v339_v9 }
  0x96   : > { %v885_v11 = vsub.f32 %v880_v0, %v347_v10 }
  0x98   : > { %v349_v12 = vmul.f32 %v885_v11, %v885_v11  ;;  %v371_v49 = vmul.f32 %v618_v47, %v885_v11 }
  0x9a   : > { %v350_v13 = vsel %vm336_vm0, %v349_v12, 0.0 }
  0x9b   : > { %351 = vadd.xlane.f32.xlu0 %v350_v13 }
 0x10e   : > { %v352_v22 = vpop.xlane.xlu0 %351 }
 0x10f   : > { %v353_v23 = vmul.f32 0.015873017, %v352_v22 }
 0x111   : > { %624 = vrsqrt.f32 %v353_v23  ;;  %vm361_vm2 = vcmp.eq.f32.partialorder %v353_v23, inf  ;;  %v364_v40 = vand.u32 2147483648, %v353_v23  ;;  %vm363_vm3 = vcmp.eq.f32.partialorder %v353_v23, 0.0 }
 0x117   : > { %v625_v27 = vpop.eup %624 }
 0x118   : > { %v355_v29 = vmul.f32 %v625_v27, %v353_v23 }
 0x11a   : > { %v356_v31 = vmul.f32 %v625_v27, %v355_v29 }
 0x11c   : > { %v357_v33 = vmul.f32 0.5, %v356_v31 }
 0x11e   : > { %v358_v35 = vsub.f32 1.5, %v357_v33 }
 0x120   : > { %v359_v37 = vmul.f32 %v625_v27, %v358_v35 }
 0x122   : > { %v360_v39 = vmul.f32 %v359_v37, %v353_v23 }
 0x124   : > { %v362_v42 = vsel %vm361_vm2, %v353_v23, %v360_v39 }
 0x125   : > { %v365_v43 = vsel %vm363_vm3, %v364_v40, %v362_v42 }
 0x126   : > { %v366_v45 = vadd.f32 1e-06, %v365_v43 }
 0x128   : > { %626 = vrcp.f32 %v366_v45 }
 0x12e   : > { %v627_v51 = vpop.eup %626 }
 0x12f   : > { %v372_v52 = vmul.f32 %v627_v51, %v371_v49 }
 0x131   : > { %v376_v53 = vadd.f32 %v619_v50, %v372_v52 }
 0x133   : > { %565 = vmatmul.msk.f32.vlgmr.msra.gmra.mxu0 %vm336_vm0, %v376_v53 }
 0x1b0   : > { %v409_v58 = vpop.f32.mrf.mxu0 }
 0x1b1   : > { %v410_v59 = vadd.f32 %v620_v57, %v409_v58 }
 0x1b3   : > { %v412_v60 = vmax.f32 %v410_v59, 0.0 }
 0x1b5   : > { %445 = vmatmul.f32.vlgmr.msra.gmra.mxu1 %v412_v60 }
 0x232   : > { %v446_v62 = vpop.f32.mrf.mxu1 }
 0x233   : > { %v449_v63 = vadd.f32 %v446_v62, %v880_v0 }
 0x235   : > { %v454_v1 = vadd.f32 %v621_v61, %v449_v63 }
 0x237   : > { %455 = vst.msk [vmem:[%s332_s18] sm:$0xff] %vm336_vm0, %v454_v1 }
 0x238 PF: > { %s20_s24 = sadd.s32 1, %s766_s24  }
 0x239   : > { %p17_p7 = scmp.ge.s32.totalorder %s20_s24, 4  }
 0x23b   :  { %19 = sbr.rel (!%p17_p7) target bundleno = 3 (0x3), region = 95 }
 0x240   :  { %475 = vsyncpa [#allocation3], 1 }
 0x241   :  { %477 = vsyncpa [#allocation3 + $0x1], 1 }
 0x242   :  { %478 = vsyncpa [#allocation5], 1 }
 0x243   :  { %479 = vsyncpa [#allocation8], 1 }

// kernel: individual_tf_forward.24
= control target key start
LH: loop header
LB: loop body
LE: loop exit
PB: predicated region body
PF: predicated region fallthrough
CT: control target
= control target key end

     0   :  { %15 = vsyncpa [#allocation3], 0  ;;  %s1738_s0 = inlined_call_operand.vmem [shape: f32[2,8,64], index: 0, kind: input, shape index: {}]   ;;  %s1739_s1 = inlined_call_operand.vmem [shape: f32[2,8,8], index: 1, kind: input, shape index: {}]   ;;  %s1740_s2 = inlined_call_operand.hbm [shape: f32[1,64], index: 2, kind: input, shape index: {}]   ;;  %s1741_s3 = inlined_call_operand.hbm [shape: f32[1,64], index: 3, kind: input, shape index: {}]   ;;  %s1742_s4 = inlined_call_operand.vmem [shape: f32[64,64], index: 4, kind: input, shape index: {}]   ;;  %s1743_s5 = inlined_call_operand.hbm [shape: f32[1,64], index: 5, kind: input, shape index: {}]   ;;  %s1744_s6 = inlined_call_operand.hbm [shape: f32[64,128], index: 6, kind: input, shape index: {}]   ;;  %s1745_s7 = inlined_call_operand.hbm [shape: f32[1,128], index: 7, kind: input, shape index: {}]   ;;  %s1746_s8 = inlined_call_operand.hbm [shape: f32[64,64], index: 8, kind: input, shape index: {}]   ;;  %s1747_s9 = inlined_call_operand.hbm [shape: f32[1,64], index: 9, kind: input, shape index: {}]   ;;  %s1748_s10 = inlined_call_operand.vmem [shape: f32[2,8,64], index: 10, kind: output, shape index: {}]  }
   0x1   :  { %16 = vsyncpa [#allocation5], 0 }
   0x2   :  { %17 = vsyncpa [#allocation8], 0 }
   0x3   :  { %18 = vsyncpa [#allocation11], 0  ;;  %s1562_s13 = smov 0  }
   0x4 LB: > { %s299_s16 = sshll.u32 %s1741_s3, 4  ;;  %s1571_s17 = sadd.s32 4294967295, %s1488_s13   ;;  %s1488_s13 = sphi %s1562_s13, %s24_s13   ;;  %s300_s16 = int_to_ptr.hbm [resolvable:$true] %s299_s16 }
   0x5   : > { %p1100_p0 = scmp.ge.s32.totalorder %s1488_s13, 1  ;;  %p275_p1 = scmp.lt.s32.totalorder %s1488_s13, 3 }
   0x6   : > { %p1190_p2 = scmp.eq.s32.totalorder %s1571_s17, 0  ;;  %s1490_s19 = smov [#allocation4]  }
   0x7   : > { %p1576_p3 = pnand %p1100_p0, %p275_p1  ;;  %s301_s20 = sshll.u32 %s1490_s19, 4  ;;  %s302_s20 = int_to_ptr.vmem [resolvable:$true] %s301_s20 }
   0x8   : > { %s325_s23 = sshll.u32 %s1744_s6, 4  ;;  %s1491_s25 = smov [#allocation7]   ;;  %s326_s23 = int_to_ptr.hbm [resolvable:$true] %s325_s23 }
   0x9   : > { %p1168_p4 = pneg %p1576_p3  ;;  %s327_s26 = sshll.u32 %s1491_s25, 4  ;;  %s328_s26 = int_to_ptr.vmem [resolvable:$true] %s327_s26 }
   0xa   : > { %s351_s29 = sshll.u32 %s1746_s8, 4  ;;  %s1492_s30 = smov 128   ;;  %s352_s29 = int_to_ptr.hbm [resolvable:$true] %s351_s29 }
   0xb   : > { %p1587_p5 = pnand %p1190_p2, %p1168_p4  ;;  %s1493_s11 = smov 8  }
   0xc   : > { %s1494_s12 = smov [#allocation10]   ;;  %s287_s21 = sshll.u32 %s1740_s2, 4  ;;  %s288_s21 = int_to_ptr.hbm [resolvable:$true] %s287_s21 }
   0xd   : > { %1174 = dma.hbm_to_vmem [thread:$0]  (!%p1587_p5), %s300_s16, 16, %s302_s20, [#allocation5]  }
   0xe   : > { %1180 = dma.hbm_to_vmem [thread:$0]  (!%p1587_p5), %s326_s23, 1024, %s328_s26, [#allocation8], %s1492_s30, %s1492_s30, %s1493_s11  }
   0xf   : > { %s353_s14 = sshll.u32 %s1494_s12, 4  ;;  %s314_s16 = sshll.u32 %s1743_s5, 4  ;;  %s354_s14 = int_to_ptr.vmem [resolvable:$true] %s353_s14  ;;  %s315_s16 = int_to_ptr.hbm [resolvable:$true] %s314_s16 }
  0x10   : > { %1186 = dma.hbm_to_vmem [thread:$0]  (!%p1587_p5), %s352_s29, 1024, %s354_s14, [#allocation11], %s1492_s30, %s1492_s30, %s1493_s11  }
  0x11   : > { %s1495_s20 = smov [#allocation2]   ;;  %s1496_s23 = smov [#allocation6]  }
  0x12   : > { %s289_s27 = sshll.u32 %s1495_s20, 4  ;;  %s316_s26 = sshll.u32 %s1496_s23, 4  ;;  %s290_s27 = int_to_ptr.vmem [resolvable:$true] %s289_s27  ;;  %s317_s26 = int_to_ptr.vmem [resolvable:$true] %s316_s26 }
  0x13   : > { %1171 = dma.hbm_to_vmem [thread:$0]  (!%p1587_p5), %s288_s21, 16, %s290_s27, [#allocation3]  }
  0x14   : > { %s340_s15 = sshll.u32 %s1745_s7, 4  ;;  %s366_s11 = sshll.u32 %s1747_s9, 4  ;;  %s341_s15 = int_to_ptr.hbm [resolvable:$true] %s340_s15  ;;  %s367_s11 = int_to_ptr.hbm [resolvable:$true] %s366_s11 }
  0x15   : > { %1177 = dma.hbm_to_vmem [thread:$0]  (!%p1587_p5), %s315_s16, 16, %s317_s26, [#allocation5]  }
  0x16   : > { %s1497_s14 = smov [#allocation9]   ;;  %s1498_s21 = smov [#allocation12]  }
  0x17   : > { %s342_s19 = sshll.u32 %s1497_s14, 4  ;;  %s368_s22 = sshll.u32 %s1498_s21, 4  ;;  %s343_s19 = int_to_ptr.vmem [resolvable:$true] %s342_s19  ;;  %s369_s22 = int_to_ptr.vmem [resolvable:$true] %s368_s22 }
  0x18   : > { %1183 = dma.hbm_to_vmem [thread:$0]  (!%p1587_p5), %s341_s15, 16, %s343_s19, [#allocation8]  }
  0x19   : > { %1189 = dma.hbm_to_vmem [thread:$0]  (!%p1587_p5), %s367_s11, 16, %s369_s22, [#allocation11]  }
  0x1a   : > { %395 = sbr.rel (%p1576_p3) target bundleno = 1895 (0x767), region = 60 }
  0x1f   : > { %1471 = dma.done.wait (%p1190_p2), [#allocation3], 16  }
  0x20   : > { %1473 = vsyncadd (%p1190_p2), [#allocation3], 4294967280 }
  0x21   : > { %1475 = dma.done.wait (%p1190_p2), [#allocation5], 32  }
  0x22   : > { %1477 = vsyncadd (%p1190_p2), [#allocation5], 4294967264 }
  0x23   : > { %1479 = dma.done.wait (%p1190_p2), [#allocation8], 1040  }
  0x24   : > { %1481 = vsyncadd (%p1190_p2), [#allocation8], 4294966256 }
  0x25   : > { %1483 = dma.done.wait (%p1190_p2), [#allocation11], 1040  }
  0x26   : > { %1485 = vsyncadd (%p1190_p2), [#allocation11], 4294966256  ;;  %p466_p6 = scmp.lt.s32.totalorder %s1571_s17, 1  ;;  %vm481_vm0 = vcmask 523264   ;;  %v1499_v2 = vmov 64.0   ;;  %v530_v14 = vld [vmem:[%s1742_s4 + $0x38] sm:$0xff] }
  0x27   : > { %1234 = vrcp.f32 %v1499_v2  ;;  %v539_v15 = vld [vmem:[#allocation7 + $0x38] sm:$0xff]  ;;  %v529_v16 = vld [vmem:[%s1742_s4 + $0x30] sm:$0xff]  ;;  %564 = vmatpush.msra.mxu0 %v530_v14  ;;  %v528_v18 = vld [vmem:[%s1742_s4 + $0x28] sm:$0xff]  ;;  %vm600_vm4 = vcmask 130048   ;;  %s1500_s25 = smov 64   ;;  %s1503_s20 = smov 80  }
  0x28   : > { %s1752_s17 = smov (!%p466_p6, %s1571_s17), 1  ;;  %587 = vmatpush.msra.mxu1 %v539_v15  ;;  %v538_v17 = vld [vmem:[#allocation7 + $0x30] sm:$0xff]  ;;  %v537_v19 = vld [vmem:[#allocation7 + $0x28] sm:$0xff]  ;;  %v527_v20 = vld [vmem:[%s1742_s4 + $0x20] sm:$0xff]  ;;  %vm628_vm6 = vcmask 64512   ;;  %s1504_s28 = smov 48  }
  0x29   : > { %s1640_s18 = sshll.u32 %s1752_s17, 3  ;;  %565 = vmatpush.msra.mxu0 %v529_v16  ;;  %v536_v21 = vld [vmem:[#allocation7 + $0x20] sm:$0xff]  ;;  %v526_v22 = vld [vmem:[%s1742_s4 + $0x18] sm:$0xff]  ;;  %v525_v24 = vld [vmem:[%s1742_s4 + $0x10] sm:$0xff]  ;;  %s1502_s17 = smov 96  }
  0x2a   : > { %s469_s16 = scalar_lea.vmem %s1738_s0, %s1640_s18  ;;  %588 = vmatpush.msra.mxu1 %v538_v17  ;;  %v535_v23 = vld [vmem:[#allocation7 + $0x18] sm:$0xff]  ;;  %v534_v25 = vld [vmem:[#allocation7 + $0x10] sm:$0xff]  ;;  %v524_v26 = vld [vmem:[%s1742_s4 + $0x8] sm:$0xff]  ;;  %s473_s26 = scalar_lea.vmem %s1739_s1, %s1640_s18 }
  0x2b   : > { %v1646_v0 = vld [vmem:[%s469_s16] sm:$0xff]  ;;  %566 = vmatpush.msra.mxu0 %v528_v18  ;;  %v533_v27 = vld [vmem:[#allocation7 + $0x8] sm:$0xff]  ;;  %s1501_s16 = smov 112   ;;  %s1505_s12 = smov 32  }
  0x2c   : > { %v482_v1 = vsel %vm481_vm0, %v1646_v0, 0.0  ;;  %589 = vmatpush.msra.mxu1 %v537_v19  ;;  %v523_v28 = vld [vmem:[%s1742_s4] sm:$0xff]  ;;  %v542_v19 = vld [vmem:[#allocation10 + $0x8] sm:$0xff]  ;;  %s1506_s15 = smov 16   ;;  %s477_s11 = scalar_lea.vmem %s1748_s10, %s1640_s18 }
  0x2d   : > { %483 = vadd.xlane.f32.xlu0 %v482_v1  ;;  %v1235_v3 = vpop.eup %1234  ;;  %567 = vmatpush.msra.mxu0 %v527_v20  ;;  %v532_v29 = vld [vmem:[#allocation7] sm:$0xff]  ;;  %v1229_v43 = vld [vmem:[#allocation2] ss:$0 sm:$0xff]  ;;  %v1230_v45 = vld [vmem:[#allocation4] ss:$0 sm:$0xff] }
  0x2e   : > { %v486_v4 = vmul.f32 64.0, %v1235_v3  ;;  %vm490_vm1 = vweird.f32 %v1235_v3  ;;  %590 = vmatpush.msra.mxu1 %v536_v21  ;;  %v1231_v49 = vld [vmem:[#allocation6] ss:$0 sm:$0xff]  ;;  %v1232_v50 = vld [vmem:[#allocation9] ss:$0 sm:$0xff]  ;;  %v541_v20 = vld [vmem:[#allocation10] sm:$0xff] }
  0x2f   : > { %568 = vmatpush.msra.mxu0 %v526_v22  ;;  %v1694_v59 = vld [vmem:[%s473_s26] sm:$0xff] }
  0x30   : > { %v487_v5 = vsub.f32 1.0, %v486_v4  ;;  %591 = vmatpush.msra.mxu1 %v535_v23  ;;  %vm599_vm5 = vcmp.ne.f32.partialorder %v1694_v59, 0.0  ;;  %v544_v22 = vld [vmem:[#allocation10 + $0x18] sm:$0xff]  ;;  %v547_v59 = vld [vmem:[#allocation10 + $0x30] sm:$0xff] }
  0x31   : > { %569 = vmatpush.msra.mxu0 %v525_v24 }
  0x32   : > { %v488_v6 = vmul.f32 %v1235_v3, %v487_v5  ;;  %592 = vmatpush.msra.mxu1 %v534_v25 }
  0x33   : > { %570 = vmatpush.msra.mxu0 %v524_v26 }
  0x34   : > { %v489_v7 = vadd.f32 %v1235_v3, %v488_v6  ;;  %593 = vmatpush.msra.mxu1 %v533_v27 }
  0x35   : > { %571 = vmatpush.msra.mxu0 %v523_v28 }
  0x36   : > { %v491_v8 = vsel %vm490_vm1, %v1235_v3, %v489_v7  ;;  %594 = vmatpush.msra.mxu1 %v532_v29 }
  0xa0   : > { %v484_v9 = vpop.xlane.xlu0 %483 }
  0xa1   : > { %v492_v10 = vmul.f32 %v491_v8, %v484_v9 }
  0xa3   : > { %v493_v11 = vsub.f32 %v1646_v0, %v492_v10 }
  0xa5   : > { %v494_v12 = vmul.f32 %v493_v11, %v493_v11  ;;  %v516_v44 = vmul.f32 %v1229_v43, %v493_v11 }
  0xa7   : > { %v495_v13 = vsel %vm481_vm0, %v494_v12, 0.0 }
  0xa8   : > { %496 = vadd.xlane.f32.xlu0 %v495_v13 }
 0x11b   : > { %v497_v30 = vpop.xlane.xlu0 %496 }
 0x11c   : > { %v498_v31 = vmul.f32 0.015873017, %v497_v30  ;;  %v543_v30 = vld [vmem:[#allocation10 + $0x10] sm:$0xff] }
 0x11e   : > { %1236 = vrsqrt.f32 %v498_v31  ;;  %vm506_vm2 = vcmp.eq.f32.partialorder %v498_v31, inf  ;;  %v509_v39 = vand.u32 2147483648, %v498_v31  ;;  %vm508_vm3 = vcmp.eq.f32.partialorder %v498_v31, 0.0 }
 0x124   : > { %v1237_v32 = vpop.eup %1236 }
 0x125   : > { %v500_v33 = vmul.f32 %v1237_v32, %v498_v31 }
 0x127   : > { %v501_v34 = vmul.f32 %v1237_v32, %v500_v33 }
 0x129   : > { %v502_v35 = vmul.f32 0.5, %v501_v34 }
 0x12b   : > { %v503_v36 = vsub.f32 1.5, %v502_v35 }
 0x12d   : > { %v504_v37 = vmul.f32 %v1237_v32, %v503_v36 }
 0x12f   : > { %v505_v38 = vmul.f32 %v504_v37, %v498_v31 }
 0x131   : > { %v507_v40 = vsel %vm506_vm2, %v498_v31, %v505_v38 }
 0x132   : > { %v510_v41 = vsel %vm508_vm3, %v509_v39, %v507_v40 }
 0x133   : > { %v511_v42 = vadd.f32 1e-06, %v510_v41 }
 0x135   : > { %1238 = vrcp.f32 %v511_v42 }
 0x13b   : > { %v1239_v46 = vpop.eup %1238 }
 0x13c   : > { %v517_v47 = vmul.f32 %v1239_v46, %v516_v44 }
 0x13e   : > { %v521_v48 = vadd.f32 %v1230_v45, %v517_v47 }
 0x140   : > { %1120 = vmatmul.msk.f32.vlgmr.msra.gmra.mxu0 %vm481_vm0, %v521_v48  ;;  %1121 = vmatmul.msk.f32.vlgmr.msra.gmra.mxu1 %vm481_vm0, %v521_v48 }
 0x1bd   : > { %v573_v51 = vpop.f32.mrf.mxu0  ;;  %v596_v52 = vpop.f32.mrf.mxu1 }
 0x1be   : > { %v574_v53 = vadd.f32 %v1231_v49, %v573_v51  ;;  %v1678_v54 = vadd.f32 %v1232_v50, %v596_v52  ;;  %v546_v50 = vld [vmem:[#allocation10 + $0x28] sm:$0xff]  ;;  %v545_v51 = vld [vmem:[#allocation10 + $0x20] sm:$0xff]  ;;  %v548_v52 = vld [vmem:[#allocation10 + $0x38] sm:$0xff] }
 0x1c0   : > { %640 = vrot.lane.b32.xlu2 %v1678_v54, %s1500_s25  ;;  %1122 = vmatpush.xpose.msk.msra.mxu2 %vm600_vm4, %v1678_v54 }
 0x1c1   : > { %666 = vrot.lane.b32.xlu0 %v574_v53, %s1501_s16 }
 0x1c3   : > { %1123 = vmatmul.msk.f32.vlgmr.msra.gmra.mxu2 %vm600_vm4, %v574_v53 }
 0x1c8   : > { %668 = vrot.lane.b32.xlu2 %v1678_v54, %s1501_s16 }
 0x1c9   : > { %780 = vrot.lane.b32.xlu0 %v1678_v54, %s1502_s17 }
 0x1d1   : > { %870 = vrot.lane.b32.xlu0 %v1678_v54, %s1503_s20 }
 0x1d9   : > { %868 = vrot.lane.b32.xlu0 %v574_v53, %s1503_s20 }
 0x21a   : > { %v641_v55 = vpop.permute.xlu2 %640 }
 0x21b   : > { %661 = vmatpush.msra.mxu3 %v641_v55 }
 0x222   : > { %v669_v56 = vpop.permute.xlu2 %668 }
 0x223   : > { %1125 = vmatpush.xpose.msk.msrb.mxu3 %vm600_vm4, %v669_v56 }
 0x233   : > { %v667_v57 = vpop.permute.xlu0 %666 }
 0x23b   : > { %v781_v58 = vpop.permute.xlu0 %780 }
 0x23c   : > { %1130 = vmatpush.xpose.msk.msrb.mxu0 %vm600_vm4, %v781_v58 }
 0x243   : > { %v871_v25 = vpop.permute.xlu0 %870 }
 0x246   : > { %v624_v60 = vpop.f32.mrf.mxu2 }
 0x247   : > { %v627_v61 = vsel %vm599_vm5, %v624_v60, -1e+09 }
 0x248   : > { %v629_v62 = vsel %vm628_vm6, %v627_v61, -inf }
 0x249   : > { %630 = vmax.xlane.f32.xlu1 %v629_v62 }
 0x24b   : > { %v869_v26 = vpop.permute.xlu0 %868 }
 0x2bc   : > { %v631_v63 = vpop.xlane.xlu1 %630 }
 0x2bd   : > { %v632_v1 = vsub.f32 %v627_v61, %v631_v63 }
 0x2bf   : > { %v633_v2 = vmul.f32 1.442695, %v632_v1 }
 0x2c1   : > { %1240 = vpow2.f32 %v633_v2 }
 0x2c7   : > { %v1241_v3 = vpop.eup %1240 }
 0x2c8   : > { %v635_v4 = vsel %vm628_vm6, %v1241_v3, 0.0 }
 0x2c9   : > { %636 = vadd.xlane.f32.xlu1 %v635_v4 }
 0x33c   : > { %v637_v5 = vpop.xlane.xlu1 %636 }
 0x33d   : > { %1242 = vrcp.f32 %v637_v5 }
 0x343   : > { %v1243_v6 = vpop.eup %1242 }
 0x344   : > { %v639_v7 = vmul.f32 %v1243_v6, %v1241_v3  ;;  %v1233_v3 = vld [vmem:[#allocation12] ss:$0 sm:$0xff] }
 0x346   : > { %1124 = vmatmul.msk.f32.vlgmr.msra.gmra.mxu3 %vm628_vm6, %v639_v7 }
 0x347   : > { %749 = vmatpush.msra.mxu3 %v544_v22 }
 0x349   : > { %750 = vmatpush.msra.mxu3 %v543_v30 }
 0x34e   : > { %1126 = vmatmul.msk.f32.vlgmr.msrb.gmra.mxu3 %vm600_vm4, %v667_v57 }
 0x34f   : > { %861 = vmatpush.msrb.mxu3 %v546_v50 }
 0x351   : > { %862 = vmatpush.msrb.mxu3 %v545_v51 }
 0x3c9   : > { %v663_v8 = vpop.f32.mrf.mxu3 }
 0x3d1   : > { %v691_v9 = vpop.f32.mrf.mxu3 }
 0x3d2   : > { %v694_v10 = vsel %vm599_vm5, %v691_v9, -1e+09 }
 0x3d3   : > { %v695_v11 = vsel %vm628_vm6, %v694_v10, -inf }
 0x3d4   : > { %696 = vmax.xlane.f32.xlu1 %v695_v11 }
 0x3ed   : > { %706 = vrot.lane.b32.xlu1 %v1678_v54, %s1504_s28 }
 0x3f5   : > { %778 = vrot.lane.b32.xlu1 %v574_v53, %s1502_s17 }
 0x447   : > { %v697_v12 = vpop.xlane.xlu1 %696 }
 0x448   : > { %v698_v13 = vsub.f32 %v694_v10, %v697_v12 }
 0x44a   : > { %v699_v14 = vmul.f32 1.442695, %v698_v13 }
 0x44c   : > { %1244 = vpow2.f32 %v699_v14 }
 0x452   : > { %v1245_v15 = vpop.eup %1244 }
 0x453   : > { %v701_v16 = vsel %vm628_vm6, %v1245_v15, 0.0 }
 0x454   : > { %702 = vadd.xlane.f32.xlu2 %v701_v16 }
 0x45f   : > { %v707_v17 = vpop.permute.xlu1 %706 }
 0x460   : > { %727 = vmatpush.msrb.mxu2 %v707_v17 }
 0x462   : > { %772 = vmatpush.msra.mxu2 %v542_v19 }
 0x464   : > { %773 = vmatpush.msra.mxu2 %v541_v20 }
 0x467   : > { %v779_v18 = vpop.permute.xlu1 %778 }
 0x468   : > { %1131 = vmatmul.msk.f32.vlgmr.msrb.gmra.mxu0 %vm600_vm4, %v779_v18 }
 0x4c7   : > { %v703_v21 = vpop.xlane.xlu2 %702 }
 0x4c8   : > { %1246 = vrcp.f32 %v703_v21 }
 0x4ce   : > { %v1247_v23 = vpop.eup %1246 }
 0x4cf   : > { %v705_v24 = vmul.f32 %v1247_v23, %v1245_v15 }
 0x4d1   : > { %1127 = vmatmul.msk.f32.vlgmr.msrb.gmra.mxu2 %vm628_vm6, %v705_v24 }
 0x4d2   : > { %1134 = vmatpush.xpose.msk.msrb.mxu2 %vm600_vm4, %v871_v25 }
 0x4d9   : > { %1129 = vmatmul.msk.f32.vlgmr.msra.gmra.mxu2 %vm600_vm4, %v663_v8 }
 0x4e1   : > { %1135 = vmatmul.msk.f32.vlgmr.msrb.gmra.mxu2 %vm600_vm4, %v869_v26 }
 0x4e5   : > { %v803_v27 = vpop.f32.mrf.mxu0 }
 0x4e6   : > { %v806_v28 = vsel %vm599_vm5, %v803_v27, -1e+09 }
 0x4e7   : > { %v807_v29 = vsel %vm628_vm6, %v806_v28, -inf }
 0x4e8   : > { %808 = vmax.xlane.f32.xlu1 %v807_v29 }
 0x554   : > { %v729_v31 = vpop.f32.mrf.mxu2 }
 0x555   : > { %1128 = vmatmul.msk.f32.vlgmr.msra.gmra.mxu3 %vm600_vm4, %v729_v31 }
 0x55b   : > { %v809_v32 = vpop.xlane.xlu1 %808 }
 0x55c   : > { %v810_v33 = vsub.f32 %v806_v28, %v809_v32  ;;  %v775_v34 = vpop.f32.mrf.mxu2 }
 0x55e   : > { %v811_v35 = vmul.f32 1.442695, %v810_v33 }
 0x560   : > { %1248 = vpow2.f32 %v811_v35 }
 0x564   : > { %v893_v36 = vpop.f32.mrf.mxu2 }
 0x565   : > { %v896_v37 = vsel %vm599_vm5, %v893_v36, -1e+09 }
 0x566   : > { %v1249_v38 = vpop.eup %1248  ;;  %v897_v39 = vsel %vm628_vm6, %v896_v37, -inf }
 0x567   : > { %898 = vmax.xlane.f32.xlu2 %v897_v39  ;;  %v813_v40 = vsel %vm628_vm6, %v1249_v38, 0.0 }
 0x568   : > { %814 = vadd.xlane.f32.xlu0 %v813_v40 }
 0x57f   : > { %818 = vrot.lane.b32.xlu2 %v1678_v54, %s1505_s12 }
 0x5d8   : > { %v752_v60 = vpop.f32.mrf.mxu3 }
 0x5d9   : > { %v776_v62 = vadd.f32 %v775_v34, %v752_v60 }
 0x5da   : > { %v899_v41 = vpop.xlane.xlu2 %898 }
 0x5db   : > { %v900_v42 = vsub.f32 %v896_v37, %v899_v41  ;;  %v815_v43 = vpop.xlane.xlu0 %814 }
 0x5dc   : > { %1250 = vrcp.f32 %v815_v43 }
 0x5dd   : > { %v901_v44 = vmul.f32 1.442695, %v900_v42 }
 0x5df   : > { %1252 = vpow2.f32 %v901_v44 }
 0x5e2   : > { %v1251_v45 = vpop.eup %1250  ;;  %v819_v46 = vpop.permute.xlu2 %818 }
 0x5e3   : > { %v817_v47 = vmul.f32 %v1251_v45, %v1249_v38  ;;  %839 = vmatpush.msrb.mxu1 %v819_v46 }
 0x5e5   : > { %v1253_v48 = vpop.eup %1252  ;;  %1132 = vmatmul.msk.f32.vlgmr.msrb.gmra.mxu1 %vm628_vm6, %v817_v47 }
 0x5e6   : > { %v903_v49 = vsel %vm628_vm6, %v1253_v48, 0.0  ;;  %951 = vmatpush.msra.mxu1 %v548_v52 }
 0x5e7   : > { %904 = vadd.xlane.f32.xlu2 %v903_v49 }
 0x5e8   : > { %952 = vmatpush.msra.mxu1 %v547_v59 }
 0x5ff   : > { %908 = vrot.lane.b32.xlu2 %v1678_v54, %s1506_s15 }
 0x65a   : > { %v905_v53 = vpop.xlane.xlu2 %904 }
 0x65b   : > { %1254 = vrcp.f32 %v905_v53 }
 0x661   : > { %v1255_v55 = vpop.eup %1254 }
 0x662   : > { %v907_v56 = vmul.f32 %v1255_v55, %v1253_v48  ;;  %v909_v57 = vpop.permute.xlu2 %908  ;;  %v841_v58 = vpop.f32.mrf.mxu1 }
 0x663   : > { %1133 = vmatmul.msk.f32.vlgmr.msrb.gmra.mxu3 %vm600_vm4, %v841_v58  ;;  %929 = vmatpush.msra.mxu0 %v909_v57 }
 0x664   : > { %1136 = vmatmul.msk.f32.vlgmr.msra.gmra.mxu0 %vm628_vm6, %v907_v56 }
 0x6e1   : > { %v931_v54 = vpop.f32.mrf.mxu0 }
 0x6e2   : > { %1137 = vmatmul.msk.f32.vlgmr.msra.gmra.mxu1 %vm600_vm4, %v931_v54 }
 0x6e6   : > { %v864_v61 = vpop.f32.mrf.mxu3 }
 0x6e7   : > { %v867_v63 = vadd.f32 %v864_v61, %v776_v62 }
 0x75f   : > { %v954_v1 = vpop.f32.mrf.mxu1 }
 0x760   : > { %v957_v2 = vadd.f32 %v954_v1, %v867_v63 }
 0x762   : > { %v958_v4 = vadd.f32 %v957_v2, %v1646_v0 }
 0x764   : > { %v962_v5 = vadd.f32 %v1233_v3, %v958_v4 }
 0x766   : > { %963 = vst.msk [vmem:[%s477_s11] sm:$0xff] %vm481_vm0, %v962_v5 }
 0x767 PF: > { %s24_s13 = sadd.s32 1, %s1488_s13  }
 0x768   : > { %p21_p7 = scmp.ge.s32.totalorder %s24_s13, 4  }
 0x76a   :  { %23 = sbr.rel (!%p21_p7) target bundleno = 4 (0x4), region = 122 }
 0x76f   :  { %983 = vsyncpa [#allocation3], 1 }
 0x770   :  { %985 = vsyncpa [#allocation3 + $0x1], 1 }
 0x771   :  { %986 = vsyncpa [#allocation5], 1 }
 0x772   :  { %987 = vsyncpa [#allocation8], 1 }
 0x773   :  { %988 = vsyncpa [#allocation11], 1 }

// kernel: individual_tf_forward.27
= control target key start
LH: loop header
LB: loop body
LE: loop exit
PB: predicated region body
PF: predicated region fallthrough
CT: control target
= control target key end

     0   :  { %vm24_vm0 = vcmask 523264   ;;  %v164_v4 = vmov 64.0   ;;  %vm133_vm6 = vcmask 23552   ;;  %s252_s0 = inlined_call_operand.vmem [shape: f32[16,64], index: 0, kind: input, shape index: {}]   ;;  %s253_s1 = inlined_call_operand.vmem [shape: f32[1,64], index: 1, kind: input, shape index: {}]   ;;  %s254_s2 = inlined_call_operand.vmem [shape: f32[1,64], index: 2, kind: input, shape index: {}]   ;;  %s255_s4 = inlined_call_operand.vmem [shape: f32[1,3], index: 4, kind: input, shape index: {}]   ;;  %s256_s3 = inlined_call_operand.vmem [shape: f32[64,3], index: 3, kind: input, shape index: {}]   ;;  %s257_s5 = inlined_call_operand.vmem [shape: f32[16,3], index: 5, kind: output, shape index: {}]  }
   0x1   :  { %v20_v0 = vld [vmem:[%s252_s0] sm:$0xff]  ;;  %v21_v2 = vld [vmem:[%s252_s0 + $0x8] sm:$0xff]  ;;  %154 = vrcp.f32 %v164_v4  ;;  %v99_v24 = vld [vmem:[%s256_s3 + $0x38] sm:$0xff] }
   0x2   :  { %v25_v1 = vsel %vm24_vm0, %v20_v0, 0.0  ;;  %v28_v3 = vsel %vm24_vm0, %v21_v2, 0.0  ;;  %v151_v12 = vld [vmem:[%s253_s1] ss:$0 sm:$0xff]  ;;  %v98_v25 = vld [vmem:[%s256_s3 + $0x30] sm:$0xff]  ;;  %118 = vmatpush.msra.mxu0 %v99_v24  ;;  %142 = vmatpush.msra.mxu1 %v99_v24  ;;  %v97_v26 = vld [vmem:[%s256_s3 + $0x28] sm:$0xff] }
   0x3   :  { %26 = vadd.xlane.f32.xlu0 %v25_v1  ;;  %v96_v27 = vld [vmem:[%s256_s3 + $0x20] sm:$0xff]  ;;  %v95_v28 = vld [vmem:[%s256_s3 + $0x18] sm:$0xff]  ;;  %v94_v29 = vld [vmem:[%s256_s3 + $0x10] sm:$0xff] }
   0x4   :  { %119 = vmatpush.msra.mxu0 %v98_v25  ;;  %143 = vmatpush.msra.mxu1 %v98_v25  ;;  %v93_v30 = vld [vmem:[%s256_s3 + $0x8] sm:$0xff]  ;;  %v92_v31 = vld [vmem:[%s256_s3] sm:$0xff] }
   0x5   :  { %v152_v56 = vld [vmem:[%s254_s2] ss:$0 sm:$0xff] }
   0x6   :  { %120 = vmatpush.msra.mxu0 %v97_v26  ;;  %144 = vmatpush.msra.mxu1 %v97_v26  ;;  %v153_v1 = vld [vmem:[%s255_s4] ss:$0 sm:$0xff] }
   0x7   :  { %v155_v5 = vpop.eup %154 }
   0x8   :  { %v32_v6 = vmul.f32 64.0, %v155_v5  ;;  %vm36_vm1 = vweird.f32 %v155_v5  ;;  %121 = vmatpush.msra.mxu0 %v96_v27  ;;  %145 = vmatpush.msra.mxu1 %v96_v27 }
   0xa   :  { %v33_v7 = vsub.f32 1.0, %v32_v6  ;;  %122 = vmatpush.msra.mxu0 %v95_v28  ;;  %146 = vmatpush.msra.mxu1 %v95_v28 }
   0xb   :  { %29 = vadd.xlane.f32.xlu0 %v28_v3 }
   0xc   :  { %v34_v8 = vmul.f32 %v155_v5, %v33_v7  ;;  %123 = vmatpush.msra.mxu0 %v94_v29  ;;  %147 = vmatpush.msra.mxu1 %v94_v29 }
   0xe   :  { %v35_v9 = vadd.f32 %v155_v5, %v34_v8  ;;  %124 = vmatpush.msra.mxu0 %v93_v30  ;;  %148 = vmatpush.msra.mxu1 %v93_v30 }
  0x10   :  { %v37_v10 = vsel %vm36_vm1, %v155_v5, %v35_v9  ;;  %125 = vmatpush.msra.mxu0 %v92_v31  ;;  %149 = vmatpush.msra.mxu1 %v92_v31 }
  0x76   :  { %v27_v11 = vpop.xlane.xlu0 %26 }
  0x77   :  { %v38_v13 = vmul.f32 %v37_v10, %v27_v11 }
  0x79   :  { %v40_v14 = vsub.f32 %v20_v0, %v38_v13 }
  0x7b   :  { %v206_v15 = vmul.f32 %v151_v12, %v40_v14  ;;  %v42_v16 = vmul.f32 %v40_v14, %v40_v14 }
  0x7d   :  { %v44_v17 = vsel %vm24_vm0, %v42_v16, 0.0 }
  0x7e   :  { %45 = vadd.xlane.f32.xlu1 %v44_v17  ;;  %v30_v18 = vpop.xlane.xlu0 %29 }
  0x7f   :  { %v39_v19 = vmul.f32 %v37_v10, %v30_v18 }
  0x81   :  { %v41_v20 = vsub.f32 %v21_v2, %v39_v19 }
  0x83   :  { %v209_v21 = vmul.f32 %v151_v12, %v41_v20  ;;  %v43_v22 = vmul.f32 %v41_v20, %v41_v20 }
  0x85   :  { %v47_v23 = vsel %vm24_vm0, %v43_v22, 0.0 }
  0x86   :  { %48 = vadd.xlane.f32.xlu1 %v47_v23 }
  0xf1   :  { %v46_v32 = vpop.xlane.xlu1 %45 }
  0xf2   :  { %v50_v33 = vmul.f32 0.015873017, %v46_v32 }
  0xf4   :  { %156 = vrsqrt.f32 %v50_v33  ;;  %vm59_vm2 = vcmp.eq.f32.partialorder %v50_v33, inf  ;;  %v62_v46 = vand.u32 2147483648, %v50_v33  ;;  %vm61_vm3 = vcmp.eq.f32.partialorder %v50_v33, 0.0 }
  0xf9   :  { %v49_v34 = vpop.xlane.xlu1 %48 }
  0xfa   :  { %v157_v35 = vpop.eup %156  ;;  %v51_v36 = vmul.f32 0.015873017, %v49_v34 }
  0xfb   :  { %v53_v37 = vmul.f32 %v157_v35, %v50_v33 }
  0xfc   :  { %158 = vrsqrt.f32 %v51_v36  ;;  %vm71_vm4 = vcmp.eq.f32.partialorder %v51_v36, inf  ;;  %v74_v54 = vand.u32 2147483648, %v51_v36  ;;  %vm73_vm5 = vcmp.eq.f32.partialorder %v51_v36, 0.0 }
  0xfd   :  { %v54_v38 = vmul.f32 %v157_v35, %v53_v37 }
  0xff   :  { %v55_v39 = vmul.f32 0.5, %v54_v38 }
 0x101   :  { %v56_v40 = vsub.f32 1.5, %v55_v39 }
 0x102   :  { %v159_v41 = vpop.eup %158 }
 0x103   :  { %v65_v42 = vmul.f32 %v159_v41, %v51_v36  ;;  %v57_v43 = vmul.f32 %v157_v35, %v56_v40 }
 0x105   :  { %v58_v44 = vmul.f32 %v57_v43, %v50_v33  ;;  %v66_v45 = vmul.f32 %v159_v41, %v65_v42 }
 0x107   :  { %v60_v47 = vsel %vm59_vm2, %v50_v33, %v58_v44  ;;  %v67_v48 = vmul.f32 0.5, %v66_v45 }
 0x108   :  { %v63_v49 = vsel %vm61_vm3, %v62_v46, %v60_v47 }
 0x109   :  { %v76_v50 = vadd.f32 1e-06, %v63_v49  ;;  %v68_v51 = vsub.f32 1.5, %v67_v48 }
 0x10b   :  { %160 = vrcp.f32 %v76_v50  ;;  %v69_v52 = vmul.f32 %v159_v41, %v68_v51 }
 0x10d   :  { %v70_v53 = vmul.f32 %v69_v52, %v51_v36 }
 0x10f   :  { %v72_v55 = vsel %vm71_vm4, %v51_v36, %v70_v53 }
 0x110   :  { %v75_v57 = vsel %vm73_vm5, %v74_v54, %v72_v55 }
 0x111   :  { %v161_v58 = vpop.eup %160  ;;  %v77_v59 = vadd.f32 1e-06, %v75_v57 }
 0x112   :  { %v85_v60 = vmul.f32 %v161_v58, %v206_v15 }
 0x113   :  { %162 = vrcp.f32 %v77_v59 }
 0x114   :  { %v90_v61 = vadd.f32 %v152_v56, %v85_v60 }
 0x116   :  { %140 = vmatmul.msk.f32.vlgmr.msra.gmra.mxu0 %vm24_vm0, %v90_v61 }
 0x119   :  { %v163_v62 = vpop.eup %162 }
 0x11a   :  { %v86_v63 = vmul.f32 %v163_v62, %v209_v21 }
 0x11c   :  { %v91_v0 = vadd.f32 %v152_v56, %v86_v63 }
 0x11e   :  { %141 = vmatmul.msk.f32.vlgmr.msra.gmra.mxu1 %vm24_vm0, %v91_v0 }
 0x193   :  { %v127_v2 = vpop.f32.mrf.mxu0 }
 0x194   :  { %v128_v3 = vadd.f32 %v153_v1, %v127_v2 }
 0x196   :  { %134 = vst.msk [vmem:[%s257_s5] sm:$0xff] %vm133_vm6, %v128_v3 }
 0x19b   :  { %v130_v4 = vpop.f32.mrf.mxu1 }
 0x19c   :  { %v131_v5 = vadd.f32 %v153_v1, %v130_v4 }
 0x19e   :  { %135 = vst.msk [vmem:[%s257_s5 + $0x8] sm:$0xff] %vm133_vm6, %v131_v5 }

</bundles_post_ra>
